<compile_context>
chip_gen: v6e
topology: v6e:2x2x1
jax: 0.10.0
libtpu: 0.0.40
codegen_flags: <defaults>
</compile_context>

<pallas_src>
import math
import functools

import jax
import jax.numpy as jnp
from jax import lax
from jax.experimental import pallas as pl
from jax.experimental.pallas import tpu as pltpu


def _im2col_3x3(xp, C, H, W):
    """xp: (C, H+2, W+2) zero-padded input -> (9*C, H*W), rows ordered (dy*3+dx, c)."""
    cols = [xp[:, dy:dy + H, dx:dx + W].reshape(C, H * W)
            for dy in range(3) for dx in range(3)]
    return jnp.concatenate(cols, axis=0)


def _fused_downscale_kernel(x_ref, w1_ref, b1_ref, w2_ref, b2_ref, o_ref,
                            xp1_ref, xp2_ref, *, H, W, slope, use_bf16):
    """One batch element of DownscaleBlock (both conv layers fused).

    x_ref  : (1, Cin, H, W)        NCHW input tile
    w1_ref : (Cout, 9*Cin)         scale folded in, columns in im2col order (tap, cin)
    b1_ref : (Cout, 1)
    w2_ref : (Cout, 9*Cout)
    b2_ref : (Cout, 1)
    o_ref  : (1, Cout, H*W)        lane-dense output (spatial on the lane axis)
    xp1_ref: (Cin,  H+2, W+2)      VMEM halo scratch for layer 1
    xp2_ref: (Cout, H+2, W+2)      VMEM halo scratch for layer 2
    """
    Cin = x_ref.shape[1]
    Cout = w1_ref.shape[0]

    def mm(w, a):
        # Optional bf16 operands (v6e/v7x MXU peak); accumulation stays f32.
        if use_bf16:
            w = w.astype(jnp.bfloat16)
            a = a.astype(jnp.bfloat16)
        return jnp.dot(w, a, preferred_element_type=jnp.float32)

    # ---- layer 1: zero halo scratch, write interior, single im2col matmul ----
    xp1_ref[...] = jnp.zeros_like(xp1_ref)
    xp1_ref[:, 1:H + 1, 1:W + 1] = x_ref[0].astype(jnp.float32)
    im1 = _im2col_3x3(xp1_ref[...], Cin, H, W)                  # (9*Cin, H*W)
    y1 = mm(w1_ref[...], im1) + b1_ref[...].astype(jnp.float32)  # (Cout, H*W)
    y1 = jnp.where(y1 >= 0, y1, slope * y1)                      # LeakyReLU(0.2)

    # ---- layer 2: intermediate never leaves VMEM ----
    xp2_ref[...] = jnp.zeros_like(xp2_ref)
    xp2_ref[:, 1:H + 1, 1:W + 1] = y1.reshape(Cout, H, W)
    im2 = _im2col_3x3(xp2_ref[...], Cout, H, W)                  # (9*Cout, H*W)
    y2 = mm(w2_ref[...], im2) + b2_ref[...].astype(jnp.float32)
    y2 = jnp.where(y2 >= 0, y2, slope * y2)

    o_ref[0] = y2.astype(o_ref.dtype)


def downscale_block(x_nchw, params, *, use_bf16=False):
    """Forward pass of DownscaleBlock. Input/output are NCHW, like PyTorch."""
    (w1, b1, s1), (w2, b2, s2) = params
    N, Cin, H, W = x_nchw.shape
    Cout = w1.shape[0]

    # Fold the equalized-LR scale into the weights and reorder (OIHW -> O,(ky,kx,I))
    # to match the im2col row ordering used in the kernel.
    w1m = (jnp.transpose(w1, (0, 2, 3, 1)).reshape(Cout, 9 * Cin)
           * jnp.float32(s1)).astype(jnp.float32)
    w2m = (jnp.transpose(w2, (0, 2, 3, 1)).reshape(Cout, 9 * Cout)
           * jnp.float32(s2)).astype(jnp.float32)
    b1c = b1.reshape(Cout, 1).astype(jnp.float32)
    b2c = b2.reshape(Cout, 1).astype(jnp.float32)

    kernel = functools.partial(_fused_downscale_kernel, H=H, W=W,
                               slope=0.2, use_bf16=use_bf16)

    # One whole image per grid step (batch is the parallel axis). For large
    # H*W*C (especially v7x's 64 MiB VMEM) this should switch to H-tiling with
    # a halo; at these shapes whole-image blocks fit comfortably.
    out_flat = pl.pallas_call(
        kernel,
        out_shape=jax.ShapeDtypeStruct((N, Cout, H * W), x_nchw.dtype),
        grid_spec=pltpu.PrefetchScalarGridSpec(
            num_scalar_prefetch=0,
            grid=(N,),
            in_specs=[
                pl.BlockSpec((1, Cin, H, W), lambda n: (n, 0, 0, 0)),
                pl.BlockSpec((Cout, 9 * Cin), lambda n: (0, 0)),
                pl.BlockSpec((Cout, 1), lambda n: (0, 0)),
                pl.BlockSpec((Cout, 9 * Cout), lambda n: (0, 0)),
                pl.BlockSpec((Cout, 1), lambda n: (0, 0)),
            ],
            out_specs=pl.BlockSpec((1, Cout, H * W), lambda n: (n, 0, 0)),
            scratch_shapes=[
                pltpu.VMEM((Cin, H + 2, W + 2), jnp.float32),
                pltpu.VMEM((Cout, H + 2, W + 2), jnp.float32),
            ],
        ),
        compiler_params=pltpu.CompilerParams(
            dimension_semantics=("parallel",),
            vmem_limit_bytes=64 * 1024 * 1024,
        ),
    )(x_nchw, w1m, b1c, w2m, b2c)

    # Trailing-dim reshape (free) back to NCHW — no transpose needed.
    return out_flat.reshape(N, Cout, H, W)


def kaiming_scale(fanin, activation_slope):
    return math.sqrt(2.0 / ((1 + activation_slope ** 2) * fanin))


def init_downscale_block(key, c_in, c_out):
    """Deterministic init mirroring ConstrainedLayer: weight ~ N(0,1), bias = 0."""
    k1, k2 = jax.random.split(key)
    slope = 0.2
    w1 = jax.random.normal(k1, (c_out, c_in, 3, 3), jnp.float32)
    b1 = jnp.zeros((c_out,), jnp.float32)
    s1 = kaiming_scale(c_in * 3 * 3, slope)
    w2 = jax.random.normal(k2, (c_out, c_out, 3, 3), jnp.float32)
    b2 = jnp.zeros((c_out,), jnp.float32)
    s2 = kaiming_scale(c_out * 3 * 3, slope)
    return ((w1, b1, s1), (w2, b2, s2))


def _reference(x_nchw, params):
    """Plain-JAX reference (NCHW conv), for a correctness sanity check."""
    def conv(x, w, b, scale, slope=0.2):
        y = lax.conv_general_dilated(
            x * scale, w, window_strides=(1, 1), padding="SAME",
            dimension_numbers=("NCHW", "OIHW", "NCHW"))
        y = y + b[None, :, None, None]
        return jnp.where(y >= 0, y, slope * y)
    (w1, b1, s1), (w2, b2, s2) = params
    return conv(conv(x_nchw, w1, b1, s1), w2, b2, s2)


if __name__ == "__main__":
    key = jax.random.PRNGKey(0)
    kx, kp = jax.random.split(key)

    N, C_IN, C_OUT, H, W = 2, 4, 8, 16, 16
    x = jax.random.normal(kx, (N, C_IN, H, W), jnp.float32)
    params = init_downscale_block(kp, C_IN, C_OUT)

    out = jax.block_until_ready(downscale_block(x, params))
    ref = jax.block_until_ready(_reference(x, params))

    assert out.shape == (N, C_OUT, H, W)
    assert jnp.allclose(out, ref, rtol=1e-4, atol=1e-4), \
        float(jnp.max(jnp.abs(out - ref)))

    print("KERNEL_OK")
</pallas_src>

<mosaic_0001>
module attributes {stable_mosaic.version = 11 : i64} {
  func.func @_fused_downscale_kernel(%arg0: i32, %arg1: memref<1x4x16x16xf32, #tpu.memory_space<vmem>>, %arg2: memref<8x36xf32, #tpu.memory_space<vmem>>, %arg3: memref<8x1xf32, #tpu.memory_space<vmem>>, %arg4: memref<8x72xf32, #tpu.memory_space<vmem>>, %arg5: memref<8x1xf32, #tpu.memory_space<vmem>>, %arg6: memref<1x8x256xf32, #tpu.memory_space<vmem>>, %arg7: memref<4x18x18xf32, #tpu.memory_space<vmem>>, %arg8: memref<8x18x18xf32, #tpu.memory_space<vmem>>) attributes {dimension_semantics = [#tpu.dimension_semantics<parallel>], iteration_bounds = array<i64: 2>, scalar_prefetch = 0 : i64, scratch_operands = 2 : i64, tpu.core_type = #tpu.core_type<tc>, window_params = [{transform_indices = @transform_0, window_bounds = array<i64: 1, 4, 16, 16>}, {pipeline_mode = #tpu.pipeline_mode<synchronous>, transform_indices = @transform_1, window_bounds = array<i64: 8, 36>}, {pipeline_mode = #tpu.pipeline_mode<synchronous>, transform_indices = @transform_2, window_bounds = array<i64: 8, 1>}, {pipeline_mode = #tpu.pipeline_mode<synchronous>, transform_indices = @transform_3, window_bounds = array<i64: 8, 72>}, {pipeline_mode = #tpu.pipeline_mode<synchronous>, transform_indices = @transform_4, window_bounds = array<i64: 8, 1>}, {transform_indices = @transform_5, window_bounds = array<i64: 1, 8, 256>}]} {
    %cst = arith.constant 0.000000e+00 : f32
    %0 = vector.broadcast %cst : f32 to vector<4x18x18xf32>
    %c0 = arith.constant 0 : index
    %c0_0 = arith.constant 0 : index
    %c0_1 = arith.constant 0 : index
    %1 = vector.load %arg7[%c0, %c0_0, %c0_1] : memref<4x18x18xf32, #tpu.memory_space<vmem>>, vector<4x18x18xf32>
    tpu.vector_store %arg7[%c0, %c0_0, %c0_1], %0 {strides = array<i32>} : memref<4x18x18xf32, #tpu.memory_space<vmem>>, vector<4x18x18xf32>,
    %c0_2 = arith.constant 0 : index
    %c0_3 = arith.constant 0 : index
    %c0_4 = arith.constant 0 : index
    %c0_5 = arith.constant 0 : index
    %2 = vector.load %arg1[%c0_2, %c0_3, %c0_4, %c0_5] : memref<1x4x16x16xf32, #tpu.memory_space<vmem>>, vector<1x4x16x16xf32>
    %3 = vector.shape_cast %2 : vector<1x4x16x16xf32> to vector<4x16x16xf32>
    %c0_6 = arith.constant 0 : index
    %c1 = arith.constant 1 : index
    %c1_7 = arith.constant 1 : index
    %4 = vector.load %arg7[%c0_6, %c1, %c1_7] : memref<4x18x18xf32, #tpu.memory_space<vmem>>, vector<4x16x16xf32>
    tpu.vector_store %arg7[%c0_6, %c1, %c1_7], %3 {strides = array<i32>} : memref<4x18x18xf32, #tpu.memory_space<vmem>>, vector<4x16x16xf32>,
    %c0_8 = arith.constant 0 : index
    %c0_9 = arith.constant 0 : index
    %c0_10 = arith.constant 0 : index
    %5 = vector.load %arg7[%c0_8, %c0_9, %c0_10] : memref<4x18x18xf32, #tpu.memory_space<vmem>>, vector<4x18x18xf32>
    %6 = vector.extract_strided_slice %5 {offsets = [0, 0, 0], sizes = [4, 16, 16], strides = [1, 1, 1]} : vector<4x18x18xf32> to vector<4x16x16xf32>
    %7 = vector.shape_cast %6 : vector<4x16x16xf32> to vector<4x256xf32>
    %8 = vector.extract_strided_slice %5 {offsets = [0, 0, 1], sizes = [4, 16, 16], strides = [1, 1, 1]} : vector<4x18x18xf32> to vector<4x16x16xf32>
    %9 = vector.shape_cast %8 : vector<4x16x16xf32> to vector<4x256xf32>
    %10 = vector.extract_strided_slice %5 {offsets = [0, 0, 2], sizes = [4, 16, 16], strides = [1, 1, 1]} : vector<4x18x18xf32> to vector<4x16x16xf32>
    %11 = vector.shape_cast %10 : vector<4x16x16xf32> to vector<4x256xf32>
    %12 = vector.extract_strided_slice %5 {offsets = [0, 1, 0], sizes = [4, 16, 16], strides = [1, 1, 1]} : vector<4x18x18xf32> to vector<4x16x16xf32>
    %13 = vector.shape_cast %12 : vector<4x16x16xf32> to vector<4x256xf32>
    %14 = vector.extract_strided_slice %5 {offsets = [0, 1, 1], sizes = [4, 16, 16], strides = [1, 1, 1]} : vector<4x18x18xf32> to vector<4x16x16xf32>
    %15 = vector.shape_cast %14 : vector<4x16x16xf32> to vector<4x256xf32>
    %16 = vector.extract_strided_slice %5 {offsets = [0, 1, 2], sizes = [4, 16, 16], strides = [1, 1, 1]} : vector<4x18x18xf32> to vector<4x16x16xf32>
    %17 = vector.shape_cast %16 : vector<4x16x16xf32> to vector<4x256xf32>
    %18 = vector.extract_strided_slice %5 {offsets = [0, 2, 0], sizes = [4, 16, 16], strides = [1, 1, 1]} : vector<4x18x18xf32> to vector<4x16x16xf32>
    %19 = vector.shape_cast %18 : vector<4x16x16xf32> to vector<4x256xf32>
    %20 = vector.extract_strided_slice %5 {offsets = [0, 2, 1], sizes = [4, 16, 16], strides = [1, 1, 1]} : vector<4x18x18xf32> to vector<4x16x16xf32>
    %21 = vector.shape_cast %20 : vector<4x16x16xf32> to vector<4x256xf32>
    %22 = vector.extract_strided_slice %5 {offsets = [0, 2, 2], sizes = [4, 16, 16], strides = [1, 1, 1]} : vector<4x18x18xf32> to vector<4x16x16xf32>
    %23 = vector.shape_cast %22 : vector<4x16x16xf32> to vector<4x256xf32>
    %24 = tpu.concatenate %7, %9, %11, %13, %15, %17, %19, %21, %23 in 0 : vector<4x256xf32>, vector<4x256xf32>, vector<4x256xf32>, vector<4x256xf32>, vector<4x256xf32>, vector<4x256xf32>, vector<4x256xf32>, vector<4x256xf32>, vector<4x256xf32> -> vector<36x256xf32>
    %c0_11 = arith.constant 0 : index
    %c0_12 = arith.constant 0 : index
    %25 = vector.load %arg2[%c0_11, %c0_12] : memref<8x36xf32, #tpu.memory_space<vmem>>, vector<8x36xf32>
    %cst_13 = arith.constant dense<0.000000e+00> : vector<8x256xf32>
    %26 = tpu.matmul %25, %24, %cst_13 {dimension_numbers = #tpu.dot_dimension_numbers<[1], [0], [0], [1], [0, 0, 1, 1], [], []>} : vector<8x36xf32>, vector<36x256xf32>, vector<8x256xf32> -> vector<8x256xf32>
    %c0_14 = arith.constant 0 : index
    %c0_15 = arith.constant 0 : index
    %27 = vector.load %arg3[%c0_14, %c0_15] : memref<8x1xf32, #tpu.memory_space<vmem>>, vector<8x1xf32>
    %28 = vector.broadcast %27 : vector<8x1xf32> to vector<8x256xf32>
    %29 = arith.addf %26, %28 : vector<8x256xf32>
    %cst_16 = arith.constant 0.000000e+00 : f32
    %30 = vector.broadcast %cst_16 : f32 to vector<8x256xf32>
    %31 = arith.cmpf oge, %29, %30 : vector<8x256xf32>
    %cst_17 = arith.constant 2.000000e-01 : f32
    %32 = vector.broadcast %cst_17 : f32 to vector<8x256xf32>
    %33 = arith.mulf %32, %29 : vector<8x256xf32>
    %34 = arith.select %31, %29, %33 : vector<8x256xi1>, vector<8x256xf32>
    %cst_18 = arith.constant 0.000000e+00 : f32
    %35 = vector.broadcast %cst_18 : f32 to vector<8x18x18xf32>
    %c0_19 = arith.constant 0 : index
    %c0_20 = arith.constant 0 : index
    %c0_21 = arith.constant 0 : index
    %36 = vector.load %arg8[%c0_19, %c0_20, %c0_21] : memref<8x18x18xf32, #tpu.memory_space<vmem>>, vector<8x18x18xf32>
    tpu.vector_store %arg8[%c0_19, %c0_20, %c0_21], %35 {strides = array<i32>} : memref<8x18x18xf32, #tpu.memory_space<vmem>>, vector<8x18x18xf32>,
    %37 = vector.shape_cast %34 : vector<8x256xf32> to vector<8x16x16xf32>
    %c0_22 = arith.constant 0 : index
    %c1_23 = arith.constant 1 : index
    %c1_24 = arith.constant 1 : index
    %38 = vector.load %arg8[%c0_22, %c1_23, %c1_24] : memref<8x18x18xf32, #tpu.memory_space<vmem>>, vector<8x16x16xf32>
    tpu.vector_store %arg8[%c0_22, %c1_23, %c1_24], %37 {strides = array<i32>} : memref<8x18x18xf32, #tpu.memory_space<vmem>>, vector<8x16x16xf32>,
    %c0_25 = arith.constant 0 : index
    %c0_26 = arith.constant 0 : index
    %c0_27 = arith.constant 0 : index
    %39 = vector.load %arg8[%c0_25, %c0_26, %c0_27] : memref<8x18x18xf32, #tpu.memory_space<vmem>>, vector<8x18x18xf32>
    %40 = vector.extract_strided_slice %39 {offsets = [0, 0, 0], sizes = [8, 16, 16], strides = [1, 1, 1]} : vector<8x18x18xf32> to vector<8x16x16xf32>
    %41 = vector.shape_cast %40 : vector<8x16x16xf32> to vector<8x256xf32>
    %42 = vector.extract_strided_slice %39 {offsets = [0, 0, 1], sizes = [8, 16, 16], strides = [1, 1, 1]} : vector<8x18x18xf32> to vector<8x16x16xf32>
    %43 = vector.shape_cast %42 : vector<8x16x16xf32> to vector<8x256xf32>
    %44 = vector.extract_strided_slice %39 {offsets = [0, 0, 2], sizes = [8, 16, 16], strides = [1, 1, 1]} : vector<8x18x18xf32> to vector<8x16x16xf32>
    %45 = vector.shape_cast %44 : vector<8x16x16xf32> to vector<8x256xf32>
    %46 = vector.extract_strided_slice %39 {offsets = [0, 1, 0], sizes = [8, 16, 16], strides = [1, 1, 1]} : vector<8x18x18xf32> to vector<8x16x16xf32>
    %47 = vector.shape_cast %46 : vector<8x16x16xf32> to vector<8x256xf32>
    %48 = vector.extract_strided_slice %39 {offsets = [0, 1, 1], sizes = [8, 16, 16], strides = [1, 1, 1]} : vector<8x18x18xf32> to vector<8x16x16xf32>
    %49 = vector.shape_cast %48 : vector<8x16x16xf32> to vector<8x256xf32>
    %50 = vector.extract_strided_slice %39 {offsets = [0, 1, 2], sizes = [8, 16, 16], strides = [1, 1, 1]} : vector<8x18x18xf32> to vector<8x16x16xf32>
    %51 = vector.shape_cast %50 : vector<8x16x16xf32> to vector<8x256xf32>
    %52 = vector.extract_strided_slice %39 {offsets = [0, 2, 0], sizes = [8, 16, 16], strides = [1, 1, 1]} : vector<8x18x18xf32> to vector<8x16x16xf32>
    %53 = vector.shape_cast %52 : vector<8x16x16xf32> to vector<8x256xf32>
    %54 = vector.extract_strided_slice %39 {offsets = [0, 2, 1], sizes = [8, 16, 16], strides = [1, 1, 1]} : vector<8x18x18xf32> to vector<8x16x16xf32>
    %55 = vector.shape_cast %54 : vector<8x16x16xf32> to vector<8x256xf32>
    %56 = vector.extract_strided_slice %39 {offsets = [0, 2, 2], sizes = [8, 16, 16], strides = [1, 1, 1]} : vector<8x18x18xf32> to vector<8x16x16xf32>
    %57 = vector.shape_cast %56 : vector<8x16x16xf32> to vector<8x256xf32>
    %58 = tpu.concatenate %41, %43, %45, %47, %49, %51, %53, %55, %57 in 0 : vector<8x256xf32>, vector<8x256xf32>, vector<8x256xf32>, vector<8x256xf32>, vector<8x256xf32>, vector<8x256xf32>, vector<8x256xf32>, vector<8x256xf32>, vector<8x256xf32> -> vector<72x256xf32>
    %c0_28 = arith.constant 0 : index
    %c0_29 = arith.constant 0 : index
    %59 = vector.load %arg4[%c0_28, %c0_29] : memref<8x72xf32, #tpu.memory_space<vmem>>, vector<8x72xf32>
    %cst_30 = arith.constant dense<0.000000e+00> : vector<8x256xf32>
    %60 = tpu.matmul %59, %58, %cst_30 {dimension_numbers = #tpu.dot_dimension_numbers<[1], [0], [0], [1], [0, 0, 1, 1], [], []>} : vector<8x72xf32>, vector<72x256xf32>, vector<8x256xf32> -> vector<8x256xf32>
    %c0_31 = arith.constant 0 : index
    %c0_32 = arith.constant 0 : index
    %61 = vector.load %arg5[%c0_31, %c0_32] : memref<8x1xf32, #tpu.memory_space<vmem>>, vector<8x1xf32>
    %62 = vector.broadcast %61 : vector<8x1xf32> to vector<8x256xf32>
    %63 = arith.addf %60, %62 : vector<8x256xf32>
    %cst_33 = arith.constant 0.000000e+00 : f32
    %64 = vector.broadcast %cst_33 : f32 to vector<8x256xf32>
    %65 = arith.cmpf oge, %63, %64 : vector<8x256xf32>
    %cst_34 = arith.constant 2.000000e-01 : f32
    %66 = vector.broadcast %cst_34 : f32 to vector<8x256xf32>
    %67 = arith.mulf %66, %63 : vector<8x256xf32>
    %68 = arith.select %65, %63, %67 : vector<8x256xi1>, vector<8x256xf32>
    %c0_35 = arith.constant 0 : index
    %c0_36 = arith.constant 0 : index
    %c0_37 = arith.constant 0 : index
    %69 = vector.load %arg6[%c0_35, %c0_36, %c0_37] : memref<1x8x256xf32, #tpu.memory_space<vmem>>, vector<1x8x256xf32>
    %70 = vector.shape_cast %69 : vector<1x8x256xf32> to vector<8x256xf32>
    %71 = vector.shape_cast %68 : vector<8x256xf32> to vector<1x8x256xf32>
    tpu.vector_store %arg6[%c0_35, %c0_36, %c0_37], %71 {strides = array<i32>} : memref<1x8x256xf32, #tpu.memory_space<vmem>>, vector<1x8x256xf32>,
    return
  }
  func.func @transform_0(%arg0: i32) -> (i32, i32, i32, i32) {
    %c0_i32 = arith.constant 0 : i32
    %c0_i32_0 = arith.constant 0 : i32
    %c0_i32_1 = arith.constant 0 : i32
    %c0_i32_2 = arith.constant 0 : i32
    return %arg0, %c0_i32, %c0_i32_0, %c0_i32_1 : i32, i32, i32, i32
  }
  func.func @transform_1(%arg0: i32) -> (i32, i32) {
    %c0_i32 = arith.constant 0 : i32
    %c0_i32_0 = arith.constant 0 : i32
    %c0_i32_1 = arith.constant 0 : i32
    return %c0_i32, %c0_i32_0 : i32, i32
  }
  func.func @transform_2(%arg0: i32) -> (i32, i32) {
    %c0_i32 = arith.constant 0 : i32
    %c0_i32_0 = arith.constant 0 : i32
    %c0_i32_1 = arith.constant 0 : i32
    return %c0_i32, %c0_i32_0 : i32, i32
  }
  func.func @transform_3(%arg0: i32) -> (i32, i32) {
    %c0_i32 = arith.constant 0 : i32
    %c0_i32_0 = arith.constant 0 : i32
    %c0_i32_1 = arith.constant 0 : i32
    return %c0_i32, %c0_i32_0 : i32, i32
  }
  func.func @transform_4(%arg0: i32) -> (i32, i32) {
    %c0_i32 = arith.constant 0 : i32
    %c0_i32_0 = arith.constant 0 : i32
    %c0_i32_1 = arith.constant 0 : i32
    return %c0_i32, %c0_i32_0 : i32, i32
  }
  func.func @transform_5(%arg0: i32) -> (i32, i32, i32) {
    %c0_i32 = arith.constant 0 : i32
    %c0_i32_0 = arith.constant 0 : i32
    %c0_i32_1 = arith.constant 0 : i32
    return %arg0, %c0_i32, %c0_i32_0 : i32, i32, i32
  }
}

</mosaic_0001>

<bundles_post_ra>
// kernel: tpu_custom_call.1
= control target key start
LH: loop header
LB: loop body
LE: loop exit
PB: predicated region body
PF: predicated region fallthrough
CT: control target
= control target key end

     0   :  { %10 = vsyncpa [#allocation5], 0  ;;  %s11138_s0 = inlined_call_operand.hbm [shape: f32[2,4,16,16], index: 0, kind: input, shape index: {}]   ;;  %s11139_s1 = inlined_call_operand.vmem [shape: f32[8,36], index: 1, kind: input, shape index: {}]   ;;  %s11140_s2 = inlined_call_operand.vmem [shape: f32[8,1], index: 2, kind: input, shape index: {}]   ;;  %s11141_s3 = inlined_call_operand.vmem [shape: f32[8,72], index: 3, kind: input, shape index: {}]   ;;  %s11142_s4 = inlined_call_operand.vmem [shape: f32[8,1], index: 4, kind: input, shape index: {}]   ;;  %s11143_s5 = inlined_call_operand.hbm [shape: f32[2,8,256], index: 5, kind: output, shape index: {}]  }
   0x1   :  { %12 = vsyncpa [#allocation5 + $0x1], 0 }
   0x2   :  { %13 = vsyncpa [#allocation6], 0 }
   0x3   :  { %15 = vsyncpa [#allocation6 + $0x1], 0  ;;  %s6880_s18 = smov 0   ;;  %s6882_s19 = smov 0  }
   0x4   :  { %s6884_s20 = smov 0   ;;  %s6886_s21 = smov 0  }
   0x5 LB: > { %s6901_s22 = sadd.s32 4294967295, %s6830_s21   ;;  %s6641_s23 = sadd.s32 4294967294, %s6830_s21   ;;  %s6830_s21 = sphi %s6886_s21, %s11966_s21   ;;  %s6826_s20 = sphi %s6884_s20, %s11965_s20   ;;  %s6822_s19 = sphi %s6882_s19, %s11964_s19   ;;  %s6818_s18 = sphi %s6880_s18, %s11963_s18  }
   0x6   : > { %s6905_s24 = sadd.s32 1, %s6830_s21   ;;  %s28_s25 = sadd.s32 1, %s6826_s20 }
   0x7   : > { %s25_s26 = ssub.s32 %s6830_s21, %s6905_s24  ;;  %p35_p0 = scmp.ne.s32.totalorder %s6826_s20, %s6822_s19 }
   0x8   : > { %p26_p1 = scmp.eq.s32.totalorder %s25_s26, 0  ;;  %p36_p2 = scmp.eq.s32.totalorder %s6830_s21, 0 }
   0x9   : > { %p41_p3 = scmp.ne.s32.totalorder %s6822_s19, %s6818_s18  ;;  %p42_p4 = scmp.eq.s32.totalorder %s6901_s22, 0 }
   0xa   : > { %s6917_s27 = scalar_select %p26_p1, %s6826_s20, %s28_s25  }
   0xb   : > { %p6919_p5 = por %p36_p2, %p35_p0  ;;  %p6923_p6 = por %p42_p4, %p41_p3 }
   0xc   : > { %p149_p7 = scmp.eq.s32.totalorder %s6901_s22, 1  ;;  %p155_p8 = scmp.eq.s32.totalorder %s6641_s23, 1 }
   0xd   : > { %s11386_s29 = scalar_select %p6923_p6, 1, 0 }
   0xe   : > { %p6673_p10 = scmp.lt.s32.totalorder %s6830_s21, 2  ;;  %p6930_p11 = por %p149_p7, %p35_p0 }
   0xf   : > { %p6934_p12 = por %p155_p8, %p41_p3  ;;  %s187_s7 = sand.u32 1, %s6826_s20  }
  0x10   : > { %s11387_s30 = scalar_select %p6930_p11, 1, 0 }
  0x11   : > { %s11388_s6 = scalar_select %p6934_p12, 1, 0 }
  0x12   : > { %s6659_s8 = sshll.u32 %s6830_s21, 10  ;;  %s6644_s9 = sshll.u32 %s187_s7, 6 }
  0x13   : > { %s6943_s12 = scalar_lea.hbm %s11138_s0, %s6659_s8  ;;  %s191_s13 = scalar_lea.vmem [#allocation4], %s6644_s9 }
  0x14   : > { %s198_s14 = sshll.u32 %s191_s13, 4  ;;  %p6947_p13 = pnand %p6673_p10, %p6919_p5  ;;  %s6951_s14 = int_to_ptr.vmem [resolvable:$true] %s198_s14 }
  0x15   : > { %s6953_s16 = scalar_lea.sflag [#allocation5], %s187_s7  ;;  %s6738_s17 = scalar_lea.hbm %s6943_s12, 1024 }
  0x16   : > { %p6739_p0 = scmp.ne.s32.totalorder %s6943_s12, %s6738_s17  ;;  %p6740_p1 = pneg %p6947_p13 }
  0x17   : > { %s6743_s26 = scalar_lea.hbm %s11138_s0, 2048  ;;  %p6744_p4 = scmp.lt.s32.totalorder %s6943_s12, %s11138_s0 }
  0x18   : > { %p6741_p2 = pnand %p6740_p1, %p6739_p0  ;;  %p6745_p5 = scmp.lt.s32.totalorder %s6743_s26, %s6738_s17 }
  0x1a   : > { %p6742_p3 = pneg %p6741_p2  ;;  %p6746_p7 = por %p6745_p5, %p6744_p4 }
  0x1c   : > { %p6747_p8 = pnand %p6746_p7, %p6742_p3 }
  0x1e   : > { %6750 = shalt.err (!%p6747_p8)
}
  0x1f   : > { %s6751_s7 = scalar_lea.vmem %s6951_s14, 1024  ;;  %s6832_s9 = smov [#allocation4]  }
  0x20   : > { %p6752_p10 = scmp.ne.s32.totalorder %s6951_s14, %s6751_s7  ;;  %s6756_s10 = sshll.u32 %s6832_s9, 4  ;;  %s6757_s10 = int_to_ptr.vmem [resolvable:$false] %s6756_s10 }
  0x21   : > { %s6758_s11 = scalar_lea.vmem %s6757_s10, 2048  ;;  %p6759_p2 = scmp.lt.s32.totalorder %s6951_s14, %s6757_s10 }
  0x22   : > { %p6754_p9 = pnand %p6752_p10, %p6740_p1  ;;  %p6760_p12 = scmp.lt.s32.totalorder %s6758_s11, %s6751_s7 }
  0x24   : > { %p6755_p0 = pneg %p6754_p9  ;;  %p6761_p11 = por %p6760_p12, %p6759_p2 }
  0x26   : > { %p6762_p6 = pnand %p6761_p11, %p6755_p0 }
  0x28   : > { %6765 = shalt.err (!%p6762_p6)
}
  0x29   : > { %s6833_s13 = smov 128   ;;  %s6834_s17 = smov 8  }
  0x2a   : > { %6668 = dma.hbm_to_vmem [thread:$0]  (!%p6947_p13), %s6943_s12, 1024, %s6951_s14, %s6953_s16, %s6833_s13, %s6833_s13, %s6834_s17  }
  0x2b   : > { %p6647_p9 = scmp.ge.s32.totalorder %s6830_s21, 1  ;;  %p206_p1 = scmp.lt.s32.totalorder %s6830_s21, 3 }
  0x2d   : > { %p207_p3 = pnand %p6647_p9, %p206_p1 }
  0x2f   : > { %210 = sbr.rel (%p207_p3) target bundleno = 1928 (0x788), region = 40 }
  0x34   : > { %s6977_s23 = sand.u32 1, %s6822_s19   ;;  %p11390_p6 = scmp.ne.s32.totalorder %s11386_s29, 0 }
  0x35   : > { %s6648_s25 = sshll.u32 %s6977_s23, 6  ;;  %s213_s26 = scalar_lea.sflag [#allocation5], %s6977_s23 }
  0x36   : > { %s6981_s28 = scalar_lea.vmem [#allocation4], %s6648_s25 }
  0x37   : > { %6809 = dma.done.wait (%p11390_p6), %s213_s26, 1024  }
  0x38   : > { %6811 = vsyncadd (%p11390_p6), %s213_s26, 4294966272  ;;  %vm243_vm0 = vcmask 146432   ;;  %vm246_vm1 = vcmask 140288   ;;  %v11153_v0 = vmov 0.0   ;;  %v259_v1 = vld [vmem:[%s6981_s28 + $0x10] sm:$0xff]  ;;  %v257_v2 = vld [vmem:[%s6981_s28] sm:$0xff]  ;;  %v323_v15 = vlaneseq }
  0x39   : > { %248 = vst.msk [vmem:[#allocation2 + $0x18] sm:$0xff] %vm243_vm0, %v11153_v0  ;;  %249 = vst.msk [vmem:[#allocation2 + $0x20] sm:$0xff] %vm243_vm0, %v11153_v0  ;;  %2507 = vmatprep.mubr.f32.mxu0 %v11153_v0  ;;  %6541 = vmatprep.mubr.f32.mxu1 %v11153_v0  ;;  %s6836_s29 = smov 1   ;;  %v260_v3 = vld [vmem:[%s6981_s28 + $0x18] sm:$0xff]  ;;  %v258_v4 = vld [vmem:[%s6981_s28 + $0x8] sm:$0xff]  ;;  %vm297_vm2 = vcmask 138248  }
  0x3a   : > { %244 = vst.msk [vmem:[#allocation2] sm:$0xff] %vm243_vm0, %v11153_v0  ;;  %245 = vst.msk [vmem:[#allocation2 + $0x8] sm:$0xff] %vm243_vm0, %v11153_v0  ;;  %277 = vrot.lane.b32.xlu1 %v259_v1, %s6836_s29  ;;  %273 = vrot.lane.b32.xlu0 %v257_v2, %s6836_s29  ;;  %v262_v5 = vld [vmem:[%s6981_s28 + $0x28] sm:$0xff]  ;;  %v261_v6 = vld [vmem:[%s6981_s28 + $0x20] sm:$0xff]  ;;  %v6837_v21 = vmov 1983009808  }
  0x3b   : > { %251 = vst.msk [vmem:[#allocation2 + $0x30] sm:$0xff] %vm243_vm0, %v11153_v0  ;;  %252 = vst.msk [vmem:[#allocation2 + $0x38] sm:$0xff] %vm243_vm0, %v11153_v0  ;;  %v264_v7 = vld [vmem:[%s6981_s28 + $0x38] sm:$0xff]  ;;  %v263_v8 = vld [vmem:[%s6981_s28 + $0x30] sm:$0xff]  ;;  %v321_v22 = vunpack.c.l.s4 %v6837_v21  ;;  %s6838_s12 = smov 127   ;;  %vm1698_vm3 = vcmask 1045504  }
  0x3c   : > { %254 = vst.msk [vmem:[#allocation2 + $0x48] sm:$0xff] %vm243_vm0, %v11153_v0  ;;  %255 = vst.msk [vmem:[#allocation2 + $0x50] sm:$0xff] %vm243_vm0, %v11153_v0  ;;  %v7101_v27 = vshrl.u32 %v323_v15, 7  ;;  %s6839_s14 = smov 126   ;;  %vm1003_vm4 = vcmask 1046528   ;;  %s6841_s15 = smov 32  }
  0x3d   : > { %2520 = vst.msk [vmem:[#allocation3] sm:$0xff] %vm243_vm0, %v11153_v0  ;;  %2521 = vst.msk [vmem:[#allocation3 + $0x8] sm:$0xff] %vm243_vm0, %v11153_v0  ;;  %v322_v33 = vunpack.c.0.s8 %v321_v22  ;;  %s6842_s16 = smov 64   ;;  %s6843_s8 = smov 96   ;;  %vm510_vm5 = vcmask 130048   ;;  %vm512_vm6 = vcmask 261120  }
  0x3e   : > { %2523 = vst.msk [vmem:[#allocation3 + $0x18] sm:$0xff] %vm243_vm0, %v11153_v0  ;;  %2524 = vst.msk [vmem:[#allocation3 + $0x20] sm:$0xff] %vm243_vm0, %v11153_v0  ;;  %279 = vrot.lane.b32.xlu1 %v260_v3, %s6836_s29  ;;  %275 = vrot.lane.b32.xlu0 %v258_v4, %s6836_s29  ;;  %s6844_s7 = smov 16   ;;  %s6845_s9 = smov 48   ;;  %vm514_vm7 = vcmask 392192   ;;  %vm516_vm8 = vcmask 523264  }
  0x3f   : > { %2526 = vst.msk [vmem:[#allocation3 + $0x30] sm:$0xff] %vm243_vm0, %v11153_v0  ;;  %2527 = vst.msk [vmem:[#allocation3 + $0x38] sm:$0xff] %vm243_vm0, %v11153_v0  ;;  %v7186_v3 = vsub.s32 %v322_v33, %v7101_v27  ;;  %s6846_s10 = smov 80   ;;  %s6847_s11 = smov 112   ;;  %vm518_vm9 = vcmask 654336   ;;  %vm520_vm10 = vcmask 785408  }
  0x40   : > { %2529 = vst.msk [vmem:[#allocation3 + $0x48] sm:$0xff] %vm243_vm0, %v11153_v0  ;;  %2530 = vst.msk [vmem:[#allocation3 + $0x50] sm:$0xff] %vm243_vm0, %v11153_v0  ;;  %vm2417_vm11 = vcmask 1043456   ;;  %vm522_vm12 = vcmask 916480   ;;  %vm2433_vm13 = vcmask 293888   ;;  %s6557_s13 = scalar_lea.sflag [#allocation6], %s6977_s23 }
  0x41   : > { %2532 = vst.msk [vmem:[#allocation3 + $0x60] sm:$0xff] %vm243_vm0, %v11153_v0  ;;  %2533 = vst.msk [vmem:[#allocation3 + $0x68] sm:$0xff] %vm243_vm0, %v11153_v0  ;;  %p11960_p12 = scmp.ne.s32.totalorder %s11387_s30, 0 }
  0x42   : > { %2535 = vst.msk [vmem:[#allocation3 + $0x78] sm:$0xff] %vm243_vm0, %v11153_v0  ;;  %2536 = vst.msk [vmem:[#allocation3 + $0x80] sm:$0xff] %vm243_vm0, %v11153_v0  ;;  %283 = vrot.lane.b32.xlu1 %v262_v5, %s6836_s29  ;;  %281 = vrot.lane.b32.xlu0 %v261_v6, %s6836_s29 }
  0x43   : > { %2538 = vst.msk [vmem:[#allocation3 + $0x90] sm:$0xff] %vm243_vm0, %v11153_v0  ;;  %2539 = vst.msk [vmem:[#allocation3 + $0x98] sm:$0xff] %vm243_vm0, %v11153_v0 }
  0x44   : > { %2541 = vst.msk [vmem:[#allocation3 + $0xa8] sm:$0xff] %vm243_vm0, %v11153_v0  ;;  %2542 = vst.msk [vmem:[#allocation3 + $0xb0] sm:$0xff] %vm243_vm0, %v11153_v0  ;;  %vm6473_vm0 = vcmask 588800  }
  0x45   : > { %250 = vst.msk [vmem:[#allocation2 + $0x28] sm:$0x3] %vm246_vm1, %v11153_v0  ;;  %247 = vst.msk [vmem:[#allocation2 + $0x10] sm:$0x3] %vm246_vm1, %v11153_v0 }
  0x46   : > { %253 = vst.msk [vmem:[#allocation2 + $0x40] sm:$0x3] %vm246_vm1, %v11153_v0  ;;  %256 = vst.msk [vmem:[#allocation2 + $0x58] sm:$0x3] %vm246_vm1, %v11153_v0  ;;  %287 = vrot.lane.b32.xlu1 %v264_v7, %s6836_s29  ;;  %285 = vrot.lane.b32.xlu0 %v263_v8, %s6836_s29 }
  0x47   : > { %2522 = vst.msk [vmem:[#allocation3 + $0x10] sm:$0x3] %vm246_vm1, %v11153_v0  ;;  %2525 = vst.msk [vmem:[#allocation3 + $0x28] sm:$0x3] %vm246_vm1, %v11153_v0 }
  0x48   : > { %2528 = vst.msk [vmem:[#allocation3 + $0x40] sm:$0x3] %vm246_vm1, %v11153_v0  ;;  %2531 = vst.msk [vmem:[#allocation3 + $0x58] sm:$0x3] %vm246_vm1, %v11153_v0 }
  0x49   : > { %2534 = vst.msk [vmem:[#allocation3 + $0x70] sm:$0x3] %vm246_vm1, %v11153_v0  ;;  %2537 = vst.msk [vmem:[#allocation3 + $0x88] sm:$0x3] %vm246_vm1, %v11153_v0 }
  0x4a   : > { %2540 = vst.msk [vmem:[#allocation3 + $0xa0] sm:$0x3] %vm246_vm1, %v11153_v0  ;;  %2543 = vst.msk [vmem:[#allocation3 + $0xb8] sm:$0x3] %vm246_vm1, %v11153_v0 }
  0x4b   : > { %11391 = vst [vmem:[#allocation10_spill] sm:$0xff] %v7186_v3 }
  0xac   : > { %v278_v9 = vpop.permute.xlu1 %277  ;;  %v274_v10 = vpop.permute.xlu0 %273 }
  0xad   : > { %300 = vst.msk [vmem:[#allocation2 + $0x19] sm:$0xff] %vm297_vm2, %v278_v9  ;;  %298 = vst.msk [vmem:[#allocation2 + $0x1] sm:$0xff] %vm297_vm2, %v274_v10 }
  0xb0   : > { %v280_v11 = vpop.permute.xlu1 %279  ;;  %v276_v12 = vpop.permute.xlu0 %275 }
  0xb1   : > { %301 = vst.msk [vmem:[#allocation2 + $0x21] sm:$0xff] %vm297_vm2, %v280_v11  ;;  %299 = vst.msk [vmem:[#allocation2 + $0x9] sm:$0xff] %vm297_vm2, %v276_v12 }
  0xb4   : > { %v284_v13 = vpop.permute.xlu1 %283  ;;  %v282_v14 = vpop.permute.xlu0 %281  ;;  %v7095_v23 = vld [vmem:[#allocation2] sm:$0xff]  ;;  %v7117_v38 = vld [vmem:[#allocation2 + $0x18] sm:$0xff] }
  0xb5   : > { %303 = vst.msk [vmem:[#allocation2 + $0x39] sm:$0xff] %vm297_vm2, %v284_v13  ;;  %302 = vst.msk [vmem:[#allocation2 + $0x31] sm:$0xff] %vm297_vm2, %v282_v14  ;;  %v1699_v32 = vrot.slane %v7095_v23, 2  ;;  %v1704_v56 = vrot.slane %v7117_v38, 2 }
  0xb8   : > { %v288_v16 = vpop.permute.xlu1 %287  ;;  %v286_v17 = vpop.permute.xlu0 %285  ;;  %v7083_v18 = vld [vmem:[#allocation2 + $0x20] sm:$0xff]  ;;  %v7085_v19 = vld [vmem:[#allocation2 + $0x8] sm:$0xff]  ;;  %v7087_v20 = vld [vmem:[#allocation2 + $0x10] sm:$0x3] }
  0xb9   : > { %305 = vst.msk [vmem:[#allocation2 + $0x51] sm:$0xff] %vm297_vm2, %v288_v16  ;;  %304 = vst.msk [vmem:[#allocation2 + $0x49] sm:$0xff] %vm297_vm2, %v286_v17  ;;  %545 = vrot.lane.b32.xlu1 %v7083_v18, %s6838_s12  ;;  %541 = vrot.lane.b32.xlu0 %v7085_v19, %s6838_s12  ;;  %v1700_v24 = vrot.slane %v7085_v19, 2  ;;  %v1702_v25 = vrot.slane %v7087_v20, 2  ;;  %v7099_v26 = vld [vmem:[#allocation2 + $0x28] sm:$0x3] }
  0xba   : > { %v1705_v30 = vrot.slane %v7083_v18, 2  ;;  %v1707_v34 = vrot.slane %v7099_v26, 2 }
  0xbb   : > { %v7120_v39 = vsel %vm1698_vm3, %v1700_v24, %v1702_v25  ;;  %v7123_v40 = vsel %vm1698_vm3, %v1699_v32, %v1700_v24 }
  0xbc   : > { %v7103_v28 = vld [vmem:[#allocation2 + $0x38] sm:$0xff]  ;;  %v7105_v29 = vld [vmem:[#allocation2 + $0x30] sm:$0xff]  ;;  %v7108_v31 = vld [vmem:[#allocation2 + $0x40] sm:$0x3]  ;;  %v7162_v58 = vsel %vm1698_vm3, %v1705_v30, %v1707_v34  ;;  %v7168_v60 = vsel %vm1698_vm3, %v1704_v56, %v1705_v30 }
  0xbd   : > { %549 = vrot.lane.b32.xlu0 %v7103_v28, %s6838_s12  ;;  %v1710_v35 = vrot.slane %v7103_v28, 2  ;;  %v1712_v36 = vrot.slane %v7108_v31, 2  ;;  %v1709_v37 = vrot.slane %v7105_v29, 2  ;;  %v386_v41 = vcombine.low %v7085_v19, %v7103_v28 }
  0xbe   : > { %v387_v42 = vcombine.high %v7085_v19, %v7103_v28  ;;  %v318_v45 = vcombine.low %v7095_v23, %v7105_v29  ;;  %v319_v46 = vcombine.high %v7095_v23, %v7105_v29 }
  0xbf   : > { %v7130_v43 = vsel %vm1698_vm3, %v1710_v35, %v1712_v36  ;;  %v7133_v44 = vsel %vm1698_vm3, %v1709_v37, %v1710_v35  ;;  %v7198_v6 = vrot.slane %v386_v41, %v7186_v3  ;;  %v1015_v41 = vrot.slane %v7103_v28, 1 }
  0xc0   : > { %v7139_v47 = vld [vmem:[#allocation2 + $0x50] sm:$0xff]  ;;  %v7141_v48 = vld [vmem:[#allocation2 + $0x48] sm:$0xff]  ;;  %v1795_v49 = vcombine.low %v7120_v39, %v7130_v43  ;;  %v1796_v50 = vcombine.high %v7120_v39, %v7130_v43  ;;  %v7147_v51 = vld [vmem:[#allocation2 + $0x58] sm:$0x3]  ;;  %v1727_v52 = vcombine.low %v7123_v40, %v7133_v44  ;;  %v1728_v53 = vcombine.high %v7123_v40, %v7133_v44 }
  0xc1   : > { %553 = vrot.lane.b32.xlu1 %v7139_v47, %s6838_s12  ;;  %771 = vrot.lane.b32.xlu0 %v7085_v19, %s6839_s14  ;;  %v1715_v54 = vrot.slane %v7139_v47, 2  ;;  %v1717_v55 = vrot.slane %v7147_v51, 2  ;;  %v1714_v57 = vrot.slane %v7141_v48, 2  ;;  %v402_v4 = vcombine.low %v7083_v18, %v7139_v47 }
  0xc2   : > { %v403_v8 = vcombine.high %v7083_v18, %v7139_v47  ;;  %v7206_v9 = vrot.slane %v1727_v52, %v7186_v3  ;;  %v334_v10 = vcombine.low %v7117_v38, %v7141_v48  ;;  %v7213_v12 = vrot.slane %v387_v42, %v7186_v3 }
  0xc3   : > { %v7165_v59 = vsel %vm1698_vm3, %v1715_v54, %v1717_v55  ;;  %v7171_v61 = vsel %vm1698_vm3, %v1714_v57, %v1715_v54  ;;  %v7201_v7 = vrot.slane %v402_v4, %v7186_v3  ;;  %v335_v14 = vcombine.high %v7117_v38, %v7141_v48 }
  0xc4   : > { %v1811_v62 = vcombine.low %v7162_v58, %v7165_v59  ;;  %v1812_v63 = vcombine.high %v7162_v58, %v7165_v59  ;;  %v1743_v1 = vcombine.low %v7168_v60, %v7171_v61  ;;  %v1744_v2 = vcombine.high %v7168_v60, %v7171_v61 }
  0xc5   : > { %775 = vrot.lane.b32.xlu1 %v7083_v18, %s6839_s14  ;;  %779 = vrot.lane.b32.xlu0 %v7103_v28, %s6839_s14  ;;  %v419_v11 = vcombine.high %v7198_v6, %v7201_v7  ;;  %v7216_v13 = vrot.slane %v403_v8, %v7186_v3  ;;  %v7221_v15 = vrot.slane %v318_v45, %v7186_v3  ;;  %v1020_v34 = vrot.slane %v7139_v47, 1 }
  0xc6   : > { %v7191_v5 = vrot.slane %v1743_v1, %v7186_v3  ;;  %v7224_v16 = vrot.slane %v334_v10, %v7186_v3  ;;  %v418_v17 = vcombine.low %v7198_v6, %v7201_v7  ;;  %v7241_v30 = vrot.slane %v319_v46, %v7186_v3 }
  0xc7   : > { %v434_v22 = vcombine.low %v7213_v12, %v7216_v13  ;;  %v435_v24 = vcombine.high %v7213_v12, %v7216_v13  ;;  %v7244_v32 = vrot.slane %v335_v14, %v7186_v3  ;;  %v1022_v35 = vrot.slane %v7147_v51, 1 }
  0xc8   : > { %v1759_v21 = vcombine.low %v7206_v9, %v7191_v5  ;;  %v351_v25 = vcombine.high %v7221_v15, %v7224_v16  ;;  %v350_v33 = vcombine.low %v7221_v15, %v7224_v16  ;;  %v1017_v42 = vrot.slane %v7108_v31, 1 }
  0xc9   : > { %783 = vrot.lane.b32.xlu1 %v7139_v47, %s6839_s14  ;;  %539 = vrot.lane.b32.xlu0 %v7095_v23, %s6838_s12  ;;  %v366_v36 = vcombine.low %v7241_v30, %v7244_v32  ;;  %v367_v37 = vcombine.high %v7241_v30, %v7244_v32  ;;  %v1005_v45 = vrot.slane %v7085_v19, 1  ;;  %v1010_v46 = vrot.slane %v7083_v18, 1 }
  0xca   : > { %v1012_v51 = vrot.slane %v7099_v26, 1  ;;  %v1007_v52 = vrot.slane %v7087_v20, 1  ;;  %v7265_v54 = vrot.slane %v1795_v49, %v7186_v3  ;;  %v7268_v55 = vrot.slane %v1811_v62, %v7186_v3 }
  0xcb   : > { %v1760_v28 = vcombine.high %v7206_v9, %v7191_v5  ;;  %v7275_v31 = vsel %vm1003_vm4, %v1020_v34, %v1022_v35  ;;  %v7282_v18 = vsel %vm1003_vm4, %v1015_v41, %v1017_v42  ;;  %v7300_v57 = vrot.slane %v1796_v50, %v7186_v3 }
  0xcc   : > { %v1828_v19 = vcombine.high %v7265_v54, %v7268_v55  ;;  %v1827_v20 = vcombine.low %v7265_v54, %v7268_v55  ;;  %v7289_v26 = vsel %vm1003_vm4, %v1010_v46, %v1012_v51  ;;  %v7292_v49 = vsel %vm1003_vm4, %v1005_v45, %v1007_v52 }
  0xcd   : > { %543 = vrot.lane.b32.xlu1 %v7117_v38, %s6838_s12  ;;  %547 = vrot.lane.b32.xlu0 %v7105_v29, %s6838_s12  ;;  %v1117_v56 = vcombine.high %v7289_v26, %v7275_v31  ;;  %v7303_v62 = vrot.slane %v1812_v63, %v7186_v3  ;;  %v1101_v1 = vcombine.high %v7292_v49, %v7282_v18 }
  0xce   : > { %v7317_v50 = vrot.slane %v1728_v53, %v7186_v3  ;;  %v7320_v63 = vrot.slane %v1744_v2, %v7186_v3  ;;  %v1116_v16 = vcombine.low %v7289_v26, %v7275_v31  ;;  %v1100_v32 = vcombine.low %v7292_v49, %v7282_v18 }
  0xcf   : > { %v1843_v4 = vcombine.low %v7300_v57, %v7303_v62  ;;  %v7323_v8 = vrot.slane %v1117_v56, %v7186_v3  ;;  %v7330_v35 = vrot.slane %v1101_v1, %v7186_v3 }
  0xd0   : > { %11392 = vst [vmem:[#allocation11_spill] sm:$0xff] %v7317_v50  ;;  %11393 = vst [vmem:[#allocation12_spill] sm:$0xff] %v7320_v63  ;;  %v1775_v14 = vcombine.low %v7317_v50, %v7320_v63  ;;  %v1124_v6 = vrot.slane %v1116_v16, %v7186_v3 }
  0xd1   : > { %551 = vrot.lane.b32.xlu1 %v7141_v48, %s6838_s12  ;;  %769 = vrot.lane.b32.xlu0 %v7095_v23, %s6839_s14  ;;  %11394 = vst [vmem:[#allocation13_spill] sm:$0xff] %v7323_v8  ;;  %11395 = vst [vmem:[#allocation14_spill] sm:$0xff] %v7330_v35 }
  0xd5   : > { %773 = vrot.lane.b32.xlu1 %v7117_v38, %s6839_s14  ;;  %777 = vrot.lane.b32.xlu0 %v7105_v29, %s6839_s14 }
  0xd9   : > { %781 = vrot.lane.b32.xlu1 %v7141_v48, %s6839_s14  ;;  %1935 = vrot.lane.b32.xlu0 %v7120_v39, %s6838_s12 }
  0xdd   : > { %1939 = vrot.lane.b32.xlu1 %v7162_v58, %s6838_s12  ;;  %1943 = vrot.lane.b32.xlu0 %v7130_v43, %s6838_s12 }
  0xe1   : > { %1947 = vrot.lane.b32.xlu1 %v7165_v59, %s6838_s12  ;;  %1933 = vrot.lane.b32.xlu0 %v7123_v40, %s6838_s12 }
  0xe5   : > { %1937 = vrot.lane.b32.xlu1 %v7168_v60, %s6838_s12  ;;  %1941 = vrot.lane.b32.xlu0 %v7133_v44, %s6838_s12 }
  0xe9   : > { %1945 = vrot.lane.b32.xlu1 %v7171_v61, %s6838_s12  ;;  %2165 = vrot.lane.b32.xlu0 %v7120_v39, %s6839_s14  ;;  %v1004_v39 = vrot.slane %v7095_v23, 1  ;;  %v1019_v23 = vrot.slane %v7141_v48, 1 }
  0xed   : > { %2169 = vrot.lane.b32.xlu1 %v7162_v58, %s6839_s14  ;;  %2173 = vrot.lane.b32.xlu0 %v7130_v43, %s6839_s14  ;;  %v7374_v43 = vsel %vm1003_vm4, %v1004_v39, %v1005_v45  ;;  %v1014_v58 = vrot.slane %v7105_v29, 1  ;;  %v7396_v29 = vsel %vm1003_vm4, %v1019_v23, %v1020_v34  ;;  %v1108_v34 = vrot.slane %v1100_v32, %v7186_v3 }
  0xef   : > { %v1132_v52 = vcombine.low %v1108_v34, %v1124_v6 }
  0xf1   : > { %2177 = vrot.lane.b32.xlu1 %v7165_v59, %s6839_s14  ;;  %1470 = vrot.lane.b32.xlu0 %v7292_v49, %s6839_s14 }
  0xf5   : > { %1474 = vrot.lane.b32.xlu1 %v7289_v26, %s6839_s14  ;;  %1478 = vrot.lane.b32.xlu0 %v7282_v18, %s6839_s14 }
  0xf9   : > { %1482 = vrot.lane.b32.xlu1 %v7275_v31, %s6839_s14  ;;  %2163 = vrot.lane.b32.xlu0 %v7123_v40, %s6839_s14  ;;  %v1009_v40 = vrot.slane %v7117_v38, 1  ;;  %v6840_v38 = vmov 1934713408  }
  0xfb   : > { %v7383_v59 = vsel %vm1003_vm4, %v1009_v40, %v1010_v46 }
  0xfd   : > { %2167 = vrot.lane.b32.xlu1 %v7168_v60, %s6839_s14  ;;  %2171 = vrot.lane.b32.xlu0 %v7133_v44, %s6839_s14  ;;  %v7386_v44 = vsel %vm1003_vm4, %v1014_v58, %v1015_v41  ;;  %v353_v60 = vunpack.c.l.s4 %v6840_v38 }
  0xff   : > { %v354_v48 = vunpack.c.0.s8 %v353_v60 }
 0x101   : > { %2175 = vrot.lane.b32.xlu1 %v7171_v61, %s6839_s14  ;;  %1468 = vrot.lane.b32.xlu0 %v7374_v43, %s6839_s14  ;;  %v7411_v47 = vsub.s32 %v354_v48, %v7101_v27 }
 0x103   : > { %11396 = vst [vmem:[#allocation15_spill] sm:$0xff] %v7411_v47  ;;  %v433_v61 = vrot.slane %v419_v11, %v7411_v47  ;;  %v442_v27 = vrot.slane %v434_v22, %v7411_v47  ;;  %v365_v2 = vrot.slane %v351_v25, %v7411_v47  ;;  %v449_v11 = vrot.slane %v435_v24, %v7411_v47 }
 0x104   : > { %v374_v22 = vrot.slane %v366_v36, %v7411_v47  ;;  %v7446_v25 = vrot.slane %v350_v33, %v7411_v47  ;;  %v381_v12 = vrot.slane %v367_v37, %v7411_v47  ;;  %v7460_v15 = vrot.slane %v418_v17, %v7411_v47 }
 0x105   : > { %1472 = vrot.lane.b32.xlu1 %v7383_v59, %s6839_s14  ;;  %1476 = vrot.lane.b32.xlu0 %v7386_v44, %s6839_s14  ;;  %v383_v30 = vcombine.high %v365_v2, %v11153_v0  ;;  %v451_v17 = vcombine.high %v433_v61, %v11153_v0  ;;  %v1048_v36 = vcombine.low %v7383_v59, %v7396_v29 }
 0x106   : > { %11397 = vst [vmem:[#allocation16_spill] sm:$0xff] %v7446_v25  ;;  %v382_v13 = vcombine.high %v7446_v25, %v11153_v0  ;;  %11398 = vst [vmem:[#allocation17_spill] sm:$0xff] %v7460_v15  ;;  %v450_v24 = vcombine.high %v7460_v15, %v11153_v0  ;;  %v384_v33 = vcombine.high %v374_v22, %v11153_v0 }
 0x107   : > { %v452_v45 = vcombine.high %v442_v27, %v11153_v0  ;;  %v385_v46 = vcombine.high %v381_v12, %v11153_v0  ;;  %v7493_v51 = vrot.slane %v1759_v21, %v7411_v47  ;;  %v453_v56 = vcombine.high %v449_v11, %v11153_v0 }
 0x108   : > { %v7508_v1 = vrot.slane %v1132_v52, %v7411_v47  ;;  %v1842_v23 = vrot.slane %v1828_v19, %v7411_v47  ;;  %v7527_v60 = vrot.slane %v1827_v20, %v7411_v47 }
 0x109   : > { %1480 = vrot.lane.b32.xlu1 %v7396_v29, %s6839_s14  ;;  %1240 = vrot.lane.b32.xlu0 %v7292_v49, %s6838_s12  ;;  %11402 = vst [vmem:[#allocation21_spill] sm:$0xff] %v7493_v51  ;;  %v1791_v21 = vcombine.high %v7493_v51, %v11153_v0 }
 0x10a   : > { %11405 = vst [vmem:[#allocation24_spill] sm:$0xff] %v7508_v1  ;;  %v1164_v38 = vcombine.high %v7508_v1, %v11153_v0  ;;  %11408 = vst [vmem:[#allocation27_spill] sm:$0xff] %v7527_v60  ;;  %v1859_v19 = vcombine.high %v7527_v60, %v11153_v0 }
 0x10d   : > { %1244 = vrot.lane.b32.xlu1 %v7289_v26, %s6838_s12  ;;  %1248 = vrot.lane.b32.xlu0 %v7282_v18, %s6838_s12  ;;  %v1056_v18 = vrot.slane %v1048_v36, %v7186_v3 }
 0x111   : > { %1252 = vrot.lane.b32.xlu1 %v7275_v31, %s6838_s12  ;;  %1238 = vrot.lane.b32.xlu0 %v7374_v43, %s6838_s12  ;;  %v1032_v31 = vcombine.low %v7374_v43, %v7386_v44 }
 0x113   : > { %v1040_v39 = vrot.slane %v1032_v31, %v7186_v3 }
 0x115   : > { %1242 = vrot.lane.b32.xlu1 %v7383_v59, %s6838_s12  ;;  %1246 = vrot.lane.b32.xlu0 %v7386_v44, %s6838_s12  ;;  %v1064_v48 = vcombine.low %v1040_v39, %v1056_v18 }
 0x117   : > { %v7542_v54 = vrot.slane %v1064_v48, %v7411_v47 }
 0x119   : > { %1250 = vrot.lane.b32.xlu1 %v7396_v29, %s6838_s12  ;;  %487 = vrot.lane.b32.xlu0 %v433_v61, %s6841_s15  ;;  %11411 = vst [vmem:[#allocation30_spill] sm:$0xff] %v7542_v54 }
 0x11d   : > { %495 = vrot.lane.b32.xlu0 %v442_v27, %s6842_s16  ;;  %459 = vrot.lane.b32.xlu1 %v365_v2, %s6841_s15  ;;  %v1774_v2 = vrot.slane %v1760_v28, %v7411_v47 }
 0x121   : > { %503 = vrot.lane.b32.xlu0 %v449_v11, %s6843_s8  ;;  %467 = vrot.lane.b32.xlu1 %v374_v22, %s6842_s16  ;;  %v1860_v11 = vcombine.high %v1842_v23, %v11153_v0  ;;  %v1096_v22 = vcombine.high %v7542_v54, %v11153_v0 }
 0x125   : > { %475 = vrot.lane.b32.xlu1 %v381_v12, %s6843_s8  ;;  %455 = vrot.lane.b32.xlu0 %v382_v13, %s6844_s7  ;;  %v1133_v12 = vcombine.high %v1108_v34, %v1124_v6 }
 0x127   : > { %v1147_v16 = vrot.slane %v1133_v12, %v7411_v47 }
 0x129   : > { %483 = vrot.lane.b32.xlu1 %v450_v24, %s6844_s7  ;;  %463 = vrot.lane.b32.xlu0 %v383_v30, %s6845_s9  ;;  %v1792_v24 = vcombine.high %v1774_v2, %v11153_v0  ;;  %v1065_v30 = vcombine.high %v1040_v39, %v1056_v18 }
 0x12b   : > { %v7474_v7 = vpop.permute.xlu0 %541  ;;  %v7483_v37 = vpop.permute.xlu1 %545  ;;  %v1079_v52 = vrot.slane %v1065_v30, %v7411_v47 }
 0x12c   : > { %11399 = vst [vmem:[#allocation18_spill] sm:$0xff] %v7474_v7  ;;  %11400 = vst [vmem:[#allocation19_spill] sm:$0xff] %v7483_v37 }
 0x12d   : > { %491 = vrot.lane.b32.xlu1 %v451_v17, %s6845_s9  ;;  %471 = vrot.lane.b32.xlu0 %v384_v33, %s6846_s10 }
 0x12f   : > { %v7485_v41 = vpop.permute.xlu0 %549 }
 0x130   : > { %11401 = vst [vmem:[#allocation20_spill] sm:$0xff] %v7485_v41  ;;  %v631_v6 = vcombine.low %v7474_v7, %v7485_v41 }
 0x131   : > { %499 = vrot.lane.b32.xlu1 %v452_v45, %s6846_s10  ;;  %479 = vrot.lane.b32.xlu0 %v385_v46, %s6847_s11  ;;  %v1851_v46 = vrot.slane %v1843_v4, %v7411_v47  ;;  %v1165_v4 = vcombine.high %v1147_v16, %v11153_v0 }
 0x132   : > { %v639_v18 = vrot.slane %v631_v6, %v7186_v3 }
 0x133   : > { %v7500_v26 = vpop.permute.xlu1 %553  ;;  %v7502_v49 = vpop.permute.xlu0 %771 }
 0x134   : > { %11403 = vst [vmem:[#allocation22_spill] sm:$0xff] %v7500_v26  ;;  %11404 = vst [vmem:[#allocation23_spill] sm:$0xff] %v7502_v49  ;;  %v647_v9 = vcombine.low %v7483_v37, %v7500_v26 }
 0x135   : > { %507 = vrot.lane.b32.xlu1 %v453_v56, %s6847_s11  ;;  %1864 = vrot.lane.b32.xlu0 %v1791_v21, %s6844_s7 }
 0x136   : > { %v655_v34 = vrot.slane %v647_v9, %v7186_v3  ;;  %v1861_v9 = vcombine.high %v1851_v46, %v11153_v0 }
 0x137   : > { %v7513_v58 = vpop.permute.xlu1 %775  ;;  %v7515_v40 = vpop.permute.xlu0 %779 }
 0x138   : > { %11406 = vst [vmem:[#allocation25_spill] sm:$0xff] %v7513_v58  ;;  %11407 = vst [vmem:[#allocation26_spill] sm:$0xff] %v7515_v40  ;;  %v663_v21 = vcombine.low %v639_v18, %v655_v34  ;;  %v861_v30 = vcombine.low %v7502_v49, %v7515_v40 }
 0x139   : > { %1896 = vrot.lane.b32.xlu1 %v1842_v23, %s6841_s15  ;;  %1197 = vrot.lane.b32.xlu0 %v1164_v38, %s6844_s7  ;;  %v7603_v38 = vrot.slane %v1775_v14, %v7411_v47  ;;  %v1097_v14 = vcombine.high %v1079_v52, %v11153_v0 }
 0x13b   : > { %v7531_v61 = vpop.permute.xlu1 %783  ;;  %v7533_v27 = vpop.permute.xlu0 %539 }
 0x13c   : > { %11409 = vst [vmem:[#allocation28_spill] sm:$0xff] %v7531_v61  ;;  %11410 = vst [vmem:[#allocation29_spill] sm:$0xff] %v7533_v27 }
 0x13d   : > { %1892 = vrot.lane.b32.xlu1 %v1859_v19, %s6844_s7  ;;  %1868 = vrot.lane.b32.xlu0 %v1774_v2, %s6841_s15  ;;  %v877_v19 = vcombine.low %v7513_v58, %v7531_v61 }
 0x13f   : > { %v7546_v55 = vpop.permute.xlu1 %543  ;;  %v7548_v20 = vpop.permute.xlu0 %547  ;;  %v885_v6 = vrot.slane %v877_v19, %v7186_v3 }
 0x140   : > { %11412 = vst [vmem:[#allocation31_spill] sm:$0xff] %v7546_v55  ;;  %11413 = vst [vmem:[#allocation32_spill] sm:$0xff] %v7548_v20  ;;  %v563_v5 = vcombine.low %v7533_v27, %v7548_v20 }
 0x141   : > { %1900 = vrot.lane.b32.xlu1 %v1860_v11, %s6845_s9  ;;  %1169 = vrot.lane.b32.xlu0 %v1096_v22, %s6844_s7 }
 0x142   : > { %v7572_v17 = vrot.slane %v563_v5, %v7186_v3 }
 0x143   : > { %v7559_v28 = vpop.permute.xlu1 %551  ;;  %v7561_v13 = vpop.permute.xlu0 %769 }
 0x144   : > { %11414 = vst [vmem:[#allocation33_spill] sm:$0xff] %v7559_v28  ;;  %11415 = vst [vmem:[#allocation34_spill] sm:$0xff] %v7561_v13  ;;  %v579_v32 = vcombine.low %v7546_v55, %v7559_v28 }
 0x145   : > { %1201 = vrot.lane.b32.xlu1 %v1147_v16, %s6841_s15  ;;  %1872 = vrot.lane.b32.xlu0 %v1792_v24, %s6845_s9  ;;  %v1148_v16 = vcombine.low %v7330_v35, %v7323_v8  ;;  %v7629_v24 = vrot.slane %v663_v21, %v7411_v47 }
 0x146   : > { %v7575_v33 = vrot.slane %v579_v32, %v7186_v3 }
 0x147   : > { %v7578_v36 = vpop.permute.xlu1 %773  ;;  %v7580_v45 = vpop.permute.xlu0 %777  ;;  %11421 = vst [vmem:[#allocation40_spill] sm:$0xff] %v7629_v24  ;;  %v7643_v21 = vrot.slane %v1148_v16, %v7411_v47 }
 0x148   : > { %11416 = vst [vmem:[#allocation35_spill] sm:$0xff] %v7578_v36  ;;  %11417 = vst [vmem:[#allocation36_spill] sm:$0xff] %v7580_v45  ;;  %v793_v56 = vcombine.low %v7561_v13, %v7580_v45  ;;  %v595_v22 = vcombine.low %v7572_v17, %v7575_v33 }
 0x149   : > { %1904 = vrot.lane.b32.xlu1 %v1851_v46, %s6842_s16  ;;  %1173 = vrot.lane.b32.xlu0 %v1079_v52, %s6841_s15  ;;  %v664_v52 = vcombine.high %v639_v18, %v655_v34  ;;  %11422 = vst [vmem:[#allocation41_spill] sm:$0xff] %v7643_v21 }
 0x14a   : > { %v7613_v2 = vrot.slane %v793_v56, %v7186_v3  ;;  %v7648_v53 = vrot.slane %v595_v22, %v7411_v47 }
 0x14b   : > { %v7594_v39 = vpop.permute.xlu1 %781  ;;  %v7596_v23 = vpop.permute.xlu0 %1935 }
 0x14c   : > { %11418 = vst [vmem:[#allocation37_spill] sm:$0xff] %v7594_v39  ;;  %v809_v48 = vcombine.low %v7578_v36, %v7594_v39  ;;  %11419 = vst [vmem:[#allocation38_spill] sm:$0xff] %v7613_v2  ;;  %v627_v42 = vcombine.high %v7648_v53, %v11153_v0 }
 0x14d   : > { %1205 = vrot.lane.b32.xlu1 %v1165_v4, %s6845_s9  ;;  %1876 = vrot.lane.b32.xlu0 %v7603_v38, %s6842_s16  ;;  %11423 = vst [vmem:[#allocation42_spill] sm:$0xff] %v7648_v53 }
 0x14e   : > { %v7616_v11 = vrot.slane %v809_v48, %v7186_v3  ;;  %v695_v48 = vcombine.high %v7629_v24, %v11153_v0 }
 0x14f   : > { %v7621_v12 = vpop.permute.xlu1 %1939  ;;  %v7623_v5 = vpop.permute.xlu0 %1943 }
 0x150   : > { %11420 = vst [vmem:[#allocation39_spill] sm:$0xff] %v7616_v11  ;;  %v825_v46 = vcombine.low %v7613_v2, %v7616_v11  ;;  %v2025_v34 = vcombine.low %v7596_v23, %v7623_v5  ;;  %v2026_v36 = vcombine.high %v7596_v23, %v7623_v5 }
 0x151   : > { %1908 = vrot.lane.b32.xlu1 %v1861_v9, %s6846_s10  ;;  %1177 = vrot.lane.b32.xlu0 %v1097_v14, %s6845_s9  ;;  %v869_v14 = vrot.slane %v861_v30, %v7186_v3  ;;  %v7658_v9 = vrot.slane %v664_v52, %v7411_v47 }
 0x152   : > { %v7670_v31 = vrot.slane %v825_v46, %v7411_v47  ;;  %v7756_v8 = vrot.slane %v2026_v36, %v7186_v3 }
 0x153   : > { %v1948_v56 = vpop.permute.xlu1 %1947  ;;  %v7640_v4 = vpop.permute.xlu0 %1933  ;;  %v893_v18 = vcombine.low %v869_v14, %v885_v6  ;;  %11424 = vst [vmem:[#allocation43_spill] sm:$0xff] %v7658_v9  ;;  %v894_v32 = vcombine.high %v869_v14, %v885_v6 }
 0x154   : > { %v2041_v19 = vcombine.low %v7621_v12, %v1948_v56  ;;  %11425 = vst [vmem:[#allocation44_spill] sm:$0xff] %v7670_v31  ;;  %v857_v14 = vcombine.high %v7670_v31, %v11153_v0 }
 0x155   : > { %1209 = vrot.lane.b32.xlu1 %v7643_v21, %s6842_s16  ;;  %728 = vrot.lane.b32.xlu0 %v695_v48, %s6844_s7  ;;  %v7673_v48 = vrot.slane %v2025_v34, %v7186_v3  ;;  %v7679_v52 = vrot.slane %v893_v18, %v7411_v47  ;;  %v7686_v46 = vrot.slane %v894_v32, %v7411_v47 }
 0x156   : > { %v7661_v16 = vrot.slane %v2041_v19, %v7186_v3 }
 0x157   : > { %v7663_v22 = vpop.permute.xlu1 %1937  ;;  %v7665_v30 = vpop.permute.xlu0 %1941  ;;  %11426 = vst [vmem:[#allocation45_spill] sm:$0xff] %v7679_v52  ;;  %11427 = vst [vmem:[#allocation46_spill] sm:$0xff] %v7686_v46  ;;  %v925_v31 = vcombine.high %v7679_v52, %v11153_v0 }
 0x158   : > { %v1957_v19 = vcombine.low %v7640_v4, %v7665_v30  ;;  %v2058_v34 = vcombine.high %v7673_v48, %v7661_v16  ;;  %v1958_v40 = vcombine.high %v7640_v4, %v7665_v30 }
 0x159   : > { %732 = vrot.lane.b32.xlu1 %v7658_v9, %s6841_s15  ;;  %700 = vrot.lane.b32.xlu0 %v627_v42, %s6844_s7 }
 0x15a   : > { %v7701_v32 = vrot.slane %v1957_v19, %v7186_v3  ;;  %v7706_v54 = vrot.slane %v2058_v34, %v7411_v47 }
 0x15b   : > { %v7683_v10 = vpop.permute.xlu1 %1945  ;;  %v2166_v6 = vpop.permute.xlu0 %2165 }
 0x15c   : > { %v1973_v42 = vcombine.low %v7663_v22, %v7683_v10 }
 0x15d   : > { %962 = vrot.lane.b32.xlu1 %v7686_v46, %s6841_s15  ;;  %930 = vrot.lane.b32.xlu0 %v857_v14, %s6844_s7 }
 0x15e   : > { %v7698_v18 = vrot.slane %v1973_v42, %v7186_v3 }
 0x15f   : > { %v2170_v53 = vpop.permute.xlu1 %2169  ;;  %v2174_v24 = vpop.permute.xlu0 %2173 }
 0x160   : > { %v1990_v14 = vcombine.high %v7701_v32, %v7698_v18  ;;  %v2255_v42 = vcombine.low %v2166_v6, %v2174_v24  ;;  %v2256_v35 = vcombine.high %v2166_v6, %v2174_v24 }
 0x161   : > { %958 = vrot.lane.b32.xlu1 %v925_v31, %s6844_s7  ;;  %2126 = vrot.lane.b32.xlu0 %v7706_v54, %s6841_s15 }
 0x162   : > { %v7716_v15 = vrot.slane %v1990_v14, %v7411_v47  ;;  %v7724_v31 = vrot.slane %v2255_v42, %v7186_v3  ;;  %v2042_v14 = vcombine.high %v7621_v12, %v1948_v56  ;;  %v7769_v24 = vrot.slane %v2256_v35, %v7186_v3 }
 0x163   : > { %v2178_v1 = vpop.permute.xlu1 %2177  ;;  %v7713_v19 = vpop.permute.xlu0 %1470 }
 0x164   : > { %v2271_v25 = vcombine.low %v2170_v53, %v2178_v1  ;;  %v7750_v56 = vrot.slane %v2042_v14, %v7186_v3  ;;  %v2272_v39 = vcombine.high %v2170_v53, %v2178_v1 }
 0x165   : > { %2098 = vrot.lane.b32.xlu0 %v7716_v15, %s6841_s15 }
 0x166   : > { %v7721_v34 = vrot.slane %v2271_v25, %v7186_v3  ;;  %v2073_v1 = vcombine.low %v7756_v8, %v7750_v56 }
 0x167   : > { %v7726_v0 = vpop.permute.xlu1 %1474  ;;  %v7728_v52 = vpop.permute.xlu0 %1478 }
 0x168   : > { %v2288_v51 = vcombine.high %v7724_v31, %v7721_v34  ;;  %v1560_v60 = vcombine.low %v7713_v19, %v7728_v52  ;;  %v1561_v7 = vcombine.high %v7713_v19, %v7728_v52 }
 0x16a   : > { %v7738_v25 = vrot.slane %v2288_v51, %v7411_v47  ;;  %v7753_v27 = vrot.slane %v1560_v60, %v7186_v3  ;;  %v7876_v26 = vrot.slane %v1561_v7, %v7186_v3 }
 0x16b   : > { %v7735_v13 = vpop.permute.xlu1 %1482  ;;  %v2164_v45 = vpop.permute.xlu0 %2163 }
 0x16c   : > { %v1576_v42 = vcombine.low %v7726_v0, %v7735_v13  ;;  %2356 = vrot.lane.b32.xlu1 %v7738_v25, %s6841_s15 }
 0x16e   : > { %v7747_v12 = vrot.slane %v1576_v42, %v7186_v3  ;;  %v7761_v42 = vrot.slane %v2272_v39, %v7186_v3 }
 0x16f   : > { %v2168_v51 = vpop.permute.xlu1 %2167  ;;  %v2172_v20 = vpop.permute.xlu0 %2171 }
 0x170   : > { %v1593_v23 = vcombine.high %v7753_v27, %v7747_v12  ;;  %v2188_v5 = vcombine.high %v2164_v45, %v2172_v20  ;;  %v2187_v55 = vcombine.low %v2164_v45, %v2172_v20  ;;  %v2303_v6 = vcombine.low %v7769_v24, %v7761_v42 }
 0x172   : > { %v7764_v53 = vrot.slane %v1593_v23, %v7411_v47  ;;  %v7774_v39 = vrot.slane %v2188_v5, %v7186_v3  ;;  %v7803_v50 = vrot.slane %v2303_v6, %v7411_v47  ;;  %v7828_v6 = vrot.slane %v1958_v40, %v7186_v3 }
 0x173   : > { %v2176_v14 = vpop.permute.xlu1 %2175  ;;  %v1469_v28 = vpop.permute.xlu0 %1468 }
 0x174   : > { %v2203_v60 = vcombine.low %v2168_v51, %v2176_v14  ;;  %v2204_v36 = vcombine.high %v2168_v51, %v2176_v14  ;;  %1661 = vrot.lane.b32.xlu1 %v7764_v53, %s6841_s15  ;;  %v7785_v51 = vrot.slane %v2187_v55, %v7186_v3  ;;  %v7788_v14 = vrot.slane %v2073_v1, %v7411_v47 }
 0x176   : > { %v7777_v20 = vrot.slane %v2203_v60, %v7186_v3  ;;  %v7780_v45 = vrot.slane %v2204_v36, %v7186_v3  ;;  %v1974_v60 = vcombine.high %v7663_v22, %v7683_v10 }
 0x177   : > { %v1473_v35 = vpop.permute.xlu1 %1472  ;;  %v1477_v23 = vpop.permute.xlu0 %1476 }
 0x178   : > { %2134 = vrot.lane.b32.xlu1 %v7788_v14, %s6842_s16  ;;  %v2220_v36 = vcombine.high %v7785_v51, %v7777_v20  ;;  %v1492_v49 = vcombine.low %v1469_v28, %v1477_v23  ;;  %v1493_v55 = vcombine.high %v1469_v28, %v1477_v23  ;;  %v7809_v58 = vrot.slane %v1974_v60, %v7186_v3 }
 0x17a   : > { %v7806_v5 = vrot.slane %v2220_v36, %v7411_v47  ;;  %v7816_v28 = vrot.slane %v1492_v49, %v7186_v3  ;;  %v7819_v4 = vrot.slane %v1493_v55, %v7186_v3  ;;  %v2005_v36 = vcombine.low %v7828_v6, %v7809_v58 }
 0x17b   : > { %v1481_v63 = vpop.permute.xlu1 %1480  ;;  %v7800_v1 = vpop.permute.xlu0 %1240  ;;  %v1577_v55 = vcombine.high %v7726_v0, %v7735_v13 }
 0x17c   : > { %v1508_v10 = vcombine.low %v1473_v35, %v1481_v63  ;;  %v1509_v22 = vcombine.high %v1473_v35, %v1481_v63  ;;  %2364 = vrot.lane.b32.xlu1 %v7803_v50, %s6842_s16  ;;  %2328 = vrot.lane.b32.xlu0 %v7806_v5, %s6841_s15  ;;  %v7858_v0 = vrot.slane %v2005_v36, %v7411_v47 }
 0x17d   : > { %v7861_v13 = vrot.slane %v1577_v55, %v7186_v3 }
 0x17e   : > { %v7822_v30 = vrot.slane %v1508_v10, %v7186_v3  ;;  %v7825_v63 = vrot.slane %v1509_v22, %v7186_v3 }
 0x17f   : > { %v7830_v35 = vpop.permute.xlu1 %1244  ;;  %v7832_v23 = vpop.permute.xlu0 %1248  ;;  %v1608_v55 = vcombine.low %v7876_v26, %v7861_v13 }
 0x180   : > { %v1525_v49 = vcombine.high %v7816_v28, %v7822_v30  ;;  %v1330_v40 = vcombine.low %v7800_v1, %v7832_v23 }
 0x182   : > { %v7845_v10 = vrot.slane %v1525_v49, %v7411_v47  ;;  %v2235_v49 = vcombine.low %v7774_v39, %v7780_v45  ;;  %v7866_v41 = vrot.slane %v1330_v40, %v7186_v3 }
 0x183   : > { %v7847_v22 = vpop.permute.xlu1 %1252  ;;  %v7849_v61 = vpop.permute.xlu0 %1238 }
 0x184   : > { %11428 = vst [vmem:[#allocation47_spill] sm:$0xff] %v7849_v61  ;;  %v1346_v60 = vcombine.low %v7830_v35, %v7847_v22  ;;  %1633 = vrot.lane.b32.xlu0 %v7845_v10, %s6841_s15  ;;  %v7890_v21 = vrot.slane %v2235_v49, %v7411_v47 }
 0x186   : > { %v7869_v52 = vrot.slane %v1346_v60, %v7186_v3 }
 0x187   : > { %v7871_v19 = vpop.permute.xlu1 %1242  ;;  %v7873_v37 = vpop.permute.xlu0 %1246 }
 0x188   : > { %11429 = vst [vmem:[#allocation48_spill] sm:$0xff] %v7873_v37  ;;  %v1363_v36 = vcombine.high %v7866_v41, %v7869_v52  ;;  %2106 = vrot.lane.b32.xlu0 %v7858_v0, %s6842_s16  ;;  %v1262_v60 = vcombine.low %v7849_v61, %v7873_v37 }
 0x18a   : > { %v7887_v40 = vrot.slane %v1363_v36, %v7411_v47  ;;  %v2074_v36 = vcombine.high %v7756_v8, %v7750_v56  ;;  %v7905_v2 = vrot.slane %v1262_v60, %v7186_v3  ;;  %v2304_v56 = vcombine.high %v7769_v24, %v7761_v42 }
 0x18b   : > { %v7892_v7 = vpop.permute.xlu1 %1250  ;;  %v7894_v46 = vpop.permute.xlu0 %487 }
 0x18c   : > { %11430 = vst [vmem:[#allocation49_spill] sm:$0xff] %v7894_v46  ;;  %v1278_v11 = vcombine.low %v7871_v19, %v7892_v7  ;;  %1431 = vrot.lane.b32.xlu1 %v7887_v40, %s6841_s15  ;;  %2336 = vrot.lane.b32.xlu0 %v7890_v21, %s6842_s16  ;;  %v7911_v46 = vrot.slane %v1608_v55, %v7411_v47 }
 0x18d   : > { %v7922_v8 = vrot.slane %v2074_v36, %v7411_v47  ;;  %v1540_v55 = vcombine.low %v7819_v4, %v7825_v63  ;;  %v7948_v42 = vrot.slane %v2304_v56, %v7411_v47 }
 0x18e   : > { %v7908_v49 = vrot.slane %v1278_v11, %v7186_v3  ;;  %v1989_v11 = vcombine.low %v7701_v32, %v7698_v18  ;;  %v2057_v18 = vcombine.low %v7673_v48, %v7661_v16  ;;  %v2006_v32 = vcombine.high %v7828_v6, %v7809_v58 }
 0x18f   : > { %v7913_v9 = vpop.permute.xlu0 %495  ;;  %v7915_v61 = vpop.permute.xlu1 %459  ;;  %v7951_v24 = vrot.slane %v1540_v55, %v7411_v47  ;;  %v1592_v16 = vcombine.low %v7753_v27, %v7747_v12  ;;  %v11436_v48 = vmov 0.0   ;;  %v2219_v27 = vcombine.low %v7785_v51, %v7777_v20 }
 0x190   : > { %11431 = vst [vmem:[#allocation50_spill] sm:$0xff] %v7913_v9  ;;  %11432 = vst [vmem:[#allocation51_spill] sm:$0xff] %v7915_v61  ;;  %v1295_v37 = vcombine.high %v7905_v2, %v7908_v49  ;;  %1669 = vrot.lane.b32.xlu1 %v7911_v46, %s6842_s16  ;;  %v7954_v36 = vrot.slane %v1989_v11, %v7411_v47  ;;  %v7965_v58 = vrot.slane %v2057_v18, %v7411_v47 }
 0x191   : > { %v7991_v18 = vrot.slane %v1592_v16, %v7411_v47  ;;  %v2090_v20 = vcombine.high %v7706_v54, %v11436_v48  ;;  %v1524_v51 = vcombine.low %v7816_v28, %v7822_v30  ;;  %v2320_v54 = vcombine.high %v7738_v25, %v11436_v48 }
 0x192   : > { %v7931_v60 = vrot.slane %v1295_v37, %v7411_v47  ;;  %v2287_v37 = vcombine.low %v7724_v31, %v7721_v34  ;;  %v2021_v34 = vcombine.high %v7954_v36, %v11436_v48  ;;  %v7972_v31 = vrot.slane %v2006_v32, %v7411_v47 }
 0x193   : > { %v7933_v9 = vpop.permute.xlu0 %503  ;;  %v7935_v61 = vpop.permute.xlu1 %467  ;;  %v2089_v55 = vcombine.high %v7965_v58, %v11436_v48  ;;  %v1624_v16 = vcombine.high %v7991_v18, %v11436_v48  ;;  %v8024_v30 = vrot.slane %v1524_v51, %v7411_v47  ;;  %v2022_v51 = vcombine.high %v7716_v15, %v11436_v48 }
 0x194   : > { %11433 = vst [vmem:[#allocation52_spill] sm:$0xff] %v7933_v9  ;;  %11434 = vst [vmem:[#allocation53_spill] sm:$0xff] %v7935_v61  ;;  %2142 = vrot.lane.b32.xlu1 %v7922_v8, %s6843_s8  ;;  %1403 = vrot.lane.b32.xlu0 %v7931_v60, %s6841_s15  ;;  %v7975_v6 = vrot.slane %v2287_v37, %v7411_v47 }
 0x196   : > { %v2319_v12 = vcombine.high %v7975_v6, %v11436_v48 }
 0x197   : > { %v7956_v9 = vpop.permute.xlu1 %475  ;;  %v7958_v61 = vpop.permute.xlu0 %455 }
 0x198   : > { %11435 = vst [vmem:[#allocation54_spill] sm:$0xff] %v7956_v9  ;;  %2372 = vrot.lane.b32.xlu1 %v7948_v42, %s6843_s8  ;;  %1641 = vrot.lane.b32.xlu0 %v7951_v24, %s6842_s16  ;;  %v8008_v9 = vrot.slane %v2219_v27, %v7411_v47 }
 0x19b   : > { %v7977_v11 = vpop.permute.xlu1 %483  ;;  %v7979_v56 = vpop.permute.xlu0 %463 }
 0x19c   : > { %11437 = vst [vmem:[#allocation55_spill] sm:$0xff] %v7977_v11  ;;  %11438 = vst [vmem:[#allocation56_spill] sm:$0xff] %v7979_v56  ;;  %2094 = vrot.lane.b32.xlu1 %v2021_v34, %s6844_s7  ;;  %2114 = vrot.lane.b32.xlu0 %v7972_v31, %s6843_s8  ;;  %v1362_v34 = vcombine.low %v7866_v41, %v7869_v52  ;;  %v2251_v41 = vcombine.high %v8008_v9, %v11436_v48 }
 0x19e   : > { %v8021_v28 = vrot.slane %v1362_v34, %v7411_v47 }
 0x19f   : > { %v7993_v32 = vpop.permute.xlu1 %491  ;;  %v7995_v37 = vpop.permute.xlu0 %471 }
 0x1a0   : > { %11439 = vst [vmem:[#allocation57_spill] sm:$0xff] %v7993_v32  ;;  %11440 = vst [vmem:[#allocation58_spill] sm:$0xff] %v7995_v37  ;;  %2352 = vrot.lane.b32.xlu1 %v2319_v12, %s6844_s7  ;;  %2122 = vrot.lane.b32.xlu0 %v2089_v55, %s6844_s7  ;;  %v1394_v25 = vcombine.high %v8021_v28, %v11436_v48  ;;  %v1556_v55 = vcombine.high %v8024_v30, %v11436_v48 }
 0x1a3   : > { %v8010_v37 = vpop.permute.xlu1 %499  ;;  %v8012_v12 = vpop.permute.xlu0 %479 }
 0x1a4   : > { %11441 = vst [vmem:[#allocation59_spill] sm:$0xff] %v8010_v37  ;;  %11442 = vst [vmem:[#allocation60_spill] sm:$0xff] %v8012_v12  ;;  %2130 = vrot.lane.b32.xlu1 %v2090_v20, %s6845_s9  ;;  %1657 = vrot.lane.b32.xlu0 %v1624_v16, %s6844_s7  ;;  %v1625_v16 = vcombine.high %v7764_v53, %v11436_v48  ;;  %v2321_v53 = vcombine.high %v7803_v50, %v11436_v48 }
 0x1a5   : > { %v1331_v50 = vcombine.high %v7800_v1, %v7832_v23 }
 0x1a7   : > { %v8026_v52 = vpop.permute.xlu1 %507  ;;  %v8028_v27 = vpop.permute.xlu0 %1864 }
 0x1a8   : > { %11443 = vst [vmem:[#allocation61_spill] sm:$0xff] %v8026_v52  ;;  %2360 = vrot.lane.b32.xlu1 %v2320_v54, %s6845_s9  ;;  %2324 = vrot.lane.b32.xlu0 %v2251_v41, %s6844_s7  ;;  %v1294_v54 = vcombine.low %v7905_v2, %v7908_v49  ;;  %v11472_v52 = vld [vmem:[#allocation18_spill] sm:$0xff] }
 0x1aa   : > { %v8059_v15 = vrot.slane %v1294_v54, %v7411_v47 }
 0x1ab   : > { %v8036_v20 = vpop.permute.xlu1 %1896  ;;  %v8038_v34 = vpop.permute.xlu0 %1197 }
 0x1ac   : > { %11444 = vst [vmem:[#allocation62_spill] sm:$0xff] %v8038_v34  ;;  %1427 = vrot.lane.b32.xlu1 %v1394_v25, %s6844_s7  ;;  %1629 = vrot.lane.b32.xlu0 %v1556_v55, %s6844_s7  ;;  %v2091_v25 = vcombine.high %v7788_v14, %v11436_v48  ;;  %v2252_v55 = vcombine.high %v7806_v5, %v11436_v48 }
 0x1ad   : > { %v1326_v14 = vcombine.high %v8059_v15, %v11436_v48  ;;  %v1347_v5 = vcombine.high %v7830_v35, %v7847_v22  ;;  %v1626_v35 = vcombine.high %v7911_v46, %v11436_v48  ;;  %v8095_v22 = vrot.slane %v1331_v50, %v7186_v3 }
 0x1ae   : > { %v2253_v46 = vcombine.high %v7890_v21, %v11436_v48 }
 0x1af   : > { %v8048_v41 = vpop.permute.xlu1 %1892  ;;  %v8056_v12 = vpop.permute.xlu0 %1868 }
 0x1b0   : > { %1665 = vrot.lane.b32.xlu1 %v1625_v16, %s6845_s9  ;;  %2102 = vrot.lane.b32.xlu0 %v2022_v51, %s6845_s9  ;;  %v1395_v51 = vcombine.high %v7887_v40, %v11436_v48  ;;  %v1557_v16 = vcombine.high %v7845_v10, %v11436_v48  ;;  %v2023_v10 = vcombine.high %v7858_v0, %v11436_v48 }
 0x1b1   : > { %v2092_v40 = vcombine.high %v7922_v8, %v11436_v48  ;;  %v1609_v0 = vcombine.high %v7876_v26, %v7861_v13  ;;  %v1793_v26 = vcombine.high %v7603_v38, %v11436_v48  ;;  %v11451_v38 = vcombine.high %v7774_v39, %v7780_v45 }
 0x1b2   : > { %v11454_v39 = vcombine.high %v7572_v17, %v7575_v33  ;;  %v11459_v33 = vld [vmem:[#allocation38_spill] sm:$0xff] }
 0x1b3   : > { %v8063_v2 = vpop.permute.xlu1 %1900  ;;  %v8069_v49 = vpop.permute.xlu0 %1169  ;;  %v1623_v8 = vrot.slane %v1609_v0, %v7411_v47 }
 0x1b4   : > { %2138 = vrot.lane.b32.xlu1 %v2091_v25, %s6846_s10  ;;  %2332 = vrot.lane.b32.xlu0 %v2252_v55, %s6845_s9  ;;  %11445 = vst [vmem:[#allocation63_spill] sm:$0xff] %v8069_v49  ;;  %v8086_v25 = vrot.slane %v1347_v5, %v7186_v3  ;;  %v1327_v5 = vcombine.high %v7931_v60, %v11436_v48 }
 0x1b5   : > { %v11449_v60 = vcombine.high %v7300_v57, %v7303_v62  ;;  %v1033_v57 = vcombine.high %v7374_v43, %v7386_v44  ;;  %v610_v45 = vrot.slane %v11454_v39, %v7411_v47  ;;  %v2322_v43 = vcombine.high %v7948_v42, %v11436_v48  ;;  %v11460_v42 = vld [vmem:[#allocation39_spill] sm:$0xff] }
 0x1b6   : > { %v1378_v1 = vcombine.low %v8095_v22, %v8086_v25 }
 0x1b7   : > { %v8081_v54 = vpop.permute.xlu1 %1201  ;;  %v8088_v55 = vpop.permute.xlu0 %1872  ;;  %v1858_v50 = vrot.slane %v11449_v60, %v7411_v47  ;;  %v8167_v44 = vrot.slane %v1033_v57, %v7186_v3 }
 0x1b8   : > { %2368 = vrot.lane.b32.xlu1 %v2321_v53, %s6846_s10  ;;  %1399 = vrot.lane.b32.xlu0 %v1326_v14, %s6844_s7  ;;  %11446 = vst [vmem:[#allocation64_spill] sm:$0xff] %v8081_v54  ;;  %v1386_v14 = vrot.slane %v1378_v1, %v7411_v47  ;;  %v2024_v1 = vcombine.high %v7972_v31, %v11436_v48  ;;  %v11455_v31 = vld [vmem:[#allocation48_spill] sm:$0xff] }
 0x1bb   : > { %v8101_v23 = vpop.permute.xlu1 %1904  ;;  %v8107_v53 = vpop.permute.xlu0 %1173 }
 0x1bc   : > { %1435 = vrot.lane.b32.xlu1 %v1395_v51, %s6845_s9  ;;  %1637 = vrot.lane.b32.xlu0 %v1557_v16, %s6845_s9  ;;  %11447 = vst [vmem:[#allocation65_spill] sm:$0xff] %v8107_v53  ;;  %v1558_v16 = vcombine.high %v7951_v24, %v11436_v48  ;;  %v1049_v24 = vcombine.high %v7383_v59, %v7396_v29 }
 0x1bd   : > { %v1279_v59 = vcombine.high %v7871_v19, %v7892_v7  ;;  %v11457_v19 = vld [vmem:[#allocation43_spill] sm:$0xff] }
 0x1be   : > { %v696_v7 = vcombine.high %v11457_v19, %v11436_v48 }
 0x1bf   : > { %v8116_v51 = vpop.permute.xlu1 %1205  ;;  %v8120_v21 = vpop.permute.xlu0 %1876 }
 0x1c0   : > { %1673 = vrot.lane.b32.xlu1 %v1626_v35, %s6846_s10  ;;  %2110 = vrot.lane.b32.xlu0 %v2023_v10, %s6846_s10  ;;  %11448 = vst [vmem:[#allocation66_spill] sm:$0xff] %v8116_v51  ;;  %v2250_v10 = vrot.slane %v11451_v38, %v7411_v47 }
 0x1c3   : > { %v8129_v13 = vpop.permute.xlu1 %1908  ;;  %v8135_v35 = vpop.permute.xlu0 %1177 }
 0x1c4   : > { %2146 = vrot.lane.b32.xlu1 %v2092_v40, %s6847_s11  ;;  %2340 = vrot.lane.b32.xlu0 %v2253_v46, %s6846_s10  ;;  %11450 = vst [vmem:[#allocation67_spill] sm:$0xff] %v8135_v35  ;;  %v8154_v40 = vrot.slane %v1049_v24, %v7186_v3  ;;  %v11456_v46 = vld [vmem:[#allocation47_spill] sm:$0xff] }
 0x1c5   : > { %v1263_v0 = vcombine.high %v11456_v46, %v11455_v31  ;;  %v11465_v31 = vld [vmem:[#allocation41_spill] sm:$0xff] }
 0x1c6   : > { %v1080_v60 = vcombine.low %v8167_v44, %v8154_v40  ;;  %v1166_v46 = vcombine.high %v11465_v31, %v11436_v48  ;;  %v11471_v31 = vld [vmem:[#allocation20_spill] sm:$0xff] }
 0x1c7   : > { %v8149_v62 = vpop.permute.xlu1 %1209  ;;  %v8158_v29 = vpop.permute.xlu0 %728  ;;  %v8187_v24 = vrot.slane %v1263_v0, %v7186_v3  ;;  %v632_v37 = vcombine.high %v11472_v52, %v11471_v31  ;;  %v1627_v52 = vcombine.high %v1623_v8, %v11436_v48 }
 0x1c8   : > { %1439 = vrot.lane.b32.xlu1 %v1386_v14, %s6842_s16  ;;  %1407 = vrot.lane.b32.xlu0 %v1327_v5, %s6845_s9  ;;  %11452 = vst [vmem:[#allocation68_spill] sm:$0xff] %v8149_v62  ;;  %11453 = vst [vmem:[#allocation69_spill] sm:$0xff] %v8158_v29  ;;  %v8176_v5 = vrot.slane %v1279_v59, %v7186_v3  ;;  %v1088_v39 = vrot.slane %v1080_v60, %v7411_v47  ;;  %v11483_v29 = vld [vmem:[#allocation13_spill] sm:$0xff] }
 0x1c9   : > { %v11470_v60 = vcombine.high %v7819_v4, %v7825_v63  ;;  %v11475_v4 = vld [vmem:[#allocation11_spill] sm:$0xff]  ;;  %v11476_v63 = vld [vmem:[#allocation12_spill] sm:$0xff]  ;;  %v8237_v31 = vrot.slane %v632_v37, %v7186_v3  ;;  %v2254_v37 = vcombine.high %v2250_v10, %v11436_v48 }
 0x1ca   : > { %v1310_v59 = vcombine.low %v8187_v24, %v8176_v5 }
 0x1cb   : > { %v8178_v17 = vpop.permute.xlu1 %732  ;;  %v8189_v38 = vpop.permute.xlu0 %700 }
 0x1cc   : > { %1677 = vrot.lane.b32.xlu1 %v1623_v8, %s6843_s8  ;;  %1645 = vrot.lane.b32.xlu0 %v1558_v16, %s6846_s10  ;;  %11458 = vst [vmem:[#allocation48_spill] sm:$0xff] %v8178_v17  ;;  %v11461_v16 = vcombine.high %v11459_v33, %v11460_v42  ;;  %11462 = vst [vmem:[#allocation47_spill] sm:$0xff] %v8189_v38  ;;  %v1318_v19 = vrot.slane %v1310_v59, %v7411_v47  ;;  %v11468_v33 = vld [vmem:[#allocation19_spill] sm:$0xff]  ;;  %v11478_v38 = vld [vmem:[#allocation26_spill] sm:$0xff] }
 0x1cd   : > { %v1862_v8 = vcombine.high %v1858_v50, %v11436_v48 }
 0x1cf   : > { %v8204_v0 = vpop.permute.xlu0 %930 }
 0x1d0   : > { %1912 = vrot.lane.b32.xlu1 %v1858_v50, %s6843_s8  ;;  %1880 = vrot.lane.b32.xlu0 %v1793_v26, %s6846_s10  ;;  %v840_v26 = vrot.slane %v11461_v16, %v7411_v47  ;;  %11466 = vst [vmem:[#allocation38_spill] sm:$0xff] %v8204_v0 }
 0x1d3   : > { %v8220_v59 = vpop.permute.xlu0 %2126 }
 0x1d4   : > { %2344 = vrot.lane.b32.xlu1 %v2250_v10, %s6843_s8  ;;  %2118 = vrot.lane.b32.xlu0 %v2024_v1, %s6847_s11  ;;  %v11463_v1 = vld [vmem:[#allocation46_spill] sm:$0xff] }
 0x1d5   : > { %v926_v57 = vcombine.high %v11463_v1, %v11436_v48  ;;  %v1555_v1 = vrot.slane %v11470_v60, %v7411_v47 }
 0x1d8   : > { %704 = vrot.lane.b32.xlu1 %v610_v45, %s6841_s15  ;;  %2376 = vrot.lane.b32.xlu0 %v2322_v43, %s6847_s11  ;;  %v8198_v43 = vpop.permute.xlu1 %962 }
 0x1d9   : > { %11464 = vst [vmem:[#allocation43_spill] sm:$0xff] %v8198_v43 }
 0x1dc   : > { %934 = vrot.lane.b32.xlu1 %v840_v26, %s6841_s15  ;;  %736 = vrot.lane.b32.xlu0 %v696_v7, %s6845_s9  ;;  %v11467_v7 = vld [vmem:[#allocation22_spill] sm:$0xff]  ;;  %v8211_v16 = vpop.permute.xlu1 %958 }
 0x1dd   : > { %v648_v42 = vcombine.high %v11468_v33, %v11467_v7  ;;  %11469 = vst [vmem:[#allocation39_spill] sm:$0xff] %v8211_v16  ;;  %v11473_v7 = vld [vmem:[#allocation28_spill] sm:$0xff]  ;;  %v11474_v33 = vld [vmem:[#allocation25_spill] sm:$0xff] }
 0x1de   : > { %v878_v0 = vcombine.high %v11474_v33, %v11473_v7  ;;  %v8248_v33 = vpop.permute.xlu0 %2098  ;;  %v11486_v16 = vld [vmem:[#allocation29_spill] sm:$0xff] }
 0x1e0   : > { %1181 = vrot.lane.b32.xlu1 %v1088_v39, %s6842_s16  ;;  %966 = vrot.lane.b32.xlu0 %v926_v57, %s6845_s9  ;;  %v1396_v57 = vcombine.high %v1386_v14, %v11436_v48  ;;  %v8229_v43 = vpop.permute.xlu1 %2356  ;;  %v11477_v14 = vcombine.high %v11475_v4, %v11476_v63  ;;  %v8246_v7 = vrot.slane %v878_v0, %v7186_v3 }
 0x1e2   : > { %v1790_v60 = vrot.slane %v11477_v14, %v7411_v47 }
 0x1e4   : > { %1411 = vrot.lane.b32.xlu1 %v1318_v19, %s6842_s16  ;;  %1213 = vrot.lane.b32.xlu0 %v1166_v46, %s6846_s10  ;;  %v8225_v46 = vrot.slane %v648_v42, %v7186_v3 }
 0x1e6   : > { %v679_v42 = vcombine.low %v8237_v31, %v8225_v46  ;;  %v8250_v4 = vpop.permute.xlu1 %1661 }
 0x1e8   : > { %1649 = vrot.lane.b32.xlu1 %v1555_v1, %s6843_s8  ;;  %1443 = vrot.lane.b32.xlu0 %v1396_v57, %s6846_s10  ;;  %v11479_v57 = vld [vmem:[#allocation23_spill] sm:$0xff]  ;;  %v687_v14 = vrot.slane %v679_v42, %v7411_v47 }
 0x1e9   : > { %v862_v17 = vcombine.high %v11479_v57, %v11478_v38  ;;  %v11481_v42 = vld [vmem:[#allocation31_spill] sm:$0xff] }
 0x1ea   : > { %v8265_v57 = vpop.permute.xlu1 %2134 }
 0x1eb   : > { %v8255_v38 = vrot.slane %v862_v17, %v7186_v3  ;;  %v858_v17 = vcombine.high %v840_v26, %v11436_v48  ;;  %v11485_v26 = vld [vmem:[#allocation32_spill] sm:$0xff] }
 0x1ec   : > { %1884 = vrot.lane.b32.xlu1 %v1790_v60, %s6843_s8  ;;  %1681 = vrot.lane.b32.xlu0 %v1627_v52, %s6847_s11  ;;  %v628_v52 = vcombine.high %v610_v45, %v11436_v48  ;;  %v1379_v45 = vcombine.high %v8095_v22, %v8086_v25  ;;  %v564_v51 = vcombine.high %v11486_v16, %v11485_v26  ;;  %v11487_v22 = vld [vmem:[#allocation37_spill] sm:$0xff]  ;;  %v11489_v16 = vld [vmem:[#allocation36_spill] sm:$0xff] }
 0x1ed   : > { %v909_v63 = vcombine.low %v8255_v38, %v8246_v7 }
 0x1ee   : > { %v8261_v0 = vpop.permute.xlu0 %2328  ;;  %v8279_v35 = vpop.permute.xlu1 %2364 }
 0x1ef   : > { %v917_v10 = vrot.slane %v909_v63, %v7411_v47  ;;  %v1098_v63 = vcombine.high %v1088_v39, %v11436_v48  ;;  %v8302_v39 = vrot.slane %v564_v51, %v7186_v3  ;;  %v1794_v51 = vcombine.high %v1790_v60, %v11436_v48 }
 0x1f0   : > { %2348 = vrot.lane.b32.xlu1 %v2254_v37, %s6847_s11  ;;  %1916 = vrot.lane.b32.xlu0 %v1862_v8, %s6847_s11  ;;  %v11480_v37 = vld [vmem:[#allocation33_spill] sm:$0xff] }
 0x1f1   : > { %v580_v8 = vcombine.high %v11481_v42, %v11480_v37 }
 0x1f3   : > { %v8293_v25 = vrot.slane %v580_v8, %v7186_v3 }
 0x1f4   : > { %740 = vrot.lane.b32.xlu1 %v687_v14, %s6842_s16  ;;  %708 = vrot.lane.b32.xlu0 %v628_v52, %s6845_s9  ;;  %v11482_v52 = vld [vmem:[#allocation14_spill] sm:$0xff] }
 0x1f5   : > { %v11484_v62 = vcombine.high %v11482_v52, %v11483_v29  ;;  %v1328_v29 = vcombine.high %v1318_v19, %v11436_v48  ;;  %v11490_v52 = vld [vmem:[#allocation34_spill] sm:$0xff]  ;;  %v611_v8 = vcombine.low %v8302_v39, %v8293_v25  ;;  %v1559_v19 = vcombine.high %v1555_v1, %v11436_v48 }
 0x1f6   : > { %v8269_v50 = vpop.permute.xlu0 %1633  ;;  %v794_v26 = vcombine.high %v11490_v52, %v11489_v16  ;;  %v697_v52 = vcombine.high %v687_v14, %v11436_v48  ;;  %v1311_v14 = vcombine.high %v8187_v24, %v8176_v5 }
 0x1f7   : > { %v1163_v53 = vrot.slane %v11484_v62, %v7411_v47  ;;  %v1393_v62 = vrot.slane %v1379_v45, %v7411_v47  ;;  %v619_v60 = vrot.slane %v611_v8, %v7411_v47 }
 0x1f8   : > { %970 = vrot.lane.b32.xlu1 %v917_v10, %s6842_s16  ;;  %938 = vrot.lane.b32.xlu0 %v858_v17, %s6845_s9  ;;  %v11488_v17 = vld [vmem:[#allocation35_spill] sm:$0xff]  ;;  %v1325_v24 = vrot.slane %v1311_v14, %v7411_v47 }
 0x1f9   : > { %v810_v37 = vcombine.high %v11488_v17, %v11487_v22  ;;  %v8320_v17 = vrot.slane %v794_v26, %v7186_v3  ;;  %v1167_v54 = vcombine.high %v1163_v53, %v11436_v48  ;;  %v1397_v5 = vcombine.high %v1393_v62, %v11436_v48 }
 0x1fa   : > { %v8288_v49 = vpop.permute.xlu0 %2106 }
 0x1fc   : > { %1217 = vrot.lane.b32.xlu1 %v1163_v53, %s6843_s8  ;;  %1185 = vrot.lane.b32.xlu0 %v1098_v63, %s6846_s10  ;;  %v8311_v63 = vrot.slane %v810_v37, %v7186_v3  ;;  %v1081_v3 = vcombine.high %v8167_v44, %v8154_v40  ;;  %v680_v40 = vcombine.high %v8237_v31, %v8225_v46 }
 0x1fd   : > { %v629_v31 = vcombine.high %v619_v60, %v11436_v48 }
 0x1fe   : > { %v8297_v42 = vpop.permute.xlu1 %1431  ;;  %v8313_v22 = vpop.permute.xlu0 %2336  ;;  %v694_v46 = vrot.slane %v680_v40, %v7411_v47  ;;  %v1329_v40 = vcombine.high %v1325_v24, %v11436_v48 }
 0x200   : > { %1447 = vrot.lane.b32.xlu1 %v1393_v62, %s6843_s8  ;;  %1415 = vrot.lane.b32.xlu0 %v1328_v29, %s6846_s10  ;;  %v841_v29 = vcombine.low %v8320_v17, %v8311_v63 }
 0x202   : > { %v8315_v45 = vpop.permute.xlu1 %1669 }
 0x204   : > { %1888 = vrot.lane.b32.xlu1 %v1794_v51, %s6847_s11  ;;  %1653 = vrot.lane.b32.xlu0 %v1559_v19, %s6847_s11  ;;  %v927_v51 = vcombine.high %v917_v10, %v11436_v48  ;;  %v849_v19 = vrot.slane %v841_v29, %v7411_v47  ;;  %v1095_v10 = vrot.slane %v1081_v3, %v7411_v47 }
 0x205   : > { %v910_v3 = vcombine.high %v8255_v38, %v8246_v7  ;;  %v612_v7 = vcombine.high %v8302_v39, %v8293_v25  ;;  %v698_v25 = vcombine.high %v694_v46, %v11436_v48 }
 0x206   : > { %v8326_v37 = vpop.permute.xlu1 %2142  ;;  %v8328_v16 = vpop.permute.xlu0 %1403 }
 0x207   : > { %11491 = vst [vmem:[#allocation46_spill] sm:$0xff] %v8328_v16  ;;  %v924_v14 = vrot.slane %v910_v3, %v7411_v47  ;;  %v626_v39 = vrot.slane %v612_v7, %v7411_v47 }
 0x208   : > { %744 = vrot.lane.b32.xlu1 %v697_v52, %s6846_s10  ;;  %712 = vrot.lane.b32.xlu0 %v619_v60, %s6842_s16 }
 0x20a   : > { %v8334_v1 = vpop.permute.xlu1 %2372  ;;  %v8336_v26 = vpop.permute.xlu0 %1641 }
 0x20b   : > { %11492 = vst [vmem:[#allocation41_spill] sm:$0xff] %v8336_v26 }
 0x20c   : > { %974 = vrot.lane.b32.xlu1 %v927_v51, %s6846_s10  ;;  %942 = vrot.lane.b32.xlu0 %v849_v19, %s6842_s16 }
 0x20e   : > { %v8346_v8 = vpop.permute.xlu1 %2094  ;;  %v8348_v52 = vpop.permute.xlu0 %2114 }
 0x210   : > { %1221 = vrot.lane.b32.xlu1 %v1167_v54, %s6847_s11  ;;  %1189 = vrot.lane.b32.xlu0 %v1095_v10, %s6843_s8 }
 0x212   : > { %v2353_v44 = vpop.permute.xlu1 %2352  ;;  %v8356_v29 = vpop.permute.xlu0 %2122 }
 0x213   : > { %v2386_v34 = vsel %vm510_vm5, %v7975_v6, %v2353_v44 }
 0x214   : > { %1451 = vrot.lane.b32.xlu1 %v1397_v5, %s6847_s11  ;;  %1419 = vrot.lane.b32.xlu0 %v1325_v24, %s6843_s8  ;;  %v859_v5 = vcombine.high %v849_v19, %v11436_v48  ;;  %v842_v19 = vcombine.high %v8320_v17, %v8311_v63 }
 0x216   : > { %v8364_v54 = vpop.permute.xlu1 %2130  ;;  %v8366_v53 = vpop.permute.xlu0 %1657  ;;  %v856_v63 = vrot.slane %v842_v19, %v7411_v47 }
 0x218   : > { %748 = vrot.lane.b32.xlu1 %v694_v46, %s6843_s8  ;;  %716 = vrot.lane.b32.xlu0 %v629_v31, %s6846_s10  ;;  %v1099_v31 = vcombine.high %v1095_v10, %v11436_v48  ;;  %v6848_v10 = vmov 0   ;;  %v860_v7 = vcombine.high %v856_v63, %v11436_v48 }
 0x219   : > { %6723 = vset.pattern.permute.xlu0 %v6848_v10 }
 0x21a   : > { %v2361_v62 = vpop.permute.xlu1 %2360  ;;  %v8372_v51 = vpop.permute.xlu0 %2324 }
 0x21c   : > { %978 = vrot.lane.b32.xlu1 %v924_v14, %s6843_s8  ;;  %946 = vrot.lane.b32.xlu0 %v859_v5, %s6846_s10 }
 0x21e   : > { %v8380_v38 = vpop.permute.xlu1 %1427  ;;  %v8382_v60 = vpop.permute.xlu0 %1629 }
 0x220   : > { %1423 = vrot.lane.b32.xlu1 %v1329_v40, %s6847_s11  ;;  %1193 = vrot.lane.b32.xlu0 %v1099_v31, %s6847_s11  ;;  %v928_v31 = vcombine.high %v924_v14, %v11436_v48  ;;  %v2427_v14 = vld [vmem:[%s11140_s2] sm:$0xff] }
 0x222   : > { %v8390_v3 = vpop.permute.xlu1 %1665  ;;  %v8392_v5 = vpop.permute.xlu0 %2102 }
 0x224   : > { %752 = vrot.lane.b32.xlu1 %v698_v25, %s6847_s11  ;;  %720 = vrot.lane.b32.xlu0 %v626_v39, %s6843_s8  ;;  %v630_v25 = vcombine.high %v626_v39, %v11436_v48 }
 0x226   : > { %v2139_v24 = vpop.permute.xlu1 %2138  ;;  %v2333_v40 = vpop.permute.xlu0 %2332 }
 0x228   : > { %982 = vrot.lane.b32.xlu1 %v928_v31, %s6847_s11  ;;  %950 = vrot.lane.b32.xlu0 %v856_v63, %s6843_s8 }
 0x22a   : > { %v2369_v17 = vpop.permute.xlu1 %2368  ;;  %v8402_v46 = vpop.permute.xlu0 %1399 }
 0x22c   : > { %954 = vrot.lane.b32.xlu1 %v860_v7, %s6847_s11  ;;  %724 = vrot.lane.b32.xlu0 %v630_v25, %s6847_s11 }
 0x22e   : > { %v8411_v19 = vpop.permute.xlu1 %1435  ;;  %v8413_v10 = vpop.permute.xlu0 %1637 }
 0x230   : > { %2430 = vperm.xlu0 %6723, %v2427_v14   ;;  %v2387_v14 = vsel %vm512_vm6, %v2386_v34, %v8229_v43 }
 0x231   : > { %v2388_v11 = vsel %vm514_vm7, %v2387_v14, %v2361_v62 }
 0x232   : > { %v8415_v31 = vpop.permute.xlu1 %1673  ;;  %v8417_v47 = vpop.permute.xlu0 %2110 }
 0x236   : > { %v2147_v63 = vpop.permute.xlu1 %2146  ;;  %v2341_v32 = vpop.permute.xlu0 %2340 }
 0x23a   : > { %v8419_v48 = vpop.permute.xlu1 %1439  ;;  %v8421_v39 = vpop.permute.xlu0 %1407 }
 0x23b   : > { %11493 = vst [vmem:[#allocation22_spill] sm:$0xff] %v8421_v39  ;;  %v2389_v39 = vsel %vm516_vm8, %v2388_v11, %v8279_v35 }
 0x23c   : > { %v2390_v6 = vsel %vm518_vm9, %v2389_v39, %v2369_v17  ;;  %v2156_v39 = vsel %vm510_vm5, %v7965_v58, %v8356_v29 }
 0x23d   : > { %v2391_v43 = vsel %vm520_vm10, %v2390_v6, %v8334_v1 }
 0x23e   : > { %v8423_v7 = vpop.permute.xlu1 %1677  ;;  %v8425_v25 = vpop.permute.xlu0 %1645 }
 0x23f   : > { %11494 = vst [vmem:[#allocation19_spill] sm:$0xff] %v8425_v25 }
 0x242   : > { %v1913_v16 = vpop.permute.xlu1 %1912  ;;  %v8431_v56 = vpop.permute.xlu0 %1880 }
 0x246   : > { %v2345_v26 = vpop.permute.xlu1 %2344  ;;  %v8436_v25 = vpop.permute.xlu0 %2118 }
 0x24a   : > { %v8439_v44 = vpop.permute.xlu1 %704  ;;  %v2377_v34 = vpop.permute.xlu0 %2376 }
 0x24b   : > { %11495 = vst [vmem:[#allocation20_spill] sm:$0xff] %v8439_v44  ;;  %v2392_v62 = vsel %vm522_vm12, %v2391_v43, %v2377_v34  ;;  %v2157_v44 = vsel %vm512_vm6, %v2156_v39, %v8220_v59  ;;  %v2379_v43 = vsel %vm510_vm5, %v8008_v9, %v8372_v51  ;;  %v11498_v59 = vld [vmem:[#allocation27_spill] sm:$0xff] }
 0x24c   : > { %6650 = vmatprep.subr.msk.mxu0 %vm2417_vm11, %v2392_v62  ;;  %v2158_v34 = vsel %vm514_vm7, %v2157_v44, %v8364_v54  ;;  %v1926_v29 = vsel %vm510_vm5, %v11498_v59, %v8048_v41  ;;  %v2380_v54 = vsel %vm512_vm6, %v2379_v43, %v8261_v0 }
 0x24d   : > { %v2159_v62 = vsel %vm516_vm8, %v2158_v34, %v8265_v57  ;;  %v2381_v44 = vsel %vm514_vm7, %v2380_v54, %v2333_v40  ;;  %v1927_v9 = vsel %vm512_vm6, %v1926_v29, %v8036_v20 }
 0x24e   : > { %v8445_v14 = vpop.permute.xlu1 %934  ;;  %v8447_v11 = vpop.permute.xlu0 %736  ;;  %v2160_v39 = vsel %vm518_vm9, %v2159_v62, %v2139_v24  ;;  %v2382_v0 = vsel %vm516_vm8, %v2381_v44, %v8313_v22 }
 0x24f   : > { %11496 = vst [vmem:[#allocation18_spill] sm:$0xff] %v8445_v14  ;;  %v2161_v57 = vsel %vm520_vm10, %v2160_v39, %v8326_v37  ;;  %v2383_v20 = vsel %vm518_vm9, %v2382_v0, %v2341_v32  ;;  %v2149_v32 = vsel %vm510_vm5, %v7954_v36, %v8346_v8  ;;  %v11499_v8 = vld [vmem:[#allocation21_spill] sm:$0xff] }
 0x250   : > { %v2162_v41 = vsel %vm522_vm12, %v2161_v57, %v2147_v63  ;;  %v2384_v62 = vsel %vm520_vm10, %v2383_v20, %v2345_v26 }
 0x251   : > { %v2414_v43 = vrot.slane %v2162_v41, 4 }
 0x252   : > { %v8449_v35 = vpop.permute.xlu1 %1181  ;;  %v8451_v17 = vpop.permute.xlu0 %966 }
 0x253   : > { %11497 = vst [vmem:[#allocation28_spill] sm:$0xff] %v8449_v35  ;;  %v1928_v35 = vsel %vm514_vm7, %v1927_v9, %v8063_v2 }
 0x254   : > { %v1929_v24 = vsel %vm516_vm8, %v1928_v35, %v8101_v23 }
 0x255   : > { %v1930_v40 = vsel %vm518_vm9, %v1929_v24, %v8129_v13 }
 0x256   : > { %v8458_v1 = vpop.permute.xlu1 %1411  ;;  %v8460_v6 = vpop.permute.xlu0 %1213  ;;  %v1931_v37 = vsel %vm520_vm10, %v1930_v40, %v1913_v16  ;;  %v2150_v16 = vsel %vm512_vm6, %v2149_v32, %v8248_v33  ;;  %v1919_v33 = vsel %vm510_vm5, %v11499_v8, %v8028_v27  ;;  %v11501_v8 = vld [vmem:[#allocation41_spill] sm:$0xff] }
 0x257   : > { %v2151_v39 = vsel %vm514_vm7, %v2150_v16, %v8392_v5  ;;  %v1920_v57 = vsel %vm512_vm6, %v1919_v33, %v8056_v12  ;;  %v11502_v33 = vld [vmem:[#allocation51_spill] sm:$0xff] }
 0x258   : > { %v2152_v54 = vsel %vm516_vm8, %v2151_v39, %v8288_v49  ;;  %v1921_v49 = vsel %vm514_vm7, %v1920_v57, %v8088_v55  ;;  %v1691_v55 = vsel %vm510_vm5, %v7991_v18, %v8366_v53 }
 0x259   : > { %v2153_v36 = vsel %vm518_vm9, %v2152_v54, %v8417_v47  ;;  %v1922_v47 = vsel %vm516_vm8, %v1921_v49, %v8120_v21  ;;  %v11505_v49 = vld [vmem:[#allocation17_spill] sm:$0xff] }
 0x25a   : > { %v8469_v14 = vpop.permute.xlu1 %1649  ;;  %v8471_v58 = vpop.permute.xlu0 %1443  ;;  %v2154_v5 = vsel %vm520_vm10, %v2153_v36, %v8348_v52  ;;  %v1923_v27 = vsel %vm518_vm9, %v1922_v47, %v8431_v56  ;;  %v1692_v56 = vsel %vm512_vm6, %v1691_v55, %v8250_v4  ;;  %v1454_v36 = vsel %vm510_vm5, %v8059_v15, %v8402_v46 }
 0x25b   : > { %v2155_v0 = vsel %vm522_vm12, %v2154_v5, %v8436_v25  ;;  %v11503_v5 = vld [vmem:[#allocation19_spill] sm:$0xff] }
 0x25c   : > { %v2413_v40 = vrot.slane %v2155_v0, 4  ;;  %v11506_v0 = vld [vmem:[#allocation56_spill] sm:$0xff] }
 0x25e   : > { %v1885_v51 = vpop.permute.xlu1 %1884  ;;  %v1682_v34 = vpop.permute.xlu0 %1681 }
 0x25f   : > { %v1924_v12 = vsel %vm520_vm10, %v1923_v27, %v1885_v51  ;;  %v1693_v51 = vsel %vm514_vm7, %v1692_v56, %v8390_v3  ;;  %v11507_v27 = vld [vmem:[#allocation46_spill] sm:$0xff]  ;;  %v11509_v56 = vld [vmem:[#allocation49_spill] sm:$0xff] }
 0x260   : > { %v1694_v18 = vsel %vm516_vm8, %v1693_v51, %v8315_v45 }
 0x261   : > { %v1695_v53 = vsel %vm518_vm9, %v1694_v18, %v8415_v31 }
 0x262   : > { %v2349_v59 = vpop.permute.xlu1 %2348  ;;  %v1917_v2 = vpop.permute.xlu0 %1916  ;;  %v1696_v3 = vsel %vm520_vm10, %v1695_v53, %v8423_v7  ;;  %v11511_v53 = vld [vmem:[#allocation62_spill] sm:$0xff] }
 0x263   : > { %v1932_v63 = vsel %vm522_vm12, %v1931_v37, %v1917_v2  ;;  %v2385_v29 = vsel %vm522_vm12, %v2384_v62, %v2349_v59  ;;  %v1461_v2 = vsel %vm510_vm5, %v8021_v28, %v8380_v38  ;;  %v1697_v28 = vsel %vm522_vm12, %v1696_v3, %v1682_v34 }
 0x264   : > { %6651 = vmatpush1.msk.msra.mxu0 %vm2417_vm11, %v2385_v29  ;;  %v2425_v23 = vsel %vm2417_vm11, %v1932_v63, %v2414_v43  ;;  %v1462_v4 = vsel %vm512_vm6, %v1461_v2, %v8297_v42  ;;  %v1684_v38 = vsel %vm510_vm5, %v8024_v30, %v8382_v60  ;;  %v2408_v31 = vrot.slane %v1697_v28, 4  ;;  %v11500_v30 = vld [vmem:[#allocation16_spill] sm:$0xff]  ;;  %v11510_v2 = vld [vmem:[#allocation53_spill] sm:$0xff] }
 0x265   : > { %2467 = vmatprep.subr.mxu0 %v2425_v23  ;;  %v1463_v23 = vsel %vm514_vm7, %v1462_v4, %v8411_v19  ;;  %v1685_v19 = vsel %vm512_vm6, %v1684_v38, %v8269_v50  ;;  %v511_v60 = vsel %vm510_vm5, %v11500_v30, %v7958_v61  ;;  %v11512_v4 = vld [vmem:[#allocation24_spill] sm:$0xff] }
 0x266   : > { %v8500_v22 = vpop.permute.xlu1 %740  ;;  %v8502_v13 = vpop.permute.xlu0 %708  ;;  %v1464_v45 = vsel %vm516_vm8, %v1463_v23, %v8419_v48  ;;  %v1686_v48 = vsel %vm514_vm7, %v1685_v19, %v8413_v10  ;;  %v513_v57 = vsel %vm512_vm6, %v511_v60, %v11502_v33  ;;  %v11513_v23 = vld [vmem:[#allocation57_spill] sm:$0xff]  ;;  %v11517_v19 = vld [vmem:[#allocation66_spill] sm:$0xff] }
 0x267   : > { %v1465_v42 = vsel %vm518_vm9, %v1464_v45, %v8471_v58  ;;  %v1687_v50 = vsel %vm516_vm8, %v1686_v48, %v11501_v8  ;;  %v515_v47 = vsel %vm514_vm7, %v513_v57, %v11506_v0  ;;  %v11514_v45 = vld [vmem:[#allocation64_spill] sm:$0xff]  ;;  %v11518_v48 = vld [vmem:[#allocation39_spill] sm:$0xff]  ;;  %v11522_v33 = vld [vmem:[#allocation69_spill] sm:$0xff] }
 0x268   : > { %v1688_v10 = vsel %vm518_vm9, %v1687_v50, %v11503_v5  ;;  %v517_v18 = vsel %vm516_vm8, %v515_v47, %v11510_v2  ;;  %v11521_v50 = vld [vmem:[#allocation68_spill] sm:$0xff] }
 0x269   : > { %v1689_v15 = vsel %vm520_vm10, %v1688_v10, %v8469_v14  ;;  %v1231_v14 = vsel %vm510_vm5, %v11512_v4, %v11511_v53  ;;  %v11523_v57 = vld [vmem:[#allocation40_spill] sm:$0xff]  ;;  %v11530_v4 = vld [vmem:[#allocation38_spill] sm:$0xff] }
 0x26a   : > { %v8509_v26 = vpop.permute.xlu1 %970  ;;  %v8511_v35 = vpop.permute.xlu0 %938  ;;  %v762_v5 = vsel %vm510_vm5, %v11523_v57, %v11522_v33  ;;  %v11526_v47 = vld [vmem:[#allocation48_spill] sm:$0xff] }
 0x26e   : > { %v8517_v44 = vpop.permute.xlu1 %1217  ;;  %v8519_v9 = vpop.permute.xlu0 %1185 }
 0x272   : > { %v1448_v41 = vpop.permute.xlu1 %1447  ;;  %v1416_v24 = vpop.permute.xlu0 %1415 }
 0x273   : > { %v1466_v7 = vsel %vm520_vm10, %v1465_v42, %v1448_v41  ;;  %v11504_v41 = vld [vmem:[#allocation55_spill] sm:$0xff] }
 0x274   : > { %v524_v61 = vsel %vm510_vm5, %v11505_v49, %v11504_v41  ;;  %v11524_v41 = vld [vmem:[#allocation50_spill] sm:$0xff] }
 0x275   : > { %v525_v51 = vsel %vm512_vm6, %v524_v61, %v11509_v56  ;;  %v11525_v61 = vld [vmem:[#allocation67_spill] sm:$0xff] }
 0x276   : > { %v1889_v20 = vpop.permute.xlu1 %1888  ;;  %v1654_v43 = vpop.permute.xlu0 %1653  ;;  %v526_v28 = vsel %vm514_vm7, %v525_v51, %v11513_v23 }
 0x277   : > { %v1925_v52 = vsel %vm522_vm12, %v1924_v12, %v1889_v20  ;;  %v11508_v20 = vld [vmem:[#allocation22_spill] sm:$0xff]  ;;  %v527_v49 = vsel %vm516_vm8, %v526_v28, %v11524_v41  ;;  %v11532_v28 = vld [vmem:[#allocation20_spill] sm:$0xff] }
 0x278   : > { %v2424_v37 = vsel %vm2417_vm11, %v1925_v52, %v2413_v40  ;;  %v1455_v40 = vsel %vm512_vm6, %v1454_v36, %v11507_v27  ;;  %v11520_v36 = vld [vmem:[#allocation65_spill] sm:$0xff]  ;;  %v763_v27 = vsel %vm512_vm6, %v762_v5, %v11526_v47  ;;  %v11538_v41 = vld [vmem:[#allocation54_spill] sm:$0xff]  ;;  %v11540_v47 = vld [vmem:[#allocation60_spill] sm:$0xff] }
 0x279   : > { %2468 = vmatpush1.msra.mxu0 %v2424_v37  ;;  %v1456_v52 = vsel %vm514_vm7, %v1455_v40, %v11508_v20  ;;  %v1690_v37 = vsel %vm522_vm12, %v1689_v15, %v1654_v43  ;;  %v1232_v43 = vsel %vm512_vm6, %v1231_v14, %v11514_v45  ;;  %v11527_v15 = vld [vmem:[#allocation47_spill] sm:$0xff]  ;;  %v11528_v20 = vld [vmem:[#allocation42_spill] sm:$0xff]  ;;  %v11531_v14 = vld [vmem:[#allocation44_spill] sm:$0xff] }
 0x27a   : > { %v8544_v25 = vpop.permute.xlu1 %744  ;;  %v8546_v21 = vpop.permute.xlu0 %712  ;;  %v1457_v55 = vsel %vm516_vm8, %v1456_v52, %v8458_v1  ;;  %v2407_v38 = vrot.slane %v1690_v37, 4  ;;  %v755_v52 = vsel %vm510_vm5, %v11528_v20, %v11527_v15  ;;  %v764_v37 = vsel %vm514_vm7, %v763_v27, %v8447_v11  ;;  %v2426_v15 = vld [vmem:[%s11139_s1] sm:$0xff] }
 0x27b   : > { %v1458_v3 = vsel %vm518_vm9, %v1457_v55, %v1416_v24  ;;  %v11519_v24 = vld [vmem:[#allocation45_spill] sm:$0xff]  ;;  %v11529_v55 = vld [vmem:[#allocation43_spill] sm:$0xff]  ;;  %v765_v23 = vsel %vm516_vm8, %v764_v37, %v8500_v22  ;;  %v756_v45 = vsel %vm512_vm6, %v755_v52, %v11532_v28 }
 0x27c   : > { %v992_v30 = vsel %vm510_vm5, %v11519_v24, %v11518_v48  ;;  %v757_v48 = vsel %vm514_vm7, %v756_v45, %v8502_v13  ;;  %v11535_v24 = vld [vmem:[#allocation59_spill] sm:$0xff] }
 0x27d   : > { %v993_v56 = vsel %vm512_vm6, %v992_v30, %v11529_v55  ;;  %v528_v30 = vsel %vm518_vm9, %v527_v49, %v11535_v24 }
 0x27e   : > { %v8552_v62 = vpop.permute.xlu1 %974  ;;  %v8554_v59 = vpop.permute.xlu0 %942 }
 0x282   : > { %v8567_v63 = vpop.permute.xlu1 %1221  ;;  %v8569_v29 = vpop.permute.xlu0 %1189 }
 0x286   : > { %v1452_v32 = vpop.permute.xlu1 %1451  ;;  %v1420_v16 = vpop.permute.xlu0 %1419 }
 0x287   : > { %v1467_v39 = vsel %vm522_vm12, %v1466_v7, %v1452_v32  ;;  %v1459_v1 = vsel %vm520_vm10, %v1458_v3, %v1420_v16  ;;  %v11515_v7 = vld [vmem:[#allocation63_spill] sm:$0xff]  ;;  %v11516_v32 = vld [vmem:[#allocation30_spill] sm:$0xff]  ;;  %v994_v3 = vsel %vm514_vm7, %v993_v56, %v8451_v17 }
 0x288   : > { %v2423_v34 = vsel %vm2417_vm11, %v1467_v39, %v2408_v31  ;;  %v1224_v39 = vsel %vm510_vm5, %v11516_v32, %v11515_v7 }
 0x289   : > { %2469 = vmatprep.subr.mxu0 %v2423_v34  ;;  %v1233_v34 = vsel %vm514_vm7, %v1232_v43, %v11517_v19  ;;  %v1225_v8 = vsel %vm512_vm6, %v1224_v39, %v11520_v36  ;;  %v11533_v43 = vld [vmem:[#allocation28_spill] sm:$0xff]  ;;  %v11536_v36 = vld [vmem:[#allocation58_spill] sm:$0xff] }
 0x28a   : > { %v749_v58 = vpop.permute.xlu1 %748  ;;  %v8591_v54 = vpop.permute.xlu0 %716  ;;  %v1234_v16 = vsel %vm516_vm8, %v1233_v34, %v11521_v50  ;;  %v1226_v0 = vsel %vm514_vm7, %v1225_v8, %v11525_v61  ;;  %v519_v13 = vsel %vm518_vm9, %v517_v18, %v11536_v36 }
 0x28b   : > { %v1235_v40 = vsel %vm518_vm9, %v1234_v16, %v8460_v6  ;;  %v985_v6 = vsel %vm510_vm5, %v11531_v14, %v11530_v4 }
 0x28c   : > { %v1236_v51 = vsel %vm520_vm10, %v1235_v40, %v8517_v44  ;;  %v1227_v44 = vsel %vm516_vm8, %v1226_v0, %v11533_v43 }
 0x28d   : > { %v1237_v11 = vsel %vm522_vm12, %v1236_v51, %v8567_v63  ;;  %v1228_v22 = vsel %vm518_vm9, %v1227_v44, %v8519_v9 }
 0x28e   : > { %v979_v46 = vpop.permute.xlu1 %978  ;;  %v947_v12 = vpop.permute.xlu0 %946  ;;  %v2402_v32 = vrot.slane %v1237_v11, 4  ;;  %v1229_v39 = vsel %vm520_vm10, %v1228_v22, %v8569_v29  ;;  %v758_v29 = vsel %vm516_vm8, %v757_v48, %v8546_v21  ;;  %v11542_v48 = vld [vmem:[#allocation15_spill] sm:$0xff] }
 0x292   : > { %v1424_v42 = vpop.permute.xlu1 %1423  ;;  %v1194_v31 = vpop.permute.xlu0 %1193 }
 0x293   : > { %v1460_v60 = vsel %vm522_vm12, %v1459_v1, %v1424_v42  ;;  %v766_v1 = vsel %vm518_vm9, %v765_v23, %v8544_v25  ;;  %v11534_v42 = vld [vmem:[#allocation18_spill] sm:$0xff] }
 0x294   : > { %v2422_v10 = vsel %vm2417_vm11, %v1460_v60, %v2407_v38  ;;  %v995_v38 = vsel %vm516_vm8, %v994_v3, %v8509_v26  ;;  %v986_v17 = vsel %vm512_vm6, %v985_v6, %v11534_v42  ;;  %v767_v7 = vsel %vm520_vm10, %v766_v1, %v749_v58  ;;  %v11541_v1 = vld [vmem:[#allocation10_spill] sm:$0xff] }
 0x295   : > { %2470 = vmatpush1.msra.mxu0 %v2422_v10  ;;  %v996_v63 = vsel %vm518_vm9, %v995_v38, %v8552_v62  ;;  %v987_v9 = vsel %vm514_vm7, %v986_v17, %v8511_v35  ;;  %v1230_v62 = vsel %vm522_vm12, %v1229_v39, %v1194_v31  ;;  %v759_v35 = vsel %vm518_vm9, %v758_v29, %v8591_v54 }
 0x296   : > { %v753_v2 = vpop.permute.xlu1 %752  ;;  %v721_v53 = vpop.permute.xlu0 %720  ;;  %v997_v26 = vsel %vm520_vm10, %v996_v63, %v979_v46  ;;  %v988_v46 = vsel %vm516_vm8, %v987_v9, %v8554_v59  ;;  %v2401_v50 = vrot.slane %v1230_v62, 4  ;;  %v11537_v59 = vld [vmem:[#allocation52_spill] sm:$0xff]  ;;  %v521_v54 = vsel %vm520_vm10, %v519_v13, %v11538_v41 }
 0x297   : > { %v768_v19 = vsel %vm522_vm12, %v767_v7, %v753_v2  ;;  %v989_v31 = vsel %vm518_vm9, %v988_v46, %v947_v12  ;;  %v760_v16 = vsel %vm520_vm10, %v759_v35, %v721_v53  ;;  %v529_v5 = vsel %vm520_vm10, %v528_v30, %v11537_v59  ;;  %v11539_v12 = vld [vmem:[#allocation61_spill] sm:$0xff] }
 0x298   : > { %v2396_v8 = vrot.slane %v768_v19, 4  ;;  %v530_v49 = vsel %vm522_vm12, %v529_v5, %v11539_v12  ;;  %v523_v27 = vsel %vm522_vm12, %v521_v54, %v11540_v47 }
 0x29a   : > { %v983_v25 = vpop.permute.xlu1 %982  ;;  %v951_v34 = vpop.permute.xlu0 %950  ;;  %v2419_v40 = vsel %vm2417_vm11, %v530_v49, %v2396_v8 }
 0x29b   : > { %v998_v58 = vsel %vm522_vm12, %v997_v26, %v983_v25  ;;  %v990_v21 = vsel %vm520_vm10, %v989_v31, %v951_v34 }
 0x29c   : > { %v2421_v60 = vsel %vm2417_vm11, %v998_v58, %v2402_v32 }
 0x29d   : > { %2471 = vmatprep.subr.mxu0 %v2421_v60 }
 0x29e   : > { %v955_v33 = vpop.permute.xlu1 %954  ;;  %v725_v57 = vpop.permute.xlu0 %724 }
 0x29f   : > { %v991_v10 = vsel %vm522_vm12, %v990_v21, %v955_v33  ;;  %v761_v18 = vsel %vm522_vm12, %v760_v16, %v725_v57 }
 0x2a0   : > { %v2395_v61 = vrot.slane %v761_v18, 4  ;;  %v2420_v0 = vsel %vm2417_vm11, %v991_v10, %v2401_v50 }
 0x2a1   : > { %2472 = vmatpush1.msra.mxu0 %v2420_v0 }
 0x2a2   : > { %2473 = vmatprep.subr.mxu0 %v2419_v40  ;;  %v2418_v20 = vsel %vm2417_vm11, %v523_v27, %v2395_v61 }
 0x2a3   : > { %2474 = vmatpush1.msra.mxu0 %v2418_v20 }
 0x2a4   : > { %6652 = vmatmul.mubr.msk.f32.vlgmr.msra.gmra.mxu0 %vm2433_vm13, %v2426_v15 }
 0x2ab   : > { %v2431_v52 = vpop.permute.xlu0 %2430 }
 0x364   : > { %v2509_v37 = vpop.f32.mrf.mxu0 }
 0x365   : > { %v2510_v55 = vadd.f32 %v2509_v37, %v2431_v52 }
 0x366   : > { %v2511_v2 = vpop.f32.mrf.mxu0 }
 0x367   : > { %vm2514_vm14 = vcmp.ge.f32.partialorder %v2510_v55, 0.0  ;;  %v2516_v56 = vmul.f32 0.2, %v2510_v55  ;;  %v2512_v53 = vadd.f32 %v2511_v2, %v2431_v52 }
 0x369   : > { %v2518_v51 = vsel %vm2514_vm14, %v2510_v55, %v2516_v56  ;;  %v2517_v4 = vmul.f32 0.2, %v2512_v53  ;;  %vm2515_vm15 = vcmp.ge.f32.partialorder %v2512_v53, 0.0 }
 0x36a   : > { %2551 = vrot.lane.b32.xlu0 %v2518_v51, %s6846_s10  ;;  %2545 = vrot.lane.b32.xlu1 %v2518_v51, %s6847_s11 }
 0x36b   : > { %v8733_v14 = vsel %vm2515_vm15, %v2512_v53, %v2517_v4 }
 0x36e   : > { %2557 = vrot.lane.b32.xlu0 %v2518_v51, %s6845_s9  ;;  %2548 = vrot.lane.b32.xlu1 %v2518_v51, %s6843_s8 }
 0x372   : > { %2563 = vrot.lane.b32.xlu0 %v2518_v51, %s6844_s7  ;;  %2554 = vrot.lane.b32.xlu1 %v2518_v51, %s6842_s16 }
 0x376   : > { %2570 = vrot.lane.b32.xlu0 %v8733_v14, %s6843_s8  ;;  %2560 = vrot.lane.b32.xlu1 %v2518_v51, %s6841_s15 }
 0x37a   : > { %2576 = vrot.lane.b32.xlu0 %v8733_v14, %s6842_s16  ;;  %2567 = vrot.lane.b32.xlu1 %v8733_v14, %s6847_s11 }
 0x37e   : > { %2582 = vrot.lane.b32.xlu0 %v8733_v14, %s6841_s15  ;;  %2573 = vrot.lane.b32.xlu1 %v8733_v14, %s6846_s10 }
 0x382   : > { %2579 = vrot.lane.b32.xlu1 %v8733_v14, %s6845_s9 }
 0x386   : > { %2585 = vrot.lane.b32.xlu1 %v8733_v14, %s6844_s7 }
 0x3dc   : > { %v2552_v6 = vpop.permute.xlu0 %2551  ;;  %v2546_v3 = vpop.permute.xlu1 %2545 }
 0x3dd   : > { %v2604_v44 = vcombine.low %v2546_v3, %v2552_v6  ;;  %v2605_v50 = vcombine.high %v2546_v3, %v2552_v6 }
 0x3df   : > { %v2612_v7 = vrot.slane %v2604_v44, %v11541_v1  ;;  %v2619_v49 = vrot.slane %v2605_v50, %v11541_v1 }
 0x3e0   : > { %v2558_v23 = vpop.permute.xlu0 %2557  ;;  %v2549_v11 = vpop.permute.xlu1 %2548 }
 0x3e1   : > { %v2588_v28 = vcombine.low %v2518_v51, %v2549_v11  ;;  %v2589_v60 = vcombine.high %v2518_v51, %v2549_v11 }
 0x3e3   : > { %v2596_v42 = vrot.slane %v2588_v28, %v11541_v1  ;;  %v2603_v5 = vrot.slane %v2589_v60, %v11541_v1 }
 0x3e4   : > { %v2564_v45 = vpop.permute.xlu0 %2563  ;;  %v2555_v43 = vpop.permute.xlu1 %2554 }
 0x3e5   : > { %v2636_v38 = vcombine.low %v2558_v23, %v2564_v45  ;;  %v2652_v26 = vcombine.low %v2596_v42, %v2612_v7  ;;  %v2653_v36 = vcombine.high %v2596_v42, %v2612_v7  ;;  %v2637_v13 = vcombine.high %v2558_v23, %v2564_v45 }
 0x3e6   : > { %v2668_v15 = vcombine.low %v2603_v5, %v2619_v49  ;;  %v2669_v45 = vcombine.high %v2603_v5, %v2619_v49 }
 0x3e7   : > { %v2644_v32 = vrot.slane %v2636_v38, %v11541_v1  ;;  %v2660_v58 = vrot.slane %v2652_v26, %v11542_v48  ;;  %v2651_v10 = vrot.slane %v2637_v13, %v11541_v1  ;;  %v2667_v41 = vrot.slane %v2653_v36, %v11542_v48 }
 0x3e8   : > { %v8751_v17 = vpop.permute.xlu0 %2570  ;;  %v2561_v22 = vpop.permute.xlu1 %2560  ;;  %v2676_v51 = vrot.slane %v2668_v15, %v11542_v48 }
 0x3e9   : > { %v2620_v63 = vcombine.low %v2555_v43, %v2561_v22  ;;  %v2621_v24 = vcombine.high %v2555_v43, %v2561_v22  ;;  %v2724_v8 = vcombine.low %v8733_v14, %v8751_v17  ;;  %v2725_v43 = vcombine.high %v8733_v14, %v8751_v17 }
 0x3ea   : > { %v2683_v14 = vrot.slane %v2669_v45, %v11542_v48 }
 0x3eb   : > { %v2628_v39 = vrot.slane %v2620_v63, %v11541_v1  ;;  %v2635_v16 = vrot.slane %v2621_v24, %v11541_v1  ;;  %v2732_v54 = vrot.slane %v2724_v8, %v11541_v1  ;;  %v2739_v17 = vrot.slane %v2725_v43, %v11541_v1 }
 0x3ec   : > { %v8756_v19 = vpop.permute.xlu1 %2567  ;;  %v2577_v34 = vpop.permute.xlu0 %2576 }
 0x3ed   : > { %v2684_v25 = vcombine.low %v2628_v39, %v2644_v32  ;;  %v2685_v30 = vcombine.high %v2628_v39, %v2644_v32  ;;  %v2700_v61 = vcombine.low %v2635_v16, %v2651_v10  ;;  %v2701_v6 = vcombine.high %v2635_v16, %v2651_v10 }
 0x3ef   : > { %v2692_v9 = vrot.slane %v2684_v25, %v11542_v48  ;;  %v2699_v33 = vrot.slane %v2685_v30, %v11542_v48  ;;  %v2708_v37 = vrot.slane %v2700_v61, %v11542_v48  ;;  %v2715_v63 = vrot.slane %v2701_v6, %v11542_v48 }
 0x3f0   : > { %v2574_v62 = vpop.permute.xlu1 %2573  ;;  %v2583_v35 = vpop.permute.xlu0 %2582 }
 0x3f1   : > { %v2716_v29 = vcombine.low %v2660_v58, %v2692_v9  ;;  %v2740_v46 = vcombine.low %v8756_v19, %v2574_v62  ;;  %v2717_v21 = vcombine.high %v2660_v58, %v2692_v9  ;;  %v2756_v57 = vcombine.low %v2577_v34, %v2583_v35 }
 0x3f2   : > { %v2718_v0 = vcombine.low %v2667_v41, %v2699_v33  ;;  %v2719_v52 = vcombine.high %v2667_v41, %v2699_v33  ;;  %v2720_v3 = vcombine.low %v2676_v51, %v2708_v37  ;;  %v2757_v23 = vcombine.high %v2577_v34, %v2583_v35 }
 0x3f3   : > { %2876 = vrot.lane.b32.xlu0 %v2716_v29, %s6836_s29  ;;  %v2748_v59 = vrot.slane %v2740_v46, %v11541_v1  ;;  %v2764_v47 = vrot.slane %v2756_v57, %v11541_v1  ;;  %v2741_v11 = vcombine.high %v8756_v19, %v2574_v62  ;;  %v2721_v22 = vcombine.high %v2676_v51, %v2708_v37 }
 0x3f4   : > { %v2580_v31 = vpop.permute.xlu1 %2579  ;;  %v2771_v7 = vrot.slane %v2757_v23, %v11541_v1  ;;  %v2722_v25 = vcombine.low %v2683_v14, %v2715_v63  ;;  %v2723_v58 = vcombine.high %v2683_v14, %v2715_v63 }
 0x3f5   : > { %v2788_v27 = vcombine.low %v2732_v54, %v2748_v59  ;;  %v2789_v28 = vcombine.high %v2732_v54, %v2748_v59  ;;  %v2755_v32 = vrot.slane %v2741_v11, %v11541_v1 }
 0x3f7   : > { %2880 = vrot.lane.b32.xlu0 %v2717_v21, %s6836_s29  ;;  %v2796_v55 = vrot.slane %v2788_v27, %v11542_v48  ;;  %v2803_v39 = vrot.slane %v2789_v28, %v11542_v48  ;;  %v2804_v34 = vcombine.low %v2739_v17, %v2755_v32  ;;  %v2805_v46 = vcombine.high %v2739_v17, %v2755_v32 }
 0x3f8   : > { %v2586_v18 = vpop.permute.xlu1 %2585 }
 0x3f9   : > { %v2772_v12 = vcombine.low %v2580_v31, %v2586_v18  ;;  %v2773_v2 = vcombine.high %v2580_v31, %v2586_v18  ;;  %v2812_v24 = vrot.slane %v2804_v34, %v11542_v48  ;;  %v2819_v13 = vrot.slane %v2805_v46, %v11542_v48 }
 0x3fb   : > { %v2780_v40 = vrot.slane %v2772_v12, %v11541_v1  ;;  %2884 = vrot.lane.b32.xlu0 %v2718_v0, %s6836_s29  ;;  %v2787_v44 = vrot.slane %v2773_v2, %v11541_v1 }
 0x3fd   : > { %v2820_v20 = vcombine.low %v2764_v47, %v2780_v40  ;;  %v2821_v53 = vcombine.high %v2764_v47, %v2780_v40  ;;  %v2836_v26 = vcombine.low %v2771_v7, %v2787_v44  ;;  %v2837_v30 = vcombine.high %v2771_v7, %v2787_v44 }
 0x3ff   : > { %v2828_v56 = vrot.slane %v2820_v20, %v11542_v48  ;;  %2888 = vrot.lane.b32.xlu0 %v2719_v52, %s6836_s29  ;;  %v2835_v42 = vrot.slane %v2821_v53, %v11542_v48  ;;  %v2844_v62 = vrot.slane %v2836_v26, %v11542_v48  ;;  %v2851_v36 = vrot.slane %v2837_v30, %v11542_v48 }
 0x401   : > { %v2852_v4 = vcombine.low %v2796_v55, %v2828_v56  ;;  %v2853_v38 = vcombine.high %v2796_v55, %v2828_v56  ;;  %v2854_v19 = vcombine.low %v2803_v39, %v2835_v42  ;;  %v2855_v9 = vcombine.high %v2803_v39, %v2835_v42 }
 0x402   : > { %v2856_v29 = vcombine.low %v2812_v24, %v2844_v62  ;;  %v2857_v60 = vcombine.high %v2812_v24, %v2844_v62  ;;  %v2858_v35 = vcombine.low %v2819_v13, %v2851_v36  ;;  %v2859_v31 = vcombine.high %v2819_v13, %v2851_v36 }
 0x403   : > { %2878 = vrot.lane.b32.xlu1 %v2852_v4, %s6836_s29  ;;  %2892 = vrot.lane.b32.xlu0 %v2720_v3, %s6836_s29 }
 0x407   : > { %2882 = vrot.lane.b32.xlu1 %v2853_v38, %s6836_s29  ;;  %2896 = vrot.lane.b32.xlu0 %v2721_v22, %s6836_s29 }
 0x40b   : > { %2886 = vrot.lane.b32.xlu1 %v2854_v19, %s6836_s29  ;;  %2900 = vrot.lane.b32.xlu0 %v2722_v25, %s6836_s29 }
 0x40f   : > { %2890 = vrot.lane.b32.xlu1 %v2855_v9, %s6836_s29  ;;  %2904 = vrot.lane.b32.xlu0 %v2723_v58, %s6836_s29 }
 0x413   : > { %2894 = vrot.lane.b32.xlu1 %v2856_v29, %s6836_s29 }
 0x417   : > { %2898 = vrot.lane.b32.xlu1 %v2857_v60, %s6836_s29 }
 0x41b   : > { %2902 = vrot.lane.b32.xlu1 %v2858_v35, %s6836_s29 }
 0x41f   : > { %2906 = vrot.lane.b32.xlu1 %v2859_v31, %s6836_s29 }
 0x465   : > { %v2877_v8 = vpop.permute.xlu0 %2876 }
 0x466   : > { %2924 = vst.msk [vmem:[#allocation3 + $0x1] sm:$0xff] %vm297_vm2, %v2877_v8 }
 0x469   : > { %v2881_v50 = vpop.permute.xlu0 %2880 }
 0x46a   : > { %2926 = vst.msk [vmem:[#allocation3 + $0x19] sm:$0xff] %vm297_vm2, %v2881_v50 }
 0x46d   : > { %v2885_v16 = vpop.permute.xlu0 %2884  ;;  %v8810_v21 = vld [vmem:[#allocation3] sm:$0xff] }
 0x46e   : > { %2928 = vst.msk [vmem:[#allocation3 + $0x31] sm:$0xff] %vm297_vm2, %v2885_v16  ;;  %3322 = vrot.lane.b32.xlu0 %v8810_v21, %s6838_s12  ;;  %v4110_v2 = vrot.slane %v8810_v21, 1 }
 0x471   : > { %v2889_v33 = vpop.permute.xlu0 %2888  ;;  %v8815_v57 = vld [vmem:[#allocation3 + $0x18] sm:$0xff] }
 0x472   : > { %2930 = vst.msk [vmem:[#allocation3 + $0x49] sm:$0xff] %vm297_vm2, %v2889_v33  ;;  %3326 = vrot.lane.b32.xlu0 %v8815_v57, %s6838_s12  ;;  %v4115_v7 = vrot.slane %v8815_v57, 1 }
 0x475   : > { %v2879_v59 = vpop.permute.xlu1 %2878  ;;  %v2893_v5 = vpop.permute.xlu0 %2892  ;;  %v8821_v10 = vld [vmem:[#allocation3 + $0x30] sm:$0xff] }
 0x476   : > { %2925 = vst.msk [vmem:[#allocation3 + $0x9] sm:$0xff] %vm297_vm2, %v2879_v59  ;;  %2932 = vst.msk [vmem:[#allocation3 + $0x61] sm:$0xff] %vm297_vm2, %v2893_v5  ;;  %3330 = vrot.lane.b32.xlu0 %v8821_v10, %s6838_s12  ;;  %v2964_v18 = vcombine.low %v8810_v21, %v8821_v10  ;;  %v2965_v41 = vcombine.high %v8810_v21, %v8821_v10  ;;  %v4120_v9 = vrot.slane %v8821_v10, 1 }
 0x478   : > { %v8847_v15 = vrot.slane %v2964_v18, %v11541_v1  ;;  %v8869_v6 = vrot.slane %v2965_v41, %v11541_v1 }
 0x479   : > { %v2883_v54 = vpop.permute.xlu1 %2882  ;;  %v2897_v12 = vpop.permute.xlu0 %2896  ;;  %v8831_v49 = vld [vmem:[#allocation3 + $0x48] sm:$0xff] }
 0x47a   : > { %2927 = vst.msk [vmem:[#allocation3 + $0x21] sm:$0xff] %vm297_vm2, %v2883_v54  ;;  %2934 = vst.msk [vmem:[#allocation3 + $0x79] sm:$0xff] %vm297_vm2, %v2897_v12  ;;  %3334 = vrot.lane.b32.xlu0 %v8831_v49, %s6838_s12  ;;  %3724 = vrot.lane.b32.xlu1 %v8831_v49, %s6839_s14  ;;  %v2980_v61 = vcombine.low %v8815_v57, %v8831_v49  ;;  %v2981_v0 = vcombine.high %v8815_v57, %v8831_v49  ;;  %v4125_v12 = vrot.slane %v8831_v49, 1 }
 0x47c   : > { %v8850_v20 = vrot.slane %v2980_v61, %v11541_v1  ;;  %v8853_v52 = vrot.slane %v2981_v0, %v11541_v1 }
 0x47d   : > { %v2887_v47 = vpop.permute.xlu1 %2886  ;;  %v8842_v27 = vld [vmem:[#allocation3 + $0x8] sm:$0xff]  ;;  %v8844_v40 = vld [vmem:[#allocation3 + $0x10] sm:$0x3]  ;;  %v2901_v37 = vpop.permute.xlu0 %2900  ;;  %v8856_v55 = vld [vmem:[#allocation3 + $0x60] sm:$0xff] }
 0x47e   : > { %2929 = vst.msk [vmem:[#allocation3 + $0x39] sm:$0xff] %vm297_vm2, %v2887_v47  ;;  %v4111_v56 = vrot.slane %v8842_v27, 1  ;;  %v4113_v51 = vrot.slane %v8844_v40, 1  ;;  %2936 = vst.msk [vmem:[#allocation3 + $0x91] sm:$0xff] %vm297_vm2, %v2901_v37  ;;  %3338 = vrot.lane.b32.xlu0 %v8856_v55, %s6838_s12  ;;  %v3028_v53 = vcombine.low %v8847_v15, %v8850_v20  ;;  %v3029_v4 = vcombine.high %v8847_v15, %v8850_v20 }
 0x47f   : > { %v3044_v43 = vcombine.low %v8869_v6, %v8853_v52  ;;  %v3045_v44 = vcombine.high %v8869_v6, %v8853_v52  ;;  %v4130_v16 = vrot.slane %v8856_v55, 1 }
 0x480   : > { %v8872_v3 = vsel %vm1003_vm4, %v4111_v56, %v4113_v51  ;;  %v8875_v23 = vsel %vm1003_vm4, %v4110_v2, %v4111_v56 }
 0x481   : > { %11543 = vst [vmem:[#allocation25_spill] sm:$0xff] %v8875_v23  ;;  %v2891_v11 = vpop.permute.xlu1 %2890  ;;  %v8877_v28 = vld [vmem:[#allocation3 + $0x20] sm:$0xff]  ;;  %v8879_v45 = vld [vmem:[#allocation3 + $0x28] sm:$0x3]  ;;  %v2905_v38 = vpop.permute.xlu0 %2904  ;;  %v8886_v42 = vld [vmem:[#allocation3 + $0x78] sm:$0xff]  ;;  %v9057_v20 = vrot.slane %v3045_v44, %v11542_v48 }
 0x482   : > { %2931 = vst.msk [vmem:[#allocation3 + $0x51] sm:$0xff] %vm297_vm2, %v2891_v11  ;;  %v4116_v22 = vrot.slane %v8877_v28, 1  ;;  %v4118_v63 = vrot.slane %v8879_v45, 1  ;;  %2938 = vst.msk [vmem:[#allocation3 + $0xa9] sm:$0xff] %vm297_vm2, %v2905_v38  ;;  %3342 = vrot.lane.b32.xlu0 %v8886_v42, %s6838_s12  ;;  %3732 = vrot.lane.b32.xlu1 %v8886_v42, %s6839_s14 }
 0x484   : > { %v8897_v32 = vsel %vm1003_vm4, %v4116_v22, %v4118_v63  ;;  %v8900_v39 = vsel %vm1003_vm4, %v4115_v7, %v4116_v22 }
 0x485   : > { %v2895_v14 = vpop.permute.xlu1 %2894  ;;  %v8902_v17 = vld [vmem:[#allocation3 + $0x38] sm:$0xff]  ;;  %v8904_v26 = vld [vmem:[#allocation3 + $0x40] sm:$0x3]  ;;  %v8907_v19 = vld [vmem:[#allocation3 + $0x90] sm:$0xff] }
 0x486   : > { %2933 = vst.msk [vmem:[#allocation3 + $0x69] sm:$0xff] %vm297_vm2, %v2895_v14  ;;  %v4121_v25 = vrot.slane %v8902_v17, 1  ;;  %v4123_v34 = vrot.slane %v8904_v26, 1  ;;  %3346 = vrot.lane.b32.xlu0 %v8907_v19, %s6838_s12  ;;  %v2996_v62 = vcombine.low %v8856_v55, %v8907_v19  ;;  %v2997_v58 = vcombine.high %v8856_v55, %v8907_v19 }
 0x487   : > { %v4140_v63 = vrot.slane %v8907_v19, 1  ;;  %v3100_v15 = vcombine.low %v8842_v27, %v8902_v17  ;;  %v3101_v6 = vcombine.high %v8842_v27, %v8902_v17 }
 0x488   : > { %v8919_v24 = vsel %vm1003_vm4, %v4121_v25, %v4123_v34  ;;  %v8922_v30 = vsel %vm1003_vm4, %v4120_v9, %v4121_v25 }
 0x489   : > { %11544 = vst [vmem:[#allocation11_spill] sm:$0xff] %v8922_v30  ;;  %v2899_v29 = vpop.permute.xlu1 %2898  ;;  %v8925_v46 = vld [vmem:[#allocation3 + $0xa8] sm:$0xff]  ;;  %v8936_v35 = vld [vmem:[#allocation3 + $0x50] sm:$0xff]  ;;  %v8943_v8 = vld [vmem:[#allocation3 + $0x58] sm:$0x3]  ;;  %v3108_v44 = vrot.slane %v3100_v15, %v11541_v1 }
 0x48a   : > { %2935 = vst.msk [vmem:[#allocation3 + $0x81] sm:$0xff] %vm297_vm2, %v2899_v29  ;;  %3350 = vrot.lane.b32.xlu0 %v8925_v46, %s6838_s12  ;;  %3740 = vrot.lane.b32.xlu1 %v8925_v46, %s6839_s14  ;;  %v4126_v54 = vrot.slane %v8936_v35, 1  ;;  %v4128_v61 = vrot.slane %v8943_v8, 1  ;;  %v3117_v15 = vcombine.high %v8877_v28, %v8936_v35 }
 0x48c   : > { %v8968_v37 = vsel %vm1003_vm4, %v4125_v12, %v4126_v54  ;;  %v8971_v56 = vsel %vm1003_vm4, %v4126_v54, %v4128_v61  ;;  %v3012_v12 = vcombine.low %v8886_v42, %v8925_v46  ;;  %v5291_v61 = vrot.slane %v8844_v40, 2 }
 0x48d   : > { %v2903_v60 = vpop.permute.xlu1 %2902  ;;  %v8931_v36 = vld [vmem:[#allocation3 + $0x68] sm:$0xff]  ;;  %v8933_v13 = vld [vmem:[#allocation3 + $0x70] sm:$0x3]  ;;  %v3004_v40 = vrot.slane %v2996_v62, %v11541_v1 }
 0x48e   : > { %2937 = vst.msk [vmem:[#allocation3 + $0x99] sm:$0xff] %vm297_vm2, %v2903_v60  ;;  %v4131_v31 = vrot.slane %v8931_v36, 1  ;;  %3712 = vrot.lane.b32.xlu0 %v8810_v21, %s6839_s14  ;;  %3324 = vrot.lane.b32.xlu1 %v8842_v27, %s6838_s12  ;;  %v4133_v50 = vrot.slane %v8933_v13, 1  ;;  %v4135_v60 = vrot.slane %v8886_v42, 1 }
 0x490   : > { %v8952_v18 = vsel %vm1003_vm4, %v4131_v31, %v4133_v50  ;;  %v8955_v41 = vsel %vm1003_vm4, %v4130_v16, %v4131_v31  ;;  %v4145_v50 = vrot.slane %v8925_v46, 1 }
 0x491   : > { %v2907_v33 = vpop.permute.xlu1 %2906  ;;  %v8947_v59 = vld [vmem:[#allocation3 + $0x80] sm:$0xff]  ;;  %v8949_v5 = vld [vmem:[#allocation3 + $0x88] sm:$0x3] }
 0x492   : > { %2939 = vst.msk [vmem:[#allocation3 + $0xb1] sm:$0xff] %vm297_vm2, %v2907_v33  ;;  %3716 = vrot.lane.b32.xlu0 %v8815_v57, %s6839_s14  ;;  %3328 = vrot.lane.b32.xlu1 %v8877_v28, %s6838_s12  ;;  %v4136_v0 = vrot.slane %v8947_v59, 1  ;;  %v4138_v47 = vrot.slane %v8949_v5, 1 }
 0x494   : > { %v8978_v11 = vsel %vm1003_vm4, %v4136_v0, %v4138_v47  ;;  %v9013_v16 = vsel %vm1003_vm4, %v4135_v60, %v4136_v0  ;;  %v9030_v0 = vrot.slane %v3028_v53, %v11542_v48  ;;  %v9036_v47 = vrot.slane %v3029_v4, %v11542_v48 }
 0x495   : > { %v8973_v51 = vld [vmem:[#allocation3 + $0x98] sm:$0xff]  ;;  %v8975_v2 = vld [vmem:[#allocation3 + $0xa0] sm:$0x3]  ;;  %v3020_v53 = vrot.slane %v3012_v12, %v11541_v1  ;;  %v3116_v4 = vcombine.low %v8877_v28, %v8936_v35 }
 0x496   : > { %v4141_v38 = vrot.slane %v8973_v51, 1  ;;  %v4143_v22 = vrot.slane %v8975_v2, 1  ;;  %3720 = vrot.lane.b32.xlu0 %v8821_v10, %s6839_s14  ;;  %3332 = vrot.lane.b32.xlu1 %v8902_v17, %s6838_s12  ;;  %11545 = vst [vmem:[#allocation12_spill] sm:$0xff] %v9030_v0  ;;  %11546 = vst [vmem:[#allocation26_spill] sm:$0xff] %v9036_v47  ;;  %v3131_v0 = vrot.slane %v3117_v15, %v11541_v1 }
 0x497   : > { %v3124_v60 = vrot.slane %v3116_v4, %v11541_v1  ;;  %v3115_v4 = vrot.slane %v3101_v6, %v11541_v1  ;;  %v5288_v6 = vrot.slane %v8810_v21, 2  ;;  %v5311_v21 = vrot.slane %v8933_v13, 2 }
 0x498   : > { %v8988_v7 = vsel %vm1003_vm4, %v4141_v38, %v4143_v22  ;;  %v8991_v14 = vsel %vm1003_vm4, %v4140_v63, %v4141_v38  ;;  %v9042_v38 = vrot.slane %v3044_v43, %v11542_v48  ;;  %v3013_v22 = vcombine.high %v8886_v42, %v8925_v46 }
 0x499   : > { %v8993_v25 = vld [vmem:[#allocation3 + $0xb0] sm:$0xff]  ;;  %v8999_v34 = vld [vmem:[#allocation3 + $0xb8] sm:$0x3]  ;;  %v3132_v43 = vcombine.low %v8931_v36, %v8973_v51  ;;  %v3060_v63 = vcombine.low %v3004_v40, %v3020_v53  ;;  %v3165_v33 = vcombine.high %v3108_v44, %v3124_v60  ;;  %v3180_v15 = vcombine.low %v3115_v4, %v3131_v0 }
 0x49a   : > { %3728 = vrot.lane.b32.xlu0 %v8856_v55, %s6839_s14  ;;  %3336 = vrot.lane.b32.xlu1 %v8936_v35, %s6838_s12  ;;  %v4146_v9 = vrot.slane %v8993_v25, 1  ;;  %v4148_v29 = vrot.slane %v8999_v34, 1  ;;  %11547 = vst [vmem:[#allocation23_spill] sm:$0xff] %v9042_v38  ;;  %v3148_v62 = vcombine.low %v8947_v59, %v8993_v25  ;;  %v3027_v52 = vrot.slane %v3013_v22, %v11541_v1 }
 0x49b   : > { %v9079_v12 = vrot.slane %v3060_v63, %v11542_v48  ;;  %v11553_v38 = vrot.slane %v8902_v17, 2  ;;  %v3164_v13 = vcombine.low %v3108_v44, %v3124_v60  ;;  %v5324_v60 = vrot.slane %v8993_v25, 2 }
 0x49c   : > { %v9009_v31 = vsel %vm1003_vm4, %v4146_v9, %v4148_v29  ;;  %v9017_v54 = vsel %vm1003_vm4, %v4145_v50, %v4146_v9  ;;  %v3061_v9 = vcombine.high %v3004_v40, %v3020_v53  ;;  %v3011_v29 = vrot.slane %v2997_v58, %v11541_v1 }
 0x49d   : > { %v3140_v50 = vrot.slane %v3132_v43, %v11541_v1  ;;  %11548 = vst [vmem:[#allocation33_spill] sm:$0xff] %v9079_v12  ;;  %v3156_v22 = vrot.slane %v3148_v62, %v11541_v1  ;;  %v5301_v62 = vrot.slane %v8904_v26, 2  ;;  %v3133_v26 = vcombine.high %v8931_v36, %v8973_v51 }
 0x49e   : > { %3736 = vrot.lane.b32.xlu0 %v8907_v19, %s6839_s14  ;;  %3340 = vrot.lane.b32.xlu1 %v8931_v36, %s6838_s12  ;;  %v9082_v58 = vrot.slane %v3061_v9, %v11542_v48  ;;  %v3076_v40 = vcombine.low %v3011_v29, %v3027_v52  ;;  %v3077_v53 = vcombine.high %v3011_v29, %v3027_v52 }
 0x49f   : > { %v9105_v29 = vrot.slane %v3165_v33, %v11542_v48  ;;  %v3197_v52 = vcombine.high %v3140_v50, %v3156_v22  ;;  %v3149_v33 = vcombine.high %v8947_v59, %v8993_v25  ;;  %v9146_v47 = vsel %vm1698_vm3, %v11553_v38, %v5301_v62 }
 0x4a0   : > { %11549 = vst [vmem:[#allocation31_spill] sm:$0xff] %v9082_v58  ;;  %v9094_v63 = vrot.slane %v3076_v40, %v11542_v48  ;;  %v9097_v9 = vrot.slane %v3077_v53, %v11542_v48  ;;  %v11551_v40 = vrot.slane %v8842_v27, 2  ;;  %v3181_v58 = vcombine.high %v3115_v4, %v3131_v0  ;;  %11554 = vst [vmem:[#allocation32_spill] sm:$0xff] %v9146_v47 }
 0x4a1   : > { %v9116_v12 = vrot.slane %v3197_v52, %v11542_v48  ;;  %v5293_v52 = vrot.slane %v8815_v57, 2  ;;  %v5294_v0 = vrot.slane %v8877_v28, 2  ;;  %v5296_v4 = vrot.slane %v8879_v45, 2 }
 0x4a2   : > { %3722 = vrot.lane.b32.xlu0 %v8902_v17, %s6839_s14  ;;  %3344 = vrot.lane.b32.xlu1 %v8947_v59, %s6838_s12  ;;  %11550 = vst [vmem:[#allocation14_spill] sm:$0xff] %v9094_v63  ;;  %v9127_v53 = vsel %vm1698_vm3, %v11551_v40, %v5291_v61  ;;  %v3147_v63 = vrot.slane %v3133_v26, %v11541_v1  ;;  %v5309_v40 = vrot.slane %v8931_v36, 2  ;;  %v5306_v45 = vrot.slane %v8943_v8, 2 }
 0x4a3   : > { %11552 = vst [vmem:[#allocation13_spill] sm:$0xff] %v9127_v53  ;;  %v3163_v61 = vrot.slane %v3149_v33, %v11541_v1  ;;  %v5304_v33 = vrot.slane %v8936_v35, 2  ;;  %v3196_v43 = vcombine.low %v3140_v50, %v3156_v22  ;;  %v9173_v50 = vrot.slane %v3164_v13, %v11542_v48 }
 0x4a4   : > { %v9169_v44 = vsel %vm1698_vm3, %v5309_v40, %v5311_v21  ;;  %v5326_v8 = vrot.slane %v8999_v34, 2  ;;  %v5298_v34 = vrot.slane %v8821_v10, 2  ;;  %v11561_v13 = vrot.slane %v8842_v27, 2 }
 0x4a5   : > { %v3212_v57 = vcombine.low %v3147_v63, %v3163_v61  ;;  %v3213_v23 = vcombine.high %v3147_v63, %v3163_v61  ;;  %v9163_v63 = vrot.slane %v3181_v58, %v11542_v48  ;;  %11558 = vst [vmem:[#allocation36_spill] sm:$0xff] %v9169_v44  ;;  %11559 = vst [vmem:[#allocation34_spill] sm:$0xff] %v9173_v50  ;;  %v5321_v61 = vrot.slane %v8975_v2, 2 }
 0x4a6   : > { %3730 = vrot.lane.b32.xlu0 %v8931_v36, %s6839_s14  ;;  %3348 = vrot.lane.b32.xlu1 %v8973_v51, %s6838_s12  ;;  %v9152_v36 = vrot.slane %v3180_v15, %v11542_v48  ;;  %v5319_v15 = vrot.slane %v8973_v51, 2  ;;  %v5323_v2 = vrot.slane %v8925_v46, 2  ;;  %v9202_v22 = vsel %vm1698_vm3, %v5288_v6, %v11561_v13 }
 0x4a7   : > { %v9160_v38 = vrot.slane %v3212_v57, %v11542_v48  ;;  %11556 = vst [vmem:[#allocation37_spill] sm:$0xff] %v9163_v63  ;;  %v9166_v62 = vrot.slane %v3213_v23, %v11542_v48  ;;  %v5314_v57 = vrot.slane %v8947_v59, 2  ;;  %v5313_v21 = vrot.slane %v8886_v42, 2 }
 0x4a8   : > { %v9209_v10 = vsel %vm1698_vm3, %v5294_v0, %v5296_v4  ;;  %v5318_v26 = vrot.slane %v8907_v19, 2  ;;  %v9219_v46 = vsel %vm1698_vm3, %v5319_v15, %v5321_v61  ;;  %v9225_v42 = vsel %vm1698_vm3, %v5293_v52, %v5294_v0 }
 0x4a9   : > { %11555 = vst [vmem:[#allocation29_spill] sm:$0xff] %v9160_v38  ;;  %11557 = vst [vmem:[#allocation35_spill] sm:$0xff] %v9166_v62  ;;  %v5308_v19 = vrot.slane %v8856_v55, 2  ;;  %v9242_v52 = vsel %vm1698_vm3, %v5313_v21, %v5314_v57  ;;  %v5480_v0 = vcombine.low %v9127_v53, %v9146_v47  ;;  %v5512_v61 = vcombine.low %v9169_v44, %v9219_v46 }
 0x4aa   : > { %3738 = vrot.lane.b32.xlu0 %v8973_v51, %s6839_s14  ;;  %3352 = vrot.lane.b32.xlu1 %v8993_v25, %s6838_s12  ;;  %v5316_v51 = vrot.slane %v8949_v5, 2  ;;  %11562 = vst [vmem:[#allocation21_spill] sm:$0xff] %v9209_v10  ;;  %v9213_v5 = vsel %vm1698_vm3, %v5324_v60, %v5326_v8  ;;  %11564 = vst [vmem:[#allocation41_spill] sm:$0xff] %v9219_v46  ;;  %v9236_v4 = vsel %vm1698_vm3, %v5318_v26, %v5319_v15 }
 0x4ab   : > { %11563 = vst [vmem:[#allocation16_spill] sm:$0xff] %v9213_v5  ;;  %v9256_v26 = vsel %vm1698_vm3, %v5308_v19, %v5309_v40  ;;  %v4350_v15 = vcombine.low %v8978_v11, %v9009_v31  ;;  %v4318_v40 = vcombine.low %v8897_v32, %v8971_v56 }
 0x4ac   : > { %v5376_v21 = vcombine.low %v9256_v26, %v9236_v4 }
 0x4ad   : > { %v9298_v58 = vrot.slane %v4350_v15, %v11541_v1 }
 0x4ae   : > { %6078 = vrot.lane.b32.xlu0 %v9127_v53, %s6839_s14  ;;  %3714 = vrot.lane.b32.xlu1 %v8842_v27, %s6839_s14  ;;  %v9216_v27 = vsel %vm1698_vm3, %v5323_v2, %v5324_v60 }
 0x4af   : > { %11569 = vst [vmem:[#allocation55_spill] sm:$0xff] %v9298_v58 }
 0x4b2   : > { %6086 = vrot.lane.b32.xlu0 %v9146_v47, %s6839_s14  ;;  %3718 = vrot.lane.b32.xlu1 %v8877_v28, %s6839_s14  ;;  %v9176_v28 = vrot.slane %v3196_v43, %v11542_v48  ;;  %v5303_v43 = vrot.slane %v8831_v49, 2  ;;  %v9222_v49 = vsel %vm1698_vm3, %v5304_v33, %v5306_v45  ;;  %v9239_v45 = vsel %vm1698_vm3, %v5314_v57, %v5316_v51 }
 0x4b3   : > { %11565 = vst [vmem:[#allocation51_spill] sm:$0xff] %v9222_v49  ;;  %11566 = vst [vmem:[#allocation19_spill] sm:$0xff] %v9239_v45  ;;  %v5528_v55 = vcombine.low %v9239_v45, %v9213_v5  ;;  %v5496_v8 = vcombine.low %v9209_v10, %v9222_v49  ;;  %v4198_v57 = vcombine.low %v8955_v41, %v8991_v14 }
 0x4b4   : > { %11560 = vst [vmem:[#allocation27_spill] sm:$0xff] %v9176_v28  ;;  %v9228_v6 = vsel %vm1698_vm3, %v5303_v43, %v5304_v33  ;;  %v11567_v33 = vrot.slane %v8902_v17, 2  ;;  %v4214_v17 = vcombine.low %v9013_v16, %v9017_v54  ;;  %v4182_v51 = vcombine.low %v8900_v39, %v8968_v37 }
 0x4b5   : > { %v5360_v43 = vcombine.low %v9225_v42, %v9228_v6  ;;  %v9285_v13 = vrot.slane %v5528_v55, %v11541_v1  ;;  %v9304_v55 = vrot.slane %v5512_v61, %v11541_v1 }
 0x4b6   : > { %6094 = vrot.lane.b32.xlu0 %v9169_v44, %s6839_s14  ;;  %3726 = vrot.lane.b32.xlu1 %v8936_v35, %s6839_s14  ;;  %v9249_v60 = vsel %vm1698_vm3, %v5298_v34, %v11567_v33  ;;  %v4334_v34 = vcombine.low %v8952_v18, %v8988_v7  ;;  %v9293_v33 = vrot.slane %v5496_v8, %v11541_v1  ;;  %v11568_v35 = vld [vmem:[#allocation25_spill] sm:$0xff] }
 0x4b7   : > { %v5344_v2 = vcombine.low %v9202_v22, %v9249_v60  ;;  %v4166_v23 = vcombine.low %v11568_v35, %v8922_v30  ;;  %v9301_v62 = vrot.slane %v4214_v17, %v11541_v1  ;;  %11571 = vst [vmem:[#allocation56_spill] sm:$0xff] %v9304_v55  ;;  %v9310_v63 = vrot.slane %v5360_v43, %v11541_v1 }
 0x4b8   : > { %v9313_v8 = vrot.slane %v4318_v40, %v11541_v1  ;;  %v9320_v15 = vrot.slane %v4334_v34, %v11541_v1  ;;  %v9323_v17 = vrot.slane %v4198_v57, %v11541_v1  ;;  %v9326_v61 = vrot.slane %v4182_v51, %v11541_v1 }
 0x4b9   : > { %11570 = vst [vmem:[#allocation17_spill] sm:$0xff] %v9301_v62  ;;  %v9332_v43 = vrot.slane %v5344_v2, %v11541_v1  ;;  %v5576_v40 = vcombine.low %v9304_v55, %v9285_v13  ;;  %v9342_v57 = vrot.slane %v4166_v23, %v11541_v1 }
 0x4ba   : > { %6102 = vrot.lane.b32.xlu0 %v9219_v46, %s6839_s14  ;;  %3734 = vrot.lane.b32.xlu1 %v8947_v59, %s6839_s14  ;;  %v5392_v59 = vcombine.low %v9242_v52, %v9216_v27  ;;  %11572 = vst [vmem:[#allocation46_spill] sm:$0xff] %v9313_v8  ;;  %11573 = vst [vmem:[#allocation22_spill] sm:$0xff] %v9320_v15  ;;  %v4262_v51 = vcombine.low %v9323_v17, %v9301_v62 }
 0x4bb   : > { %11574 = vst [vmem:[#allocation49_spill] sm:$0xff] %v9323_v17  ;;  %11575 = vst [vmem:[#allocation53_spill] sm:$0xff] %v9326_v61  ;;  %v5408_v55 = vcombine.low %v9332_v43, %v9310_v63  ;;  %v4230_v23 = vcombine.low %v9342_v57, %v9326_v61  ;;  %v11585_v61 = vld [vmem:[#allocation33_spill] sm:$0xff] }
 0x4bc   : > { %v9288_v19 = vrot.slane %v5392_v59, %v11541_v1  ;;  %v9307_v59 = vrot.slane %v5376_v21, %v11541_v1  ;;  %v9329_v21 = vrot.slane %v5480_v0, %v11541_v1  ;;  %11576 = vst [vmem:[#allocation62_spill] sm:$0xff] %v9332_v43  ;;  %11578 = vst [vmem:[#allocation57_spill] sm:$0xff] %v9342_v57 }
 0x4bd   : > { %v4398_v0 = vcombine.low %v9320_v15, %v9298_v58  ;;  %v9361_v15 = vrot.slane %v5576_v40, %v11542_v48  ;;  %v9367_v17 = vrot.slane %v4262_v51, %v11542_v48  ;;  %v9376_v57 = vrot.slane %v5408_v55, %v11542_v48 }
 0x4be   : > { %6076 = vrot.lane.b32.xlu0 %v9202_v22, %s6839_s14  ;;  %3742 = vrot.lane.b32.xlu1 %v8993_v25, %s6839_s14  ;;  %v4302_v25 = vcombine.low %v8872_v3, %v8919_v24  ;;  %v5440_v38 = vcombine.low %v9307_v59, %v9288_v19  ;;  %v5544_v2 = vcombine.low %v9329_v21, %v9293_v33 }
 0x4bf   : > { %11579 = vst [vmem:[#allocation64_spill] sm:$0xff] %v9361_v15  ;;  %11581 = vst [vmem:[#allocation30_spill] sm:$0xff] %v9367_v17  ;;  %v9370_v62 = vrot.slane %v4398_v0, %v11542_v48 }
 0x4c0   : > { %v9339_v34 = vrot.slane %v4302_v25, %v11541_v1  ;;  %v9364_v58 = vrot.slane %v5440_v38, %v11542_v48  ;;  %v9373_v43 = vrot.slane %v5544_v2, %v11542_v48  ;;  %11584 = vst [vmem:[#allocation45_spill] sm:$0xff] %v9376_v57  ;;  %v9385_v38 = vrot.slane %v4230_v23, %v11542_v48 }
 0x4c1   : > { %11582 = vst [vmem:[#allocation66_spill] sm:$0xff] %v9370_v62 }
 0x4c2   : > { %6084 = vrot.lane.b32.xlu0 %v9249_v60, %s6839_s14  ;;  %6082 = vrot.lane.b32.xlu1 %v9209_v10, %s6839_s14  ;;  %11577 = vst [vmem:[#allocation24_spill] sm:$0xff] %v9339_v34  ;;  %v4366_v25 = vcombine.low %v9339_v34, %v9313_v8  ;;  %11580 = vst [vmem:[#allocation63_spill] sm:$0xff] %v9364_v58  ;;  %v11586_v34 = vld [vmem:[#allocation12_spill] sm:$0xff] }
 0x4c3   : > { %11583 = vst [vmem:[#allocation39_spill] sm:$0xff] %v9373_v43  ;;  %11587 = vst [vmem:[#allocation65_spill] sm:$0xff] %v9385_v38 }
 0x4c4   : > { %v9388_v40 = vrot.slane %v4366_v25, %v11542_v48 }
 0x4c6   : > { %6092 = vrot.lane.b32.xlu0 %v9256_v26, %s6839_s14  ;;  %6090 = vrot.lane.b32.xlu1 %v9222_v49, %s6839_s14  ;;  %11588 = vst [vmem:[#allocation68_spill] sm:$0xff] %v9388_v40 }
 0x4ca   : > { %6100 = vrot.lane.b32.xlu0 %v9236_v4, %s6839_s14  ;;  %6098 = vrot.lane.b32.xlu1 %v9239_v45, %s6839_s14 }
 0x4ce   : > { %5688 = vrot.lane.b32.xlu0 %v9127_v53, %s6838_s12  ;;  %6106 = vrot.lane.b32.xlu1 %v9213_v5, %s6839_s14 }
 0x4d2   : > { %5696 = vrot.lane.b32.xlu0 %v9146_v47, %s6838_s12  ;;  %6080 = vrot.lane.b32.xlu1 %v9225_v42, %s6839_s14 }
 0x4d6   : > { %5704 = vrot.lane.b32.xlu0 %v9169_v44, %s6838_s12  ;;  %6088 = vrot.lane.b32.xlu1 %v9228_v6, %s6839_s14 }
 0x4da   : > { %5712 = vrot.lane.b32.xlu0 %v9219_v46, %s6838_s12  ;;  %6096 = vrot.lane.b32.xlu1 %v9242_v52, %s6839_s14 }
 0x4de   : > { %5686 = vrot.lane.b32.xlu0 %v9202_v22, %s6838_s12  ;;  %6104 = vrot.lane.b32.xlu1 %v9216_v27, %s6839_s14 }
 0x4e0   : > { %v9420_v23 = vpop.permute.xlu0 %3322 }
 0x4e1   : > { %11589 = vst [vmem:[#allocation69_spill] sm:$0xff] %v9420_v23 }
 0x4e2   : > { %5694 = vrot.lane.b32.xlu0 %v9249_v60, %s6838_s12  ;;  %5692 = vrot.lane.b32.xlu1 %v9209_v10, %s6838_s12 }
 0x4e4   : > { %v9426_v25 = vpop.permute.xlu0 %3326 }
 0x4e5   : > { %11590 = vst [vmem:[#allocation40_spill] sm:$0xff] %v9426_v25 }
 0x4e6   : > { %5702 = vrot.lane.b32.xlu0 %v9256_v26, %s6838_s12  ;;  %5700 = vrot.lane.b32.xlu1 %v9222_v49, %s6838_s12 }
 0x4e8   : > { %v9432_v55 = vpop.permute.xlu0 %3330 }
 0x4e9   : > { %11591 = vst [vmem:[#allocation50_spill] sm:$0xff] %v9432_v55  ;;  %v3370_v57 = vcombine.low %v9420_v23, %v9432_v55 }
 0x4ea   : > { %5710 = vrot.lane.b32.xlu0 %v9236_v4, %s6838_s12  ;;  %5708 = vrot.lane.b32.xlu1 %v9239_v45, %s6838_s12 }
 0x4eb   : > { %v9486_v55 = vrot.slane %v3370_v57, %v11541_v1 }
 0x4ec   : > { %v9438_v51 = vpop.permute.xlu0 %3334  ;;  %v3725_v2 = vpop.permute.xlu1 %3724 }
 0x4ed   : > { %11592 = vst [vmem:[#allocation67_spill] sm:$0xff] %v9438_v51  ;;  %v3386_v38 = vcombine.low %v9426_v25, %v9438_v51  ;;  %11600 = vst [vmem:[#allocation28_spill] sm:$0xff] %v9486_v55 }
 0x4ee   : > { %4900 = vrot.lane.b32.xlu0 %v8872_v3, %s6839_s14  ;;  %5716 = vrot.lane.b32.xlu1 %v9213_v5, %s6838_s12 }
 0x4ef   : > { %v9473_v25 = vrot.slane %v3386_v38, %v11541_v1 }
 0x4f0   : > { %v9444_v8 = vpop.permute.xlu0 %3338 }
 0x4f1   : > { %11593 = vst [vmem:[#allocation48_spill] sm:$0xff] %v9444_v8  ;;  %11597 = vst [vmem:[#allocation38_spill] sm:$0xff] %v9473_v25 }
 0x4f2   : > { %4908 = vrot.lane.b32.xlu0 %v8919_v24, %s6839_s14  ;;  %5690 = vrot.lane.b32.xlu1 %v9225_v42, %s6838_s12 }
 0x4f4   : > { %v9450_v0 = vpop.permute.xlu0 %3342  ;;  %v3733_v40 = vpop.permute.xlu1 %3732 }
 0x4f5   : > { %11594 = vst [vmem:[#allocation47_spill] sm:$0xff] %v9450_v0 }
 0x4f6   : > { %4916 = vrot.lane.b32.xlu0 %v8952_v18, %s6839_s14  ;;  %5698 = vrot.lane.b32.xlu1 %v9228_v6, %s6838_s12 }
 0x4f8   : > { %v9456_v62 = vpop.permute.xlu0 %3346 }
 0x4f9   : > { %11595 = vst [vmem:[#allocation42_spill] sm:$0xff] %v9456_v62  ;;  %v3402_v17 = vcombine.low %v9444_v8, %v9456_v62 }
 0x4fa   : > { %4924 = vrot.lane.b32.xlu0 %v8988_v7, %s6839_s14  ;;  %5706 = vrot.lane.b32.xlu1 %v9242_v52, %s6838_s12 }
 0x4fb   : > { %v9480_v8 = vrot.slane %v3402_v17, %v11541_v1 }
 0x4fc   : > { %v9468_v58 = vpop.permute.xlu0 %3350  ;;  %v3741_v53 = vpop.permute.xlu1 %3740 }
 0x4fd   : > { %11596 = vst [vmem:[#allocation43_spill] sm:$0xff] %v9468_v58  ;;  %v3418_v47 = vcombine.low %v9450_v0, %v9468_v58  ;;  %11598 = vst [vmem:[#allocation44_spill] sm:$0xff] %v9480_v8  ;;  %v3434_v0 = vcombine.low %v9486_v55, %v9473_v25  ;;  %v3808_v44 = vcombine.low %v3733_v40, %v3741_v53 }
 0x4fe   : > { %4898 = vrot.lane.b32.xlu0 %v11568_v35, %s6839_s14  ;;  %5714 = vrot.lane.b32.xlu1 %v9216_v27, %s6838_s12 }
 0x4ff   : > { %v9483_v23 = vrot.slane %v3418_v47, %v11541_v1  ;;  %v9508_v55 = vrot.slane %v3434_v0, %v11542_v48  ;;  %v3809_v0 = vcombine.high %v3733_v40, %v3741_v53  ;;  %v9533_v53 = vrot.slane %v3808_v44, %v11541_v1 }
 0x500   : > { %v3713_v62 = vpop.permute.xlu0 %3712  ;;  %v9488_v51 = vpop.permute.xlu1 %3324 }
 0x501   : > { %11599 = vst [vmem:[#allocation20_spill] sm:$0xff] %v9483_v23  ;;  %11601 = vst [vmem:[#allocation18_spill] sm:$0xff] %v9488_v51  ;;  %v3466_v38 = vcombine.low %v9480_v8, %v9483_v23  ;;  %v9536_v40 = vrot.slane %v3809_v0, %v11541_v1 }
 0x502   : > { %4906 = vrot.lane.b32.xlu0 %v8922_v30, %s6839_s14  ;;  %4904 = vrot.lane.b32.xlu1 %v8897_v32, %s6839_s14  ;;  %11604 = vst [vmem:[#allocation52_spill] sm:$0xff] %v9508_v55  ;;  %11610 = vst [vmem:[#allocation70_spill] sm:$0xff] %v9533_v53 }
 0x503   : > { %v9501_v57 = vrot.slane %v3466_v38, %v11542_v48  ;;  %11611 = vst [vmem:[#allocation71_spill] sm:$0xff] %v9536_v40 }
 0x504   : > { %v3717_v47 = vpop.permute.xlu0 %3716  ;;  %v9498_v17 = vpop.permute.xlu1 %3328 }
 0x505   : > { %11602 = vst [vmem:[#allocation59_spill] sm:$0xff] %v9498_v17  ;;  %11603 = vst [vmem:[#allocation58_spill] sm:$0xff] %v9501_v57  ;;  %v3776_v23 = vcombine.low %v3717_v47, %v3725_v2  ;;  %v3777_v55 = vcombine.high %v3717_v47, %v3725_v2 }
 0x506   : > { %4914 = vrot.lane.b32.xlu0 %v8955_v41, %s6839_s14  ;;  %4912 = vrot.lane.b32.xlu1 %v8971_v56, %s6839_s14 }
 0x507   : > { %v9541_v2 = vrot.slane %v3776_v23, %v11541_v1 }
 0x508   : > { %v3721_v25 = vpop.permute.xlu0 %3720  ;;  %v9510_v8 = vpop.permute.xlu1 %3332 }
 0x509   : > { %11605 = vst [vmem:[#allocation54_spill] sm:$0xff] %v9510_v8  ;;  %v3760_v10 = vcombine.low %v3713_v62, %v3721_v25  ;;  %v3761_v49 = vcombine.high %v3713_v62, %v3721_v25  ;;  %11612 = vst [vmem:[#allocation72_spill] sm:$0xff] %v9541_v2 }
 0x50a   : > { %4922 = vrot.lane.b32.xlu0 %v8991_v14, %s6839_s14  ;;  %4920 = vrot.lane.b32.xlu1 %v8978_v11, %s6839_s14 }
 0x50b   : > { %v9527_v45 = vrot.slane %v3760_v10, %v11541_v1  ;;  %v9530_v5 = vrot.slane %v3761_v49, %v11541_v1  ;;  %v9544_v10 = vrot.slane %v3777_v55, %v11541_v1 }
 0x50c   : > { %v3729_v38 = vpop.permute.xlu0 %3728  ;;  %v9518_v58 = vpop.permute.xlu1 %3336 }
 0x50d   : > { %11606 = vst [vmem:[#allocation61_spill] sm:$0xff] %v9518_v58  ;;  %11608 = vst [vmem:[#allocation10_spill] sm:$0xff] %v9527_v45  ;;  %v3824_v23 = vcombine.low %v9527_v45, %v9541_v2  ;;  %v3841_v55 = vcombine.high %v9530_v5, %v9544_v10 }
 0x50e   : > { %4510 = vrot.lane.b32.xlu0 %v8872_v3, %s6838_s12  ;;  %4928 = vrot.lane.b32.xlu1 %v9009_v31, %s6839_s14  ;;  %11609 = vst [vmem:[#allocation15_spill] sm:$0xff] %v9530_v5  ;;  %11613 = vst [vmem:[#allocation73_spill] sm:$0xff] %v9544_v10 }
 0x50f   : > { %v9584_v5 = vrot.slane %v3841_v55, %v11542_v48 }
 0x510   : > { %v3737_v57 = vpop.permute.xlu0 %3736  ;;  %v9524_v46 = vpop.permute.xlu1 %3340 }
 0x511   : > { %11607 = vst [vmem:[#allocation60_spill] sm:$0xff] %v9524_v46  ;;  %v3792_v62 = vcombine.low %v3729_v38, %v3737_v57  ;;  %v3793_v25 = vcombine.high %v3729_v38, %v3737_v57  ;;  %11621 = vst [vmem:[#allocation81_spill] sm:$0xff] %v9584_v5 }
 0x512   : > { %4518 = vrot.lane.b32.xlu0 %v8919_v24, %s6838_s12  ;;  %4902 = vrot.lane.b32.xlu1 %v8900_v39, %s6839_s14 }
 0x513   : > { %v9547_v49 = vrot.slane %v3792_v62, %v11541_v1  ;;  %v9550_v47 = vrot.slane %v3793_v25, %v11541_v1 }
 0x514   : > { %v9554_v44 = vpop.permute.xlu0 %3722  ;;  %v9556_v57 = vpop.permute.xlu1 %3344 }
 0x515   : > { %11614 = vst [vmem:[#allocation74_spill] sm:$0xff] %v9547_v49  ;;  %11615 = vst [vmem:[#allocation75_spill] sm:$0xff] %v9550_v47  ;;  %v3856_v38 = vcombine.low %v9547_v49, %v9533_v53  ;;  %v3873_v0 = vcombine.high %v9550_v47, %v9536_v40  ;;  %v3522_v49 = vcombine.low %v9498_v17, %v9518_v58 }
 0x516   : > { %11616 = vst [vmem:[#allocation76_spill] sm:$0xff] %v9556_v57  ;;  %4526 = vrot.lane.b32.xlu0 %v8952_v18, %s6838_s12  ;;  %4910 = vrot.lane.b32.xlu1 %v8968_v37, %s6839_s14  ;;  %v9581_v53 = vrot.slane %v3824_v23, %v11542_v48 }
 0x517   : > { %v9571_v62 = vrot.slane %v3856_v38, %v11542_v48  ;;  %v9574_v25 = vrot.slane %v3873_v0, %v11542_v48  ;;  %v3506_v38 = vcombine.low %v9488_v51, %v9510_v8  ;;  %v9601_v10 = vrot.slane %v3522_v49, %v11541_v1 }
 0x518   : > { %v3731_v45 = vpop.permute.xlu0 %3730  ;;  %v9576_v2 = vpop.permute.xlu1 %3348  ;;  %11620 = vst [vmem:[#allocation80_spill] sm:$0xff] %v9581_v53 }
 0x519   : > { %11617 = vst [vmem:[#allocation77_spill] sm:$0xff] %v9571_v62  ;;  %11618 = vst [vmem:[#allocation78_spill] sm:$0xff] %v9574_v25  ;;  %v3538_v0 = vcombine.low %v9524_v46, %v9576_v2  ;;  %v9608_v8 = vrot.slane %v3506_v38, %v11541_v1 }
 0x51a   : > { %11619 = vst [vmem:[#allocation79_spill] sm:$0xff] %v9576_v2  ;;  %4534 = vrot.lane.b32.xlu0 %v8988_v7, %s6838_s12  ;;  %4918 = vrot.lane.b32.xlu1 %v9013_v16, %s6839_s14  ;;  %11623 = vst [vmem:[#allocation83_spill] sm:$0xff] %v9601_v10 }
 0x51b   : > { %11624 = vst [vmem:[#allocation84_spill] sm:$0xff] %v9608_v8  ;;  %v9611_v17 = vrot.slane %v3538_v0, %v11541_v1  ;;  %v3570_v25 = vcombine.low %v9608_v8, %v9601_v10  ;;  %v11633_v8 = vcombine.high %v11586_v34, %v11585_v61 }
 0x51c   : > { %v3739_v55 = vpop.permute.xlu0 %3738  ;;  %v9598_v58 = vpop.permute.xlu1 %3352 }
 0x51d   : > { %11622 = vst [vmem:[#allocation82_spill] sm:$0xff] %v9598_v58  ;;  %v3554_v51 = vcombine.low %v9556_v57, %v9598_v58  ;;  %11625 = vst [vmem:[#allocation85_spill] sm:$0xff] %v9611_v17  ;;  %v9634_v2 = vrot.slane %v3570_v25, %v11542_v48  ;;  %v3928_v62 = vcombine.low %v3731_v45, %v3739_v55 }
 0x51e   : > { %4508 = vrot.lane.b32.xlu0 %v11568_v35, %s6838_s12  ;;  %4926 = vrot.lane.b32.xlu1 %v9017_v54, %s6839_s14  ;;  %v3929_v57 = vcombine.high %v3731_v45, %v3739_v55 }
 0x51f   : > { %v9614_v23 = vrot.slane %v3554_v51, %v11541_v1  ;;  %11630 = vst [vmem:[#allocation90_spill] sm:$0xff] %v9634_v2 }
 0x520   : > { %v9618_v49 = vpop.permute.xlu0 %6078  ;;  %v3715_v5 = vpop.permute.xlu1 %3714 }
 0x521   : > { %11626 = vst [vmem:[#allocation86_spill] sm:$0xff] %v9614_v23  ;;  %11627 = vst [vmem:[#allocation87_spill] sm:$0xff] %v9618_v49  ;;  %v3602_v46 = vcombine.low %v9611_v17, %v9614_v23  ;;  %v3896_v2 = vcombine.low %v3715_v5, %v9554_v44 }
 0x522   : > { %4516 = vrot.lane.b32.xlu0 %v8922_v30, %s6838_s12  ;;  %4514 = vrot.lane.b32.xlu1 %v8897_v32, %s6838_s12 }
 0x523   : > { %v9629_v51 = vrot.slane %v3602_v46, %v11542_v48  ;;  %v9677_v34 = vrot.slane %v3896_v2, %v11541_v1 }
 0x524   : > { %v9631_v38 = vpop.permute.xlu0 %6086  ;;  %v3719_v0 = vpop.permute.xlu1 %3718 }
 0x525   : > { %11628 = vst [vmem:[#allocation88_spill] sm:$0xff] %v9629_v51  ;;  %11629 = vst [vmem:[#allocation89_spill] sm:$0xff] %v9631_v38  ;;  %v3897_v51 = vcombine.high %v3715_v5, %v9554_v44  ;;  %v11639_v5 = vld [vmem:[#allocation26_spill] sm:$0xff]  ;;  %v11640_v44 = vld [vmem:[#allocation31_spill] sm:$0xff] }
 0x526   : > { %4524 = vrot.lane.b32.xlu0 %v8955_v41, %s6838_s12  ;;  %4522 = vrot.lane.b32.xlu1 %v8971_v56, %s6838_s12  ;;  %v11641_v61 = vcombine.high %v11639_v5, %v11640_v44  ;;  %11642 = vst [vmem:[#allocation26_spill] sm:$0xff] %v9677_v34 }
 0x528   : > { %v9642_v10 = vpop.permute.xlu0 %6094  ;;  %v3727_v17 = vpop.permute.xlu1 %3726 }
 0x529   : > { %11631 = vst [vmem:[#allocation91_spill] sm:$0xff] %v9642_v10  ;;  %v3912_v23 = vcombine.low %v3719_v0, %v3727_v17  ;;  %v3913_v53 = vcombine.high %v3719_v0, %v3727_v17  ;;  %v9670_v0 = vrot.slane %v3929_v57, %v11541_v1 }
 0x52a   : > { %4532 = vrot.lane.b32.xlu0 %v8991_v14, %s6838_s12  ;;  %4530 = vrot.lane.b32.xlu1 %v8978_v11, %s6838_s12 }
 0x52b   : > { %v9661_v40 = vrot.slane %v3912_v23, %v11541_v1  ;;  %v9664_v45 = vrot.slane %v3913_v53, %v11541_v1  ;;  %11638 = vst [vmem:[#allocation97_spill] sm:$0xff] %v9670_v0  ;;  %v9680_v23 = vrot.slane %v3897_v51, %v11541_v1 }
 0x52c   : > { %v9648_v46 = vpop.permute.xlu0 %6102  ;;  %v3735_v25 = vpop.permute.xlu1 %3734 }
 0x52d   : > { %11632 = vst [vmem:[#allocation92_spill] sm:$0xff] %v9648_v46  ;;  %11635 = vst [vmem:[#allocation94_spill] sm:$0xff] %v9661_v40  ;;  %v3977_v2 = vcombine.high %v9680_v23, %v9664_v45 }
 0x52e   : > { %3237 = vrot.lane.b32.xlu0 %v11633_v8, %s6844_s7  ;;  %4538 = vrot.lane.b32.xlu1 %v9009_v31, %s6838_s12  ;;  %11636 = vst [vmem:[#allocation95_spill] sm:$0xff] %v9664_v45  ;;  %v9667_v8 = vrot.slane %v3928_v62, %v11541_v1  ;;  %11643 = vst [vmem:[#allocation31_spill] sm:$0xff] %v9680_v23 }
 0x530   : > { %v9658_v58 = vpop.permute.xlu0 %6076  ;;  %v3743_v47 = vpop.permute.xlu1 %3742  ;;  %11637 = vst [vmem:[#allocation96_spill] sm:$0xff] %v9667_v8 }
 0x531   : > { %11634 = vst [vmem:[#allocation93_spill] sm:$0xff] %v9658_v58  ;;  %v3944_v17 = vcombine.low %v3735_v25, %v3743_v47  ;;  %v3945_v55 = vcombine.high %v3735_v25, %v3743_v47 }
 0x532   : > { %3245 = vrot.lane.b32.xlu0 %v11641_v61, %s6845_s9  ;;  %4512 = vrot.lane.b32.xlu1 %v8900_v39, %s6838_s12  ;;  %v3960_v61 = vcombine.low %v9677_v34, %v9661_v40 }
 0x533   : > { %v9683_v53 = vrot.slane %v3944_v17, %v11541_v1  ;;  %v9686_v47 = vrot.slane %v3945_v55, %v11541_v1  ;;  %v11647_v17 = vld [vmem:[#allocation23_spill] sm:$0xff]  ;;  %v11648_v55 = vld [vmem:[#allocation14_spill] sm:$0xff] }
 0x534   : > { %v9690_v57 = vpop.permute.xlu0 %6084  ;;  %v9692_v62 = vpop.permute.xlu1 %6082  ;;  %v11649_v35 = vcombine.high %v11647_v17, %v11648_v55 }
 0x535   : > { %11644 = vst [vmem:[#allocation98_spill] sm:$0xff] %v9686_v47  ;;  %11645 = vst [vmem:[#allocation99_spill] sm:$0xff] %v9690_v57  ;;  %v3992_v51 = vcombine.low %v9667_v8, %v9683_v53  ;;  %v4009_v25 = vcombine.high %v9670_v0, %v9686_v47  ;;  %v9719_v0 = vrot.slane %v3960_v61, %v11542_v48 }
 0x536   : > { %11646 = vst [vmem:[#allocation100_spill] sm:$0xff] %v9692_v62  ;;  %3253 = vrot.lane.b32.xlu0 %v11649_v35, %s6846_s10  ;;  %4520 = vrot.lane.b32.xlu1 %v8968_v37, %s6838_s12  ;;  %v9722_v47 = vrot.slane %v3977_v2, %v11542_v48  ;;  %v11656_v35 = vcombine.high %v9057_v20, %v9097_v9 }
 0x537   : > { %v9709_v30 = vrot.slane %v3992_v51, %v11542_v48  ;;  %v9712_v34 = vrot.slane %v4009_v25, %v11542_v48  ;;  %11654 = vst [vmem:[#allocation103_spill] sm:$0xff] %v9719_v0  ;;  %v6260_v8 = vcombine.low %v9618_v49, %v9631_v38  ;;  %v6292_v51 = vcombine.low %v9642_v10, %v9648_v46  ;;  %v11669_v0 = vld [vmem:[#allocation35_spill] sm:$0xff] }
 0x538   : > { %v9714_v23 = vpop.permute.xlu0 %6092  ;;  %v9716_v45 = vpop.permute.xlu1 %6090  ;;  %11655 = vst [vmem:[#allocation104_spill] sm:$0xff] %v9722_v47 }
 0x539   : > { %11650 = vst [vmem:[#allocation23_spill] sm:$0xff] %v9709_v30  ;;  %11651 = vst [vmem:[#allocation14_spill] sm:$0xff] %v9712_v34  ;;  %v6276_v2 = vcombine.low %v9692_v62, %v9716_v45  ;;  %v9764_v38 = vrot.slane %v6260_v8, %v11541_v1 }
 0x53a   : > { %11652 = vst [vmem:[#allocation101_spill] sm:$0xff] %v9714_v23  ;;  %11653 = vst [vmem:[#allocation102_spill] sm:$0xff] %v9716_v45  ;;  %3261 = vrot.lane.b32.xlu0 %v11656_v35, %s6847_s11  ;;  %4528 = vrot.lane.b32.xlu1 %v9013_v16, %s6838_s12  ;;  %v11659_v35 = vcombine.low %v9105_v29, %v9116_v12  ;;  %v9767_v45 = vrot.slane %v6292_v51, %v11541_v1 }
 0x53b   : > { %v9755_v34 = vrot.slane %v6276_v2, %v11541_v1  ;;  %v11665_v2 = vcombine.low %v11639_v5, %v11640_v44  ;;  %v5545_v5 = vcombine.high %v9329_v21, %v9293_v33  ;;  %v11671_v44 = vcombine.low %v11647_v17, %v11648_v55 }
 0x53c   : > { %v9734_v40 = vpop.permute.xlu0 %6100  ;;  %v9736_v61 = vpop.permute.xlu1 %6098  ;;  %v5441_v21 = vcombine.high %v9307_v59, %v9288_v19  ;;  %v5377_v55 = vcombine.high %v9256_v26, %v9236_v4  ;;  %v11676_v19 = vcombine.low %v9057_v20, %v9097_v9  ;;  %v5345_v4 = vcombine.high %v9202_v22, %v9249_v60 }
 0x53d   : > { %11657 = vst [vmem:[#allocation105_spill] sm:$0xff] %v9734_v40  ;;  %11658 = vst [vmem:[#allocation106_spill] sm:$0xff] %v9736_v61  ;;  %v6324_v8 = vcombine.low %v9764_v38, %v9755_v34  ;;  %v6124_v60 = vcombine.low %v9658_v58, %v9690_v57 }
 0x53e   : > { %3269 = vrot.lane.b32.xlu0 %v11659_v35, %s6841_s15  ;;  %4536 = vrot.lane.b32.xlu1 %v9017_v54, %s6838_s12  ;;  %v11662_v35 = vld [vmem:[#allocation29_spill] sm:$0xff]  ;;  %v5391_v9 = vrot.slane %v5377_v55, %v11541_v1 }
 0x53f   : > { %v11663_v49 = vcombine.low %v9152_v36, %v11662_v35  ;;  %11664 = vst [vmem:[#allocation29_spill] sm:$0xff] %v9764_v38  ;;  %v9813_v17 = vrot.slane %v6324_v8, %v11542_v48  ;;  %v5455_v8 = vrot.slane %v5441_v21, %v11542_v48  ;;  %v9867_v59 = vrot.slane %v6124_v60, %v11541_v1  ;;  %v11683_v60 = vld [vmem:[#allocation16_spill] sm:$0xff] }
 0x540   : > { %v9750_v25 = vpop.permute.xlu0 %5688  ;;  %v9752_v47 = vpop.permute.xlu1 %6106 }
 0x541   : > { %11660 = vst [vmem:[#allocation107_spill] sm:$0xff] %v9750_v25  ;;  %11661 = vst [vmem:[#allocation108_spill] sm:$0xff] %v9752_v47  ;;  %v6308_v62 = vcombine.low %v9736_v61, %v9752_v47 }
 0x542   : > { %3277 = vrot.lane.b32.xlu0 %v11663_v49, %s6842_s16  ;;  %3241 = vrot.lane.b32.xlu1 %v11665_v2, %s6841_s15  ;;  %v11667_v49 = vld [vmem:[#allocation56_spill] sm:$0xff]  ;;  %v5393_v2 = vcombine.high %v9242_v52, %v9216_v27  ;;  %11674 = vst [vmem:[#allocation35_spill] sm:$0xff] %v9813_v17  ;;  %v5361_v27 = vcombine.high %v9225_v42, %v9228_v6 }
 0x543   : > { %v9770_v10 = vrot.slane %v6308_v62, %v11541_v1  ;;  %v5577_v47 = vcombine.high %v11667_v49, %v9285_v13  ;;  %v11668_v62 = vld [vmem:[#allocation37_spill] sm:$0xff]  ;;  %v9821_v52 = vrot.slane %v5545_v5, %v11542_v48 }
 0x544   : > { %v9776_v46 = vpop.permute.xlu0 %5696  ;;  %v9778_v61 = vpop.permute.xlu1 %6080  ;;  %v11670_v30 = vcombine.low %v11668_v62, %v11669_v0  ;;  %v5407_v42 = vrot.slane %v5393_v2, %v11541_v1  ;;  %v5375_v5 = vrot.slane %v5361_v27, %v11541_v1  ;;  %v11678_v2 = vcombine.high %v9173_v50, %v9176_v28 }
 0x545   : > { %11666 = vst [vmem:[#allocation109_spill] sm:$0xff] %v9778_v61  ;;  %v6356_v51 = vcombine.low %v9767_v45, %v9770_v10  ;;  %v9808_v33 = vrot.slane %v5577_v47, %v11542_v48  ;;  %v11675_v47 = vld [vmem:[#allocation62_spill] sm:$0xff] }
 0x546   : > { %3285 = vrot.lane.b32.xlu0 %v11670_v30, %s6843_s8  ;;  %3249 = vrot.lane.b32.xlu1 %v11671_v44, %s6842_s16  ;;  %v5609_v30 = vcombine.high %v9373_v43, %v9361_v15  ;;  %v6156_v44 = vcombine.low %v9714_v23, %v9734_v40  ;;  %v11684_v43 = vld [vmem:[#allocation19_spill] sm:$0xff]  ;;  %v11692_v23 = vld [vmem:[#allocation32_spill] sm:$0xff]  ;;  %v11693_v40 = vld [vmem:[#allocation13_spill] sm:$0xff] }
 0x547   : > { %v9797_v13 = vrot.slane %v6356_v51, %v11542_v48  ;;  %v5409_v51 = vcombine.high %v11675_v47, %v9310_v63  ;;  %v5610_v63 = vcombine.low %v9821_v52, %v9808_v33  ;;  %v5456_v47 = vcombine.low %v5391_v9, %v5407_v42 }
 0x548   : > { %v9801_v49 = vpop.permute.xlu0 %5704  ;;  %v9803_v38 = vpop.permute.xlu1 %6088  ;;  %v5529_v58 = vcombine.high %v11684_v43, %v11683_v60  ;;  %v11689_v43 = vcombine.high %v9152_v36, %v11662_v35 }
 0x549   : > { %11672 = vst [vmem:[#allocation56_spill] sm:$0xff] %v9797_v13  ;;  %11673 = vst [vmem:[#allocation37_spill] sm:$0xff] %v9803_v38  ;;  %v6140_v20 = vcombine.low %v9778_v61, %v9803_v38  ;;  %v5423_v22 = vrot.slane %v5409_v51, %v11542_v48  ;;  %v5464_v15 = vrot.slane %v5456_v47, %v11542_v48  ;;  %v11687_v61 = vld [vmem:[#allocation51_spill] sm:$0xff] }
 0x54a   : > { %5645 = vrot.lane.b32.xlu0 %v5609_v30, %s6844_s7  ;;  %3257 = vrot.lane.b32.xlu1 %v11676_v19, %s6843_s8  ;;  %v5359_v30 = vrot.slane %v5345_v4, %v11541_v1  ;;  %v9870_v4 = vrot.slane %v6156_v44, %v11541_v1 }
 0x54b   : > { %v5474_v27 = vcombine.low %v5423_v22, %v5455_v8  ;;  %v9861_v51 = vrot.slane %v6140_v20, %v11541_v1  ;;  %v11681_v20 = vcombine.high %v9105_v29, %v9116_v12  ;;  %v11685_v29 = vld [vmem:[#allocation41_spill] sm:$0xff] }
 0x54c   : > { %v9834_v6 = vpop.permute.xlu0 %5712  ;;  %v9836_v26 = vpop.permute.xlu1 %6096  ;;  %v5425_v36 = vcombine.high %v5359_v30, %v5375_v5 }
 0x54d   : > { %11677 = vst [vmem:[#allocation62_spill] sm:$0xff] %v9836_v26  ;;  %v6188_v44 = vcombine.low %v9867_v59, %v9861_v51 }
 0x54e   : > { %5649 = vrot.lane.b32.xlu0 %v5610_v63, %s6841_s15  ;;  %3265 = vrot.lane.b32.xlu1 %v11678_v2, %s6844_s7  ;;  %v5424_v63 = vcombine.low %v5359_v30, %v5375_v5  ;;  %v11696_v30 = vld [vmem:[#allocation63_spill] sm:$0xff] }
 0x550   : > { %v9856_v21 = vpop.permute.xlu0 %5686  ;;  %v9858_v55 = vpop.permute.xlu1 %6104  ;;  %v5432_v12 = vrot.slane %v5424_v63, %v11542_v48  ;;  %v5457_v63 = vcombine.high %v5391_v9, %v5407_v42 }
 0x551   : > { %11679 = vst [vmem:[#allocation110_spill] sm:$0xff] %v9856_v21  ;;  %11680 = vst [vmem:[#allocation111_spill] sm:$0xff] %v9858_v55  ;;  %v6172_v19 = vcombine.low %v9836_v26, %v9858_v55  ;;  %v11703_v55 = vld [vmem:[#allocation17_spill] sm:$0xff] }
 0x552   : > { %5621 = vrot.lane.b32.xlu0 %v5474_v27, %s6841_s15  ;;  %3273 = vrot.lane.b32.xlu1 %v11681_v20, %s6845_s9  ;;  %v5475_v27 = vcombine.high %v5423_v22, %v5455_v8  ;;  %v11686_v20 = vld [vmem:[#allocation36_spill] sm:$0xff]  ;;  %v11688_v8 = vld [vmem:[#allocation21_spill] sm:$0xff]  ;;  %v5477_v42 = vcombine.high %v5432_v12, %v5464_v15  ;;  %v5471_v9 = vrot.slane %v5457_v63, %v11542_v48 }
 0x553   : > { %v9873_v2 = vrot.slane %v6172_v19, %v11541_v1  ;;  %v5513_v57 = vcombine.high %v11686_v20, %v11685_v29  ;;  %v5497_v22 = vcombine.high %v11688_v8, %v11687_v61  ;;  %v5481_v29 = vcombine.high %v11693_v40, %v11692_v23 }
 0x554   : > { %v9879_v28 = vpop.permute.xlu0 %5694  ;;  %v9881_v50 = vpop.permute.xlu1 %5692  ;;  %v5543_v20 = vrot.slane %v5529_v58, %v11541_v1  ;;  %v9911_v61 = vrot.slane %v6188_v44, %v11542_v48  ;;  %v11695_v8 = vcombine.high %v11668_v62, %v11669_v0  ;;  %v11697_v44 = vld [vmem:[#allocation45_spill] sm:$0xff]  ;;  %v5439_v62 = vrot.slane %v5425_v36, %v11542_v48 }
 0x555   : > { %11682 = vst [vmem:[#allocation112_spill] sm:$0xff] %v9879_v28  ;;  %v6220_v19 = vcombine.low %v9870_v4, %v9873_v2  ;;  %v5527_v35 = vrot.slane %v5513_v57, %v11541_v1  ;;  %v5495_v5 = vrot.slane %v5481_v29, %v11541_v1 }
 0x556   : > { %5625 = vrot.lane.b32.xlu0 %v5475_v27, %s6845_s9  ;;  %3281 = vrot.lane.b32.xlu1 %v11689_v43, %s6846_s10  ;;  %v5476_v27 = vcombine.low %v5432_v12, %v5464_v15  ;;  %11694 = vst [vmem:[#allocation41_spill] sm:$0xff] %v9911_v61  ;;  %v5870_v43 = vcombine.low %v9750_v25, %v9776_v46 }
 0x557   : > { %v9901_v47 = vrot.slane %v6220_v19, %v11542_v48  ;;  %v5511_v19 = vrot.slane %v5497_v22, %v11541_v1  ;;  %v5473_v22 = vcombine.high %v11697_v44, %v11696_v30  ;;  %v5592_v0 = vcombine.low %v5527_v35, %v5543_v20 }
 0x558   : > { %v9903_v60 = vpop.permute.xlu0 %5702  ;;  %v9905_v38 = vpop.permute.xlu1 %5700  ;;  %v5902_v15 = vcombine.low %v9801_v49, %v9834_v6  ;;  %v5478_v29 = vcombine.low %v5439_v62, %v5471_v9 }
 0x559   : > { %11690 = vst [vmem:[#allocation16_spill] sm:$0xff] %v9901_v47  ;;  %11691 = vst [vmem:[#allocation19_spill] sm:$0xff] %v9903_v60  ;;  %v5886_v57 = vcombine.low %v9881_v50, %v9905_v38  ;;  %v5560_v12 = vcombine.low %v5495_v5, %v5511_v19  ;;  %v5600_v40 = vrot.slane %v5592_v0, %v11542_v48 }
 0x55a   : > { %5629 = vrot.lane.b32.xlu0 %v5476_v27, %s6842_s16  ;;  %3289 = vrot.lane.b32.xlu1 %v11695_v8, %s6847_s11  ;;  %v9956_v30 = vrot.slane %v5902_v15, %v11541_v1  ;;  %v11704_v15 = vld [vmem:[#allocation49_spill] sm:$0xff]  ;;  %v5593_v47 = vcombine.high %v5527_v35, %v5543_v20  ;;  %v4303_v20 = vcombine.high %v8872_v3, %v8919_v24 }
 0x55b   : > { %v9944_v8 = vrot.slane %v5886_v57, %v11541_v1  ;;  %v5568_v57 = vrot.slane %v5560_v12, %v11542_v48  ;;  %v4263_v61 = vcombine.high %v11704_v15, %v11703_v55  ;;  %v5561_v55 = vcombine.high %v5495_v5, %v5511_v19 }
 0x55c   : > { %v9922_v23 = vpop.permute.xlu0 %5710  ;;  %v9924_v58 = vpop.permute.xlu1 %5708 }
 0x55d   : > { %v5612_v12 = vcombine.low %v5568_v57, %v5600_v40  ;;  %v5575_v24 = vrot.slane %v5561_v55, %v11542_v48  ;;  %v5734_v55 = vcombine.low %v9856_v21, %v9879_v28 }
 0x55e   : > { %5633 = vrot.lane.b32.xlu0 %v5477_v42, %s6846_s10  ;;  %5617 = vrot.lane.b32.xlu1 %v5473_v22, %s6844_s7  ;;  %v5611_v42 = vcombine.high %v9821_v52, %v9808_v33  ;;  %v9953_v22 = vrot.slane %v5870_v43, %v11541_v1  ;;  %v4351_v33 = vcombine.high %v8978_v11, %v9009_v31  ;;  %v11702_v43 = vld [vmem:[#allocation65_spill] sm:$0xff] }
 0x55f   : > { %v4335_v11 = vcombine.high %v8952_v18, %v8988_v7  ;;  %v4319_v31 = vcombine.high %v8897_v32, %v8971_v56  ;;  %v5479_v32 = vcombine.high %v5439_v62, %v5471_v9  ;;  %v4277_v56 = vrot.slane %v4263_v61, %v11542_v48 }
 0x560   : > { %v9939_v27 = vpop.permute.xlu0 %4900  ;;  %v9941_v63 = vpop.permute.xlu1 %5716  ;;  %v4365_v35 = vrot.slane %v4351_v33, %v11541_v1 }
 0x561   : > { %11698 = vst [vmem:[#allocation36_spill] sm:$0xff] %v9939_v27  ;;  %v5918_v36 = vcombine.low %v9924_v58, %v9941_v63  ;;  %v4349_v5 = vrot.slane %v4335_v11, %v11541_v1 }
 0x562   : > { %5637 = vrot.lane.b32.xlu0 %v5478_v29, %s6843_s8  ;;  %5653 = vrot.lane.b32.xlu1 %v5611_v42, %s6845_s9  ;;  %v11701_v29 = vld [vmem:[#allocation30_spill] sm:$0xff] }
 0x563   : > { %v9959_v44 = vrot.slane %v5918_v36, %v11541_v1  ;;  %v4295_v26 = vcombine.high %v11702_v43, %v11701_v29  ;;  %v5934_v36 = vcombine.low %v9953_v22, %v9944_v8  ;;  %v11705_v29 = vld [vmem:[#allocation53_spill] sm:$0xff]  ;;  %v4414_v33 = vcombine.low %v4349_v5, %v4365_v35 }
 0x564   : > { %v9965_v52 = vpop.permute.xlu0 %4908  ;;  %v9967_v0 = vpop.permute.xlu1 %5690  ;;  %v11706_v43 = vld [vmem:[#allocation57_spill] sm:$0xff] }
 0x565   : > { %11699 = vst [vmem:[#allocation51_spill] sm:$0xff] %v9965_v52  ;;  %11700 = vst [vmem:[#allocation21_spill] sm:$0xff] %v9967_v0  ;;  %v5966_v42 = vcombine.low %v9956_v30, %v9959_v44  ;;  %v4231_v25 = vcombine.high %v11706_v43, %v11705_v29  ;;  %v5607_v29 = vrot.slane %v5593_v47, %v11542_v48 }
 0x566   : > { %4439 = vrot.lane.b32.xlu0 %v4295_v26, %s6844_s7  ;;  %5657 = vrot.lane.b32.xlu1 %v5612_v12, %s6842_s16  ;;  %v5613_v26 = vcombine.high %v5568_v57, %v5600_v40  ;;  %v9998_v19 = vrot.slane %v5934_v36, %v11542_v48  ;;  %v4333_v43 = vrot.slane %v4319_v31, %v11541_v1 }
 0x567   : > { %v9986_v15 = vrot.slane %v5966_v42, %v11542_v48  ;;  %v4245_v3 = vrot.slane %v4231_v25, %v11542_v48  ;;  %v4317_v47 = vrot.slane %v4303_v20, %v11541_v1  ;;  %v4215_v40 = vcombine.high %v9013_v16, %v9017_v54  ;;  %v11712_v16 = vld [vmem:[#allocation11_spill] sm:$0xff]  ;;  %v11713_v54 = vld [vmem:[#allocation25_spill] sm:$0xff] }
 0x568   : > { %v9991_v18 = vpop.permute.xlu0 %4916  ;;  %v9993_v7 = vpop.permute.xlu1 %5698  ;;  %11710 = vst [vmem:[#allocation49_spill] sm:$0xff] %v9998_v19  ;;  %v5614_v36 = vcombine.low %v5575_v24, %v5607_v29  ;;  %v4199_v42 = vcombine.high %v8955_v41, %v8991_v14  ;;  %v4183_v12 = vcombine.high %v8900_v39, %v8968_v37  ;;  %v4167_v31 = vcombine.high %v11713_v54, %v11712_v16  ;;  %v11716_v54 = vld [vmem:[#allocation66_spill] sm:$0xff] }
 0x569   : > { %11707 = vst [vmem:[#allocation32_spill] sm:$0xff] %v9986_v15  ;;  %11708 = vst [vmem:[#allocation13_spill] sm:$0xff] %v9991_v18  ;;  %v4296_v57 = vcombine.low %v4245_v3, %v4277_v56  ;;  %v5750_v25 = vcombine.low %v9967_v0, %v9993_v7  ;;  %v4382_v11 = vcombine.low %v4317_v47, %v4333_v43  ;;  %v11719_v19 = vld [vmem:[#allocation22_spill] sm:$0xff]  ;;  %v11736_v0 = vld [vmem:[#allocation40_spill] sm:$0xff] }
 0x56a   : > { %11709 = vst [vmem:[#allocation17_spill] sm:$0xff] %v9993_v7  ;;  %5641 = vrot.lane.b32.xlu0 %v5479_v32, %s6847_s11  ;;  %5661 = vrot.lane.b32.xlu1 %v5613_v26, %s6846_s10  ;;  %v5766_v20 = vcombine.low %v9903_v60, %v9922_v23  ;;  %v10030_v32 = vrot.slane %v4215_v40, %v11541_v1  ;;  %v11718_v40 = vld [vmem:[#allocation55_spill] sm:$0xff]  ;;  %v11737_v7 = vld [vmem:[#allocation42_spill] sm:$0xff]  ;;  %v11738_v60 = vld [vmem:[#allocation48_spill] sm:$0xff] }
 0x56b   : > { %v4297_v37 = vcombine.high %v4245_v3, %v4277_v56  ;;  %v10037_v14 = vrot.slane %v4414_v33, %v11542_v48  ;;  %v4415_v26 = vcombine.high %v4349_v5, %v4365_v35  ;;  %v4399_v15 = vcombine.high %v11719_v19, %v11718_v40  ;;  %v11723_v19 = vld [vmem:[#allocation46_spill] sm:$0xff] }
 0x56c   : > { %v10011_v9 = vpop.permute.xlu0 %4924  ;;  %v10013_v62 = vpop.permute.xlu1 %5706  ;;  %v4213_v21 = vrot.slane %v4199_v42, %v11541_v1  ;;  %v10050_v56 = vrot.slane %v4183_v12, %v11541_v1  ;;  %v10054_v35 = vrot.slane %v4382_v11, %v11542_v48  ;;  %v4383_v5 = vcombine.high %v4317_v47, %v4333_v43  ;;  %v11724_v42 = vld [vmem:[#allocation24_spill] sm:$0xff] }
 0x56d   : > { %11711 = vst [vmem:[#allocation53_spill] sm:$0xff] %v10011_v9  ;;  %v10057_v3 = vrot.slane %v5734_v55, %v11541_v1  ;;  %v10060_v33 = vrot.slane %v5766_v20, %v11541_v1  ;;  %v4367_v12 = vcombine.high %v11724_v42, %v11723_v19  ;;  %v10076_v47 = vrot.slane %v4415_v26, %v11542_v48 }
 0x56e   : > { %4443 = vrot.lane.b32.xlu0 %v4296_v57, %s6841_s15  ;;  %5665 = vrot.lane.b32.xlu1 %v5614_v36, %s6843_s8  ;;  %v10040_v57 = vrot.slane %v5750_v25, %v11541_v1  ;;  %v11717_v36 = vld [vmem:[#allocation68_spill] sm:$0xff]  ;;  %v4435_v43 = vcombine.high %v10054_v35, %v10037_v14  ;;  %v4279_v55 = vcombine.high %v4213_v21, %v10030_v32 }
 0x56f   : > { %v4431_v61 = vcombine.high %v11717_v36, %v11716_v54  ;;  %11720 = vst [vmem:[#allocation25_spill] sm:$0xff] %v10057_v3  ;;  %11721 = vst [vmem:[#allocation55_spill] sm:$0xff] %v10060_v33  ;;  %v10086_v19 = vrot.slane %v4383_v5, %v11542_v48  ;;  %v4381_v26 = vrot.slane %v4367_v12, %v11542_v48 }
 0x570   : > { %v10032_v41 = vpop.permute.xlu0 %4898  ;;  %v10034_v39 = vpop.permute.xlu1 %5714  ;;  %11715 = vst [vmem:[#allocation11_spill] sm:$0xff] %v10040_v57 }
 0x571   : > { %11714 = vst [vmem:[#allocation57_spill] sm:$0xff] %v10032_v41  ;;  %v5782_v16 = vcombine.low %v10013_v62, %v10034_v39 }
 0x572   : > { %4447 = vrot.lane.b32.xlu0 %v4297_v37, %s6845_s9  ;;  %4467 = vrot.lane.b32.xlu1 %v4431_v61, %s6844_s7  ;;  %v4181_v37 = vrot.slane %v4167_v31, %v11541_v1  ;;  %v5798_v61 = vcombine.low %v10057_v3, %v10040_v57  ;;  %v4413_v31 = vrot.slane %v4399_v15, %v11542_v48 }
 0x573   : > { %v10063_v25 = vrot.slane %v5782_v16, %v11541_v1  ;;  %v5615_v16 = vcombine.high %v5575_v24, %v5607_v29  ;;  %v4436_v15 = vcombine.low %v10086_v19, %v10076_v47  ;;  %v4293_v29 = vrot.slane %v4279_v55, %v11542_v48 }
 0x574   : > { %v10069_v40 = vpop.permute.xlu0 %4906  ;;  %v10071_v11 = vpop.permute.xlu1 %4904  ;;  %v4247_v42 = vcombine.high %v4181_v37, %v10050_v56  ;;  %v4432_v24 = vcombine.low %v4381_v26, %v4413_v31  ;;  %v10102_v5 = vrot.slane %v5798_v61, %v11542_v48  ;;  %v4433_v28 = vcombine.high %v4381_v26, %v4413_v31  ;;  %v11739_v26 = vld [vmem:[#allocation50_spill] sm:$0xff] }
 0x575   : > { %11722 = vst [vmem:[#allocation22_spill] sm:$0xff] %v10063_v25  ;;  %11725 = vst [vmem:[#allocation46_spill] sm:$0xff] %v10069_v40  ;;  %v5830_v20 = vcombine.low %v10060_v33, %v10063_v25  ;;  %v4246_v31 = vcombine.low %v4181_v37, %v10050_v56  ;;  %v4434_v56 = vcombine.low %v10054_v35, %v10037_v14 }
 0x576   : > { %11726 = vst [vmem:[#allocation24_spill] sm:$0xff] %v10071_v11  ;;  %4483 = vrot.lane.b32.xlu0 %v4435_v43, %s6846_s10  ;;  %5669 = vrot.lane.b32.xlu1 %v5615_v16, %s6847_s11  ;;  %11730 = vst [vmem:[#allocation116_spill] sm:$0xff] %v10102_v5  ;;  %v4261_v12 = vrot.slane %v4247_v42, %v11542_v48  ;;  %v11732_v16 = vld [vmem:[#allocation47_spill] sm:$0xff]  ;;  %v3403_v43 = vcombine.high %v11738_v60, %v11737_v7 }
 0x577   : > { %v10092_v54 = vrot.slane %v5830_v20, %v11542_v48  ;;  %v11731_v20 = vld [vmem:[#allocation43_spill] sm:$0xff]  ;;  %v4254_v14 = vrot.slane %v4246_v31, %v11542_v48 }
 0x578   : > { %v10094_v36 = vpop.permute.xlu0 %4914  ;;  %v10096_v3 = vpop.permute.xlu1 %4912  ;;  %v3419_v57 = vcombine.high %v11732_v16, %v11731_v20  ;;  %v4300_v55 = vcombine.low %v4261_v12, %v4293_v29  ;;  %v11735_v42 = vld [vmem:[#allocation67_spill] sm:$0xff]  ;;  %v5082_v20 = vcombine.low %v9939_v27, %v9965_v52  ;;  %v5114_v16 = vcombine.low %v9991_v18, %v10011_v9 }
 0x579   : > { %11727 = vst [vmem:[#allocation113_spill] sm:$0xff] %v10092_v54  ;;  %11728 = vst [vmem:[#allocation114_spill] sm:$0xff] %v10094_v36  ;;  %v5098_v61 = vcombine.low %v10071_v11, %v10096_v3  ;;  %v11742_v11 = vld [vmem:[#allocation44_spill] sm:$0xff]  ;;  %v4301_v27 = vcombine.high %v4261_v12, %v4293_v29 }
 0x57a   : > { %11729 = vst [vmem:[#allocation115_spill] sm:$0xff] %v10096_v3  ;;  %4487 = vrot.lane.b32.xlu0 %v4436_v15, %s6843_s8  ;;  %4471 = vrot.lane.b32.xlu1 %v4432_v24, %s6841_s15  ;;  %v4278_v15 = vcombine.low %v4213_v21, %v10030_v32  ;;  %v3387_v24 = vcombine.high %v11736_v0, %v11735_v42  ;;  %v11740_v21 = vld [vmem:[#allocation69_spill] sm:$0xff]  ;;  %v11741_v42 = vld [vmem:[#allocation20_spill] sm:$0xff] }
 0x57b   : > { %v3371_v32 = vcombine.high %v11740_v21, %v11739_v26  ;;  %v3433_v0 = vrot.slane %v3419_v57, %v11541_v1  ;;  %v3467_v60 = vcombine.high %v11742_v11, %v11741_v42  ;;  %v10139_v52 = vrot.slane %v5098_v61, %v11541_v1  ;;  %v11746_v26 = vld [vmem:[#allocation38_spill] sm:$0xff]  ;;  %v11747_v11 = vld [vmem:[#allocation28_spill] sm:$0xff] }
 0x57c   : > { %v10111_v33 = vpop.permute.xlu0 %4922  ;;  %v10113_v25 = vpop.permute.xlu1 %4920  ;;  %v4286_v37 = vrot.slane %v4278_v15, %v11542_v48  ;;  %v3401_v57 = vrot.slane %v3387_v24, %v11541_v1  ;;  %v3435_v21 = vcombine.high %v11747_v11, %v11746_v26  ;;  %v3417_v42 = vrot.slane %v3403_v43, %v11541_v1  ;;  %v11752_v43 = vld [vmem:[#allocation58_spill] sm:$0xff] }
 0x57d   : > { %11733 = vst [vmem:[#allocation43_spill] sm:$0xff] %v10111_v33  ;;  %11734 = vst [vmem:[#allocation47_spill] sm:$0xff] %v10113_v25  ;;  %v10152_v29 = vrot.slane %v5082_v20, %v11541_v1  ;;  %v10155_v12 = vrot.slane %v5114_v16, %v11541_v1  ;;  %v3385_v35 = vrot.slane %v3371_v32, %v11541_v1 }
 0x57e   : > { %4459 = vrot.lane.b32.xlu0 %v4300_v55, %s6843_s8  ;;  %4475 = vrot.lane.b32.xlu1 %v4433_v28, %s6845_s9  ;;  %11745 = vst [vmem:[#allocation42_spill] sm:$0xff] %v10139_v52  ;;  %v3482_v15 = vcombine.low %v3417_v42, %v3433_v0  ;;  %v3481_v20 = vrot.slane %v3467_v60, %v11542_v48 }
 0x57f   : > { %11748 = vst [vmem:[#allocation48_spill] sm:$0xff] %v10152_v29  ;;  %11749 = vst [vmem:[#allocation50_spill] sm:$0xff] %v10155_v12  ;;  %v5146_v16 = vcombine.low %v10152_v29, %v10139_v52  ;;  %v3450_v31 = vcombine.low %v3385_v35, %v3401_v57  ;;  %v3449_v32 = vrot.slane %v3435_v21, %v11542_v48 }
 0x580   : > { %v10134_v7 = vpop.permute.xlu0 %4510  ;;  %v10136_v55 = vpop.permute.xlu1 %4928  ;;  %v3483_v60 = vcombine.high %v3417_v42, %v3433_v0 }
 0x581   : > { %11743 = vst [vmem:[#allocation67_spill] sm:$0xff] %v10134_v7  ;;  %11744 = vst [vmem:[#allocation40_spill] sm:$0xff] %v10136_v55  ;;  %v5130_v28 = vcombine.low %v10113_v25, %v10136_v55  ;;  %v3501_v9 = vcombine.high %v3449_v32, %v3481_v20  ;;  %v3490_v25 = vrot.slane %v3482_v15, %v11542_v48 }
 0x582   : > { %4463 = vrot.lane.b32.xlu0 %v4301_v27, %s6847_s11  ;;  %4479 = vrot.lane.b32.xlu1 %v4434_v56, %s6842_s16  ;;  %v11753_v27 = vld [vmem:[#allocation52_spill] sm:$0xff]  ;;  %v4298_v56 = vcombine.low %v4254_v14, %v4286_v37  ;;  %v3458_v21 = vrot.slane %v3450_v31, %v11542_v48  ;;  %v3497_v15 = vrot.slane %v3483_v60, %v11542_v48 }
 0x583   : > { %v10158_v61 = vrot.slane %v5130_v28, %v11541_v1  ;;  %v3499_v26 = vcombine.high %v11753_v27, %v11752_v43  ;;  %v4299_v43 = vcombine.high %v4254_v14, %v4286_v37  ;;  %v10186_v27 = vrot.slane %v5146_v16, %v11542_v48  ;;  %v11761_v14 = vld [vmem:[#allocation71_spill] sm:$0xff] }
 0x584   : > { %v10163_v24 = vpop.permute.xlu0 %4518  ;;  %v10172_v11 = vpop.permute.xlu1 %4902  ;;  %v4437_v37 = vcombine.high %v10086_v19, %v10076_v47  ;;  %v4946_v16 = vcombine.low %v10032_v41, %v10069_v40  ;;  %v4978_v31 = vcombine.low %v10094_v36, %v10111_v33  ;;  %v3500_v0 = vcombine.low %v3449_v32, %v3481_v20  ;;  %v11772_v33 = vld [vmem:[#allocation61_spill] sm:$0xff] }
 0x585   : > { %11750 = vst [vmem:[#allocation69_spill] sm:$0xff] %v10158_v61  ;;  %11751 = vst [vmem:[#allocation20_spill] sm:$0xff] %v10163_v24  ;;  %v5178_v28 = vcombine.low %v10155_v12, %v10158_v61 }
 0x586   : > { %11754 = vst [vmem:[#allocation44_spill] sm:$0xff] %v10172_v11  ;;  %3643 = vrot.lane.b32.xlu0 %v3499_v26, %s6844_s7  ;;  %4451 = vrot.lane.b32.xlu1 %v4298_v56, %s6842_s16  ;;  %11758 = vst [vmem:[#allocation118_spill] sm:$0xff] %v10186_v27  ;;  %v3451_v26 = vcombine.high %v3385_v35, %v3401_v57  ;;  %v11762_v35 = vld [vmem:[#allocation75_spill] sm:$0xff]  ;;  %v10228_v20 = vrot.slane %v4946_v16, %v11541_v1  ;;  %v11777_v16 = vld [vmem:[#allocation60_spill] sm:$0xff] }
 0x587   : > { %v10178_v3 = vrot.slane %v5178_v28, %v11542_v48  ;;  %v3503_v28 = vcombine.high %v3458_v21, %v3490_v25 }
 0x588   : > { %v10180_v18 = vpop.permute.xlu0 %4526  ;;  %v10183_v55 = vpop.permute.xlu1 %4910  ;;  %v3465_v57 = vrot.slane %v3451_v26, %v11542_v48 }
 0x589   : > { %11755 = vst [vmem:[#allocation38_spill] sm:$0xff] %v10178_v3  ;;  %11756 = vst [vmem:[#allocation28_spill] sm:$0xff] %v10180_v18 }
 0x58a   : > { %11757 = vst [vmem:[#allocation117_spill] sm:$0xff] %v10183_v55  ;;  %3651 = vrot.lane.b32.xlu0 %v3501_v9, %s6845_s9  ;;  %4455 = vrot.lane.b32.xlu1 %v4299_v43, %s6846_s10  ;;  %v4962_v9 = vcombine.low %v10172_v11, %v10183_v55  ;;  %v3872_v43 = vcombine.low %v11762_v35, %v11761_v14  ;;  %v11765_v11 = vld [vmem:[#allocation15_spill] sm:$0xff]  ;;  %v11767_v14 = vld [vmem:[#allocation82_spill] sm:$0xff]  ;;  %v11768_v35 = vld [vmem:[#allocation76_spill] sm:$0xff] }
 0x58b   : > { %v3505_v47 = vcombine.high %v3465_v57, %v3497_v15  ;;  %v3555_v41 = vcombine.high %v11768_v35, %v11767_v14  ;;  %v11773_v14 = vld [vmem:[#allocation59_spill] sm:$0xff] }
 0x58c   : > { %v10193_v42 = vpop.permute.xlu0 %4534  ;;  %v10196_v56 = vpop.permute.xlu1 %4918  ;;  %v10218_v55 = vrot.slane %v4962_v9, %v11541_v1  ;;  %v3880_v40 = vrot.slane %v3872_v43, %v11542_v48  ;;  %v3523_v35 = vcombine.high %v11773_v14, %v11772_v33  ;;  %v11779_v33 = vld [vmem:[#allocation72_spill] sm:$0xff]  ;;  %v11780_v14 = vld [vmem:[#allocation10_spill] sm:$0xff] }
 0x58d   : > { %11759 = vst [vmem:[#allocation119_spill] sm:$0xff] %v10193_v42  ;;  %11760 = vst [vmem:[#allocation120_spill] sm:$0xff] %v10196_v56 }
 0x58e   : > { %3659 = vrot.lane.b32.xlu0 %v3503_v28, %s6846_s10  ;;  %4491 = vrot.lane.b32.xlu1 %v4437_v37, %s6847_s11  ;;  %v11764_v28 = vld [vmem:[#allocation73_spill] sm:$0xff]  ;;  %11766 = vst [vmem:[#allocation75_spill] sm:$0xff] %v10218_v55 }
 0x58f   : > { %v3840_v26 = vcombine.low %v11765_v11, %v11764_v28  ;;  %11769 = vst [vmem:[#allocation73_spill] sm:$0xff] %v10228_v20  ;;  %v10231_v11 = vrot.slane %v4978_v31, %v11541_v1  ;;  %v11770_v28 = vld [vmem:[#allocation77_spill] sm:$0xff]  ;;  %v3502_v31 = vcombine.low %v3458_v21, %v3490_v25  ;;  %v11783_v25 = vld [vmem:[#allocation86_spill] sm:$0xff] }
 0x590   : > { %v10211_v60 = vpop.permute.xlu0 %4508  ;;  %v10213_v19 = vpop.permute.xlu1 %4926  ;;  %v11784_v21 = vld [vmem:[#allocation85_spill] sm:$0xff] }
 0x591   : > { %11763 = vst [vmem:[#allocation71_spill] sm:$0xff] %v10213_v19  ;;  %v4994_v37 = vcombine.low %v10196_v56, %v10213_v19  ;;  %v11775_v56 = vld [vmem:[#allocation74_spill] sm:$0xff]  ;;  %v11776_v19 = vld [vmem:[#allocation79_spill] sm:$0xff] }
 0x592   : > { %3667 = vrot.lane.b32.xlu0 %v3505_v47, %s6847_s11  ;;  %3647 = vrot.lane.b32.xlu1 %v3500_v0, %s6841_s15  ;;  %v11771_v47 = vld [vmem:[#allocation80_spill] sm:$0xff]  ;;  %v11774_v0 = vld [vmem:[#allocation70_spill] sm:$0xff]  ;;  %v3539_v29 = vcombine.high %v11777_v16, %v11776_v19  ;;  %v3569_v19 = vrot.slane %v3555_v41, %v11541_v1  ;;  %v3603_v16 = vcombine.high %v11784_v21, %v11783_v25 }
 0x593   : > { %v10234_v32 = vrot.slane %v4994_v37, %v11541_v1  ;;  %v3889_v36 = vcombine.high %v11771_v47, %v11770_v28  ;;  %v3857_v43 = vcombine.high %v11775_v56, %v11774_v0  ;;  %v5010_v37 = vcombine.low %v10228_v20, %v10218_v55  ;;  %v11781_v56 = vld [vmem:[#allocation54_spill] sm:$0xff] }
 0x594   : > { %v10236_v9 = vpop.permute.xlu0 %4516  ;;  %v10246_v52 = vpop.permute.xlu1 %4514  ;;  %v3848_v28 = vrot.slane %v3840_v26, %v11542_v48  ;;  %v3825_v47 = vcombine.high %v11780_v14, %v11779_v33  ;;  %v11782_v0 = vld [vmem:[#allocation18_spill] sm:$0xff]  ;;  %v3537_v26 = vrot.slane %v3523_v35, %v11541_v1  ;;  %v3553_v33 = vrot.slane %v3539_v29, %v11541_v1 }
 0x595   : > { %11778 = vst [vmem:[#allocation15_spill] sm:$0xff] %v10246_v52  ;;  %v5042_v12 = vcombine.low %v10231_v11, %v10234_v32  ;;  %v3507_v61 = vcombine.high %v11782_v0, %v11781_v56  ;;  %v3504_v56 = vcombine.low %v3465_v57, %v3497_v15  ;;  %v3871_v41 = vrot.slane %v3857_v43, %v11542_v48  ;;  %v11786_v0 = vld [vmem:[#allocation83_spill] sm:$0xff] }
 0x596   : > { %4033 = vrot.lane.b32.xlu0 %v3889_v36, %s6844_s7  ;;  %3655 = vrot.lane.b32.xlu1 %v3502_v31, %s6842_s16  ;;  %v3892_v3 = vcombine.low %v3848_v28, %v3880_v40  ;;  %v11787_v31 = vld [vmem:[#allocation84_spill] sm:$0xff]  ;;  %v10276_v25 = vrot.slane %v5010_v37, %v11542_v48  ;;  %v3618_v21 = vcombine.low %v3553_v33, %v3569_v19 }
 0x597   : > { %v10265_v36 = vrot.slane %v5042_v12, %v11542_v48  ;;  %v3571_v20 = vcombine.high %v11787_v31, %v11786_v0  ;;  %v3521_v12 = vrot.slane %v3507_v61, %v11541_v1  ;;  %v3839_v29 = vrot.slane %v3825_v47, %v11542_v48 }
 0x598   : > { %v10262_v27 = vpop.permute.xlu0 %4524  ;;  %v10269_v14 = vpop.permute.xlu1 %4522  ;;  %v3893_v15 = vcombine.high %v3848_v28, %v3880_v40  ;;  %v3617_v57 = vrot.slane %v3603_v16, %v11542_v48  ;;  %v3619_v47 = vcombine.high %v3553_v33, %v3569_v19  ;;  %v3626_v40 = vrot.slane %v3618_v21, %v11542_v48 }
 0x599   : > { %11785 = vst [vmem:[#allocation82_spill] sm:$0xff] %v10269_v14  ;;  %v3586_v0 = vcombine.low %v3521_v12, %v3537_v26  ;;  %v3890_v37 = vcombine.low %v3839_v29, %v3871_v41  ;;  %v4708_v61 = vcombine.low %v10246_v52, %v10269_v14  ;;  %v4692_v28 = vcombine.low %v10134_v7, %v10163_v24  ;;  %v11799_v24 = vld [vmem:[#allocation26_spill] sm:$0xff] }
 0x59a   : > { %4045 = vrot.lane.b32.xlu0 %v3892_v3, %s6842_s16  ;;  %3663 = vrot.lane.b32.xlu1 %v3504_v56, %s6843_s8  ;;  %v3585_v56 = vrot.slane %v3571_v20, %v11542_v48  ;;  %v4724_v16 = vcombine.low %v10180_v18, %v10193_v42  ;;  %v3891_v52 = vcombine.high %v3839_v29, %v3871_v41  ;;  %v11803_v42 = vld [vmem:[#allocation88_spill] sm:$0xff] }
 0x59b   : > { %v3587_v20 = vcombine.high %v3521_v12, %v3537_v26  ;;  %v10304_v19 = vrot.slane %v4708_v61, %v11541_v1  ;;  %v10314_v41 = vrot.slane %v4692_v28, %v11541_v1 }
 0x59c   : > { %v10281_v35 = vpop.permute.xlu0 %4532  ;;  %v10286_v3 = vpop.permute.xlu1 %4530  ;;  %v3636_v43 = vcombine.low %v3585_v56, %v3617_v57  ;;  %v10317_v26 = vrot.slane %v4724_v16, %v11541_v1 }
 0x59d   : > { %11788 = vst [vmem:[#allocation76_spill] sm:$0xff] %v10286_v3  ;;  %11791 = vst [vmem:[#allocation70_spill] sm:$0xff] %v10304_v19  ;;  %v3601_v16 = vrot.slane %v3587_v20, %v11542_v48  ;;  %v11805_v20 = vld [vmem:[#allocation95_spill] sm:$0xff] }
 0x59e   : > { %4049 = vrot.lane.b32.xlu0 %v3893_v15, %s6846_s10  ;;  %4037 = vrot.lane.b32.xlu1 %v3890_v37, %s6841_s15  ;;  %v3594_v15 = vrot.slane %v3586_v0, %v11542_v48  ;;  %v3633_v37 = vrot.slane %v3619_v47, %v11542_v48  ;;  %11793 = vst [vmem:[#allocation74_spill] sm:$0xff] %v10314_v41  ;;  %11794 = vst [vmem:[#allocation79_spill] sm:$0xff] %v10317_v26  ;;  %v11797_v0 = vld [vmem:[#allocation81_spill] sm:$0xff]  ;;  %v11798_v47 = vld [vmem:[#allocation94_spill] sm:$0xff] }
 0x59f   : > { %v3961_v14 = vcombine.high %v11799_v24, %v11798_v47 }
 0x5a0   : > { %v10298_v31 = vpop.permute.xlu0 %3237  ;;  %v10300_v55 = vpop.permute.xlu1 %4538  ;;  %v3638_v21 = vcombine.low %v3594_v15, %v3626_v40 }
 0x5a1   : > { %11789 = vst [vmem:[#allocation61_spill] sm:$0xff] %v10298_v31  ;;  %11790 = vst [vmem:[#allocation59_spill] sm:$0xff] %v10300_v55  ;;  %v4740_v33 = vcombine.low %v10286_v3, %v10300_v55  ;;  %v11792_v31 = vld [vmem:[#allocation96_spill] sm:$0xff]  ;;  %v11806_v55 = vld [vmem:[#allocation31_spill] sm:$0xff] }
 0x5a2   : > { %3675 = vrot.lane.b32.xlu0 %v3636_v43, %s6841_s15  ;;  %4041 = vrot.lane.b32.xlu1 %v3891_v52, %s6845_s9  ;;  %v3993_v7 = vcombine.high %v11792_v31, %v9683_v53  ;;  %v11796_v52 = vld [vmem:[#allocation78_spill] sm:$0xff]  ;;  %v4756_v53 = vcombine.low %v10314_v41, %v10304_v19 }
 0x5a3   : > { %v10320_v12 = vrot.slane %v4740_v33, %v11541_v1  ;;  %v3894_v61 = vcombine.low %v11797_v0, %v11796_v52  ;;  %v11800_v31 = vld [vmem:[#allocation98_spill] sm:$0xff]  ;;  %v11801_v33 = vld [vmem:[#allocation97_spill] sm:$0xff]  ;;  %v3640_v52 = vcombine.low %v3601_v16, %v3633_v37 }
 0x5a4   : > { %v10322_v29 = vpop.permute.xlu0 %3245  ;;  %v10324_v43 = vpop.permute.xlu1 %4512  ;;  %v10342_v24 = vrot.slane %v3993_v7, %v11542_v48 }
 0x5a5   : > { %11795 = vst [vmem:[#allocation60_spill] sm:$0xff] %v10322_v29  ;;  %v4788_v28 = vcombine.low %v10317_v26, %v10320_v12  ;;  %v4008_v29 = vcombine.low %v11801_v33, %v11800_v31  ;;  %v3975_v31 = vrot.slane %v3961_v14, %v11542_v48  ;;  %v10356_v33 = vrot.slane %v4756_v53, %v11542_v48 }
 0x5a6   : > { %3683 = vrot.lane.b32.xlu0 %v3638_v21, %s6842_s16  ;;  %4053 = vrot.lane.b32.xlu1 %v3894_v61, %s6843_s8  ;;  %v11804_v21 = vld [vmem:[#allocation90_spill] sm:$0xff]  ;;  %v3976_v61 = vcombine.low %v11806_v55, %v11805_v20  ;;  %v6357_v53 = vcombine.high %v9767_v45, %v9770_v10  ;;  %v4588_v20 = vcombine.low %v10262_v27, %v10281_v35 }
 0x5a7   : > { %v10345_v47 = vrot.slane %v4788_v28, %v11542_v48  ;;  %v3635_v3 = vcombine.high %v11804_v21, %v11803_v42  ;;  %v4027_v28 = vcombine.high %v3975_v31, %v10342_v24  ;;  %v11809_v42 = vld [vmem:[#allocation29_spill] sm:$0xff]  ;;  %v11822_v21 = vld [vmem:[#allocation100_spill] sm:$0xff] }
 0x5a8   : > { %v10339_v18 = vpop.permute.xlu0 %3253  ;;  %v10347_v0 = vpop.permute.xlu1 %4520 }
 0x5a9   : > { %11802 = vst [vmem:[#allocation72_spill] sm:$0xff] %v10339_v18  ;;  %v10363_v18 = vrot.slane %v4008_v29, %v11542_v48  ;;  %v4572_v14 = vcombine.low %v10324_v43, %v10347_v0  ;;  %v4556_v29 = vcombine.low %v10211_v60, %v10236_v9 }
 0x5aa   : > { %3691 = vrot.lane.b32.xlu0 %v3640_v52, %s6843_s8  ;;  %3671 = vrot.lane.b32.xlu1 %v3635_v3, %s6844_s7  ;;  %v3637_v52 = vcombine.high %v3585_v56, %v3617_v57  ;;  %v10373_v3 = vrot.slane %v3976_v61, %v11542_v48  ;;  %v3639_v61 = vcombine.high %v3594_v15, %v3626_v40 }
 0x5ab   : > { %v10391_v10 = vrot.slane %v4572_v14, %v11541_v1  ;;  %v6221_v40 = vcombine.high %v9870_v4, %v9873_v2 }
 0x5ac   : > { %v10359_v7 = vpop.permute.xlu0 %3261  ;;  %v10367_v55 = vpop.permute.xlu1 %4528  ;;  %v4028_v56 = vcombine.low %v10373_v3, %v10363_v18 }
 0x5ad   : > { %11807 = vst [vmem:[#allocation10_spill] sm:$0xff] %v10359_v7  ;;  %v6325_v7 = vcombine.high %v11809_v42, %v9755_v34  ;;  %v10405_v34 = vrot.slane %v4556_v29, %v11541_v1  ;;  %v10408_v42 = vrot.slane %v4588_v20, %v11541_v1 }
 0x5ae   : > { %4069 = vrot.lane.b32.xlu0 %v4027_v28, %s6845_s9  ;;  %3679 = vrot.lane.b32.xlu1 %v3637_v52, %s6845_s9  ;;  %v6389_v52 = vcombine.high %v9813_v17, %v9797_v13  ;;  %v11819_v17 = vld [vmem:[#allocation92_spill] sm:$0xff] }
 0x5af   : > { %v4620_v4 = vcombine.low %v10405_v34, %v10391_v10  ;;  %v10425_v29 = vrot.slane %v6325_v7, %v11542_v48 }
 0x5b0   : > { %v10382_v57 = vpop.permute.xlu0 %3269  ;;  %v10386_v28 = vpop.permute.xlu1 %4536 }
 0x5b1   : > { %11808 = vst [vmem:[#allocation54_spill] sm:$0xff] %v10382_v57  ;;  %v4604_v45 = vcombine.low %v10367_v55, %v10386_v28  ;;  %v10400_v57 = vrot.slane %v6357_v53, %v11542_v48  ;;  %v6189_v53 = vcombine.high %v9867_v59, %v9861_v51  ;;  %v6235_v59 = vrot.slane %v6221_v40, %v11542_v48 }
 0x5b2   : > { %4073 = vrot.lane.b32.xlu0 %v4028_v56, %s6842_s16  ;;  %3687 = vrot.lane.b32.xlu1 %v3639_v61, %s6846_s10  ;;  %v3641_v61 = vcombine.high %v3601_v16, %v3633_v37 }
 0x5b3   : > { %v10411_v15 = vrot.slane %v4604_v45, %v11541_v1  ;;  %v6390_v37 = vcombine.low %v10425_v29, %v10400_v57  ;;  %v11814_v45 = vld [vmem:[#allocation23_spill] sm:$0xff]  ;;  %v6203_v7 = vrot.slane %v6189_v53, %v11542_v48 }
 0x5b4   : > { %v10413_v14 = vpop.permute.xlu0 %3277  ;;  %v10415_v56 = vpop.permute.xlu1 %3241 }
 0x5b5   : > { %11810 = vst [vmem:[#allocation18_spill] sm:$0xff] %v10413_v14  ;;  %11811 = vst [vmem:[#allocation86_spill] sm:$0xff] %v10415_v56  ;;  %v4652_v2 = vcombine.low %v10408_v42, %v10411_v15  ;;  %v11815_v14 = vld [vmem:[#allocation103_spill] sm:$0xff]  ;;  %v11817_v56 = vld [vmem:[#allocation106_spill] sm:$0xff] }
 0x5b6   : > { %6425 = vrot.lane.b32.xlu0 %v6389_v52, %s6844_s7  ;;  %3695 = vrot.lane.b32.xlu1 %v3641_v61, %s6847_s11  ;;  %v4025_v52 = vcombine.high %v11815_v14, %v11814_v45  ;;  %v10443_v61 = vrot.slane %v4620_v4, %v11542_v48  ;;  %v11820_v45 = vld [vmem:[#allocation91_spill] sm:$0xff]  ;;  %v4026_v4 = vcombine.low %v3975_v31, %v10342_v24 }
 0x5b7   : > { %v10434_v51 = vrot.slane %v4652_v2, %v11542_v48  ;;  %v6254_v2 = vcombine.low %v6203_v7, %v6235_v59  ;;  %v6293_v14 = vcombine.high %v11820_v45, %v11819_v17  ;;  %v5919_v17 = vcombine.high %v9924_v58, %v9941_v63 }
 0x5b8   : > { %v10428_v20 = vpop.permute.xlu0 %3285  ;;  %v10436_v16 = vpop.permute.xlu1 %3249  ;;  %v5863_v24 = vcombine.high %v10102_v5, %v10092_v54  ;;  %v5903_v58 = vcombine.high %v9801_v49, %v9834_v6  ;;  %v6255_v6 = vcombine.high %v6203_v7, %v6235_v59  ;;  %v11841_v54 = vld [vmem:[#allocation110_spill] sm:$0xff] }
 0x5b9   : > { %11812 = vst [vmem:[#allocation85_spill] sm:$0xff] %v10428_v20  ;;  %11813 = vst [vmem:[#allocation83_spill] sm:$0xff] %v10436_v16  ;;  %v11816_v20 = vld [vmem:[#allocation108_spill] sm:$0xff]  ;;  %v6307_v31 = vrot.slane %v6293_v14, %v11541_v1  ;;  %v11836_v16 = vld [vmem:[#allocation17_spill] sm:$0xff] }
 0x5ba   : > { %6429 = vrot.lane.b32.xlu0 %v6390_v37, %s6841_s15  ;;  %v6309_v13 = vcombine.high %v11817_v56, %v11816_v20  ;;  %4061 = vrot.lane.b32.xlu1 %v4025_v52, %s6844_s7  ;;  %v11821_v37 = vld [vmem:[#allocation102_spill] sm:$0xff]  ;;  %v11824_v56 = vld [vmem:[#allocation89_spill] sm:$0xff]  ;;  %v11825_v20 = vld [vmem:[#allocation87_spill] sm:$0xff] }
 0x5bb   : > { %v6277_v53 = vcombine.high %v11822_v21, %v11821_v37  ;;  %v6261_v52 = vcombine.high %v11825_v20, %v11824_v56  ;;  %v5967_v21 = vcombine.high %v9956_v30, %v9959_v44  ;;  %v4029_v37 = vcombine.high %v10373_v3, %v10363_v18 }
 0x5bc   : > { %v10448_v40 = vpop.permute.xlu0 %5645  ;;  %v10456_v41 = vpop.permute.xlu1 %3257  ;;  %v5887_v30 = vcombine.high %v9881_v50, %v9905_v38  ;;  %v5935_v44 = vcombine.high %v9953_v22, %v9944_v8  ;;  %v10495_v3 = vrot.slane %v5919_v17, %v11541_v1  ;;  %v11830_v22 = vld [vmem:[#allocation14_spill] sm:$0xff]  ;;  %v10506_v20 = vrot.slane %v5903_v58, %v11541_v1 }
 0x5bd   : > { %11818 = vst [vmem:[#allocation84_spill] sm:$0xff] %v10448_v40  ;;  %11823 = vst [vmem:[#allocation96_spill] sm:$0xff] %v10456_v41  ;;  %v10463_v40 = vrot.slane %v6309_v13, %v11541_v1  ;;  %v6275_v63 = vrot.slane %v6261_v52, %v11541_v1  ;;  %v10498_v50 = vrot.slane %v5967_v21, %v11542_v48 }
 0x5be   : > { %6401 = vrot.lane.b32.xlu0 %v6254_v2, %s6841_s15  ;;  %4065 = vrot.lane.b32.xlu1 %v4026_v4, %s6841_s15  ;;  %v10476_v2 = vrot.slane %v6277_v53, %v11541_v1  ;;  %v11828_v53 = vld [vmem:[#allocation107_spill] sm:$0xff]  ;;  %v11831_v4 = vld [vmem:[#allocation104_spill] sm:$0xff]  ;;  %v10513_v59 = vrot.slane %v5935_v44, %v11542_v48  ;;  %v5982_v17 = vcombine.low %v10506_v20, %v10495_v3  ;;  %v11834_v44 = vld [vmem:[#allocation41_spill] sm:$0xff] }
 0x5bf   : > { %v6372_v14 = vcombine.low %v6307_v31, %v10463_v40  ;;  %v5871_v18 = vcombine.high %v11828_v53, %v9776_v46  ;;  %v4030_v56 = vcombine.low %v11831_v4, %v11830_v22  ;;  %v10509_v46 = vrot.slane %v5887_v30, %v11541_v1  ;;  %v11833_v30 = vld [vmem:[#allocation16_spill] sm:$0xff]  ;;  %v11848_v22 = vld [vmem:[#allocation109_spill] sm:$0xff] }
 0x5c0   : > { %v10470_v45 = vpop.permute.xlu0 %5649  ;;  %v10478_v13 = vpop.permute.xlu1 %3265  ;;  %v6340_v38 = vcombine.low %v6275_v63, %v10476_v2  ;;  %v5783_v21 = vcombine.high %v10013_v62, %v10034_v39  ;;  %v6253_v53 = vcombine.high %v11834_v44, %v11833_v30  ;;  %v11837_v62 = vld [vmem:[#allocation21_spill] sm:$0xff]  ;;  %v6373_v41 = vcombine.high %v6307_v31, %v10463_v40  ;;  %v11845_v30 = vld [vmem:[#allocation32_spill] sm:$0xff] }
 0x5c1   : > { %11826 = vst [vmem:[#allocation94_spill] sm:$0xff] %v10470_v45  ;;  %11827 = vst [vmem:[#allocation26_spill] sm:$0xff] %v10478_v13  ;;  %v10517_v7 = vrot.slane %v6372_v14, %v11542_v48  ;;  %v10520_v52 = vrot.slane %v5871_v18, %v11541_v1  ;;  %v5751_v39 = vcombine.high %v11837_v62, %v11836_v16  ;;  %v11840_v45 = vld [vmem:[#allocation112_spill] sm:$0xff]  ;;  %v11842_v31 = vld [vmem:[#allocation105_spill] sm:$0xff] }
 0x5c2   : > { %6007 = vrot.lane.b32.xlu0 %v5863_v24, %s6844_s7  ;;  %4077 = vrot.lane.b32.xlu1 %v4029_v37, %s6846_s10  ;;  %v6001_v37 = vcombine.high %v10513_v59, %v10498_v50  ;;  %v10533_v14 = vrot.slane %v6340_v38, %v11542_v48  ;;  %v11838_v38 = vld [vmem:[#allocation111_spill] sm:$0xff]  ;;  %v5735_v5 = vcombine.high %v11841_v54, %v11840_v45  ;;  %v11846_v44 = vld [vmem:[#allocation49_spill] sm:$0xff] }
 0x5c3   : > { %v5950_v18 = vcombine.low %v10520_v52, %v10509_v46  ;;  %v10554_v16 = vrot.slane %v5982_v17, %v11542_v48  ;;  %v6341_v40 = vcombine.high %v6275_v63, %v10476_v2  ;;  %v11849_v63 = vld [vmem:[#allocation99_spill] sm:$0xff]  ;;  %v11850_v17 = vld [vmem:[#allocation93_spill] sm:$0xff] }
 0x5c4   : > { %v5622_v49 = vpop.permute.xlu0 %5621  ;;  %v10501_v8 = vpop.permute.xlu1 %3273 }
 0x5c5   : > { %11829 = vst [vmem:[#allocation98_spill] sm:$0xff] %v10501_v8  ;;  %v11839_v8 = vld [vmem:[#allocation62_spill] sm:$0xff]  ;;  %v10573_v2 = vrot.slane %v5950_v18, %v11542_v48 }
 0x5c6   : > { %6405 = vrot.lane.b32.xlu0 %v6255_v6, %s6845_s9  ;;  %4081 = vrot.lane.b32.xlu1 %v4030_v56, %s6843_s8  ;;  %v11835_v6 = vld [vmem:[#allocation19_spill] sm:$0xff]  ;;  %v6173_v13 = vcombine.high %v11839_v8, %v11838_v38  ;;  %v5999_v8 = vcombine.high %v11846_v44, %v11845_v30  ;;  %v11847_v38 = vld [vmem:[#allocation37_spill] sm:$0xff] }
 0x5c7   : > { %v5767_v56 = vcombine.high %v11835_v6, %v9922_v23  ;;  %v10551_v23 = vrot.slane %v5783_v21, %v11541_v1  ;;  %v6141_v54 = vcombine.high %v11848_v22, %v11847_v38  ;;  %v10569_v21 = vrot.slane %v5751_v39, %v11541_v1 }
 0x5c8   : > { %v5626_v24 = vpop.permute.xlu0 %5625  ;;  %v10528_v58 = vpop.permute.xlu1 %3281  ;;  %v6187_v22 = vrot.slane %v6173_v13, %v11541_v1  ;;  %v6002_v18 = vcombine.low %v10573_v2, %v10554_v16 }
 0x5c9   : > { %11832 = vst [vmem:[#allocation97_spill] sm:$0xff] %v10528_v58  ;;  %v6393_v58 = vcombine.high %v10533_v14, %v10517_v7  ;;  %v10566_v45 = vrot.slane %v5767_v56, %v11541_v1  ;;  %v10583_v56 = vrot.slane %v5735_v5, %v11541_v1  ;;  %v6155_v13 = vrot.slane %v6141_v54, %v11541_v1 }
 0x5ca   : > { %6043 = vrot.lane.b32.xlu0 %v6001_v37, %s6845_s9  ;;  %6397 = vrot.lane.b32.xlu1 %v6253_v53, %s6844_s7  ;;  %v11843_v37 = vld [vmem:[#allocation101_spill] sm:$0xff] }
 0x5cb   : > { %v6157_v53 = vcombine.high %v11843_v37, %v11842_v31  ;;  %v6125_v31 = vcombine.high %v11850_v17, %v11849_v63  ;;  %v10579_v37 = vrot.slane %v6373_v41, %v11542_v48  ;;  %v5846_v39 = vcombine.low %v10566_v45, %v10551_v23  ;;  %v11851_v17 = vld [vmem:[#allocation45_spill] sm:$0xff] }
 0x5cc   : > { %v5630_v6 = vpop.permute.xlu0 %5629  ;;  %v10559_v62 = vpop.permute.xlu1 %3289  ;;  %v6391_v63 = vcombine.high %v10425_v29, %v10400_v57  ;;  %v5814_v5 = vcombine.low %v10583_v56, %v10569_v21 }
 0x5cd   : > { %11844 = vst [vmem:[#allocation95_spill] sm:$0xff] %v10559_v62  ;;  %v6171_v41 = vrot.slane %v6157_v53, %v11541_v1  ;;  %v11852_v62 = vld [vmem:[#allocation63_spill] sm:$0xff]  ;;  %v6139_v4 = vrot.slane %v6125_v31, %v11541_v1  ;;  %v5854_v19 = vrot.slane %v5846_v39, %v11542_v48  ;;  %v6000_v31 = vcombine.low %v10513_v59, %v10498_v50 }
 0x5ce   : > { %6441 = vrot.lane.b32.xlu0 %v6393_v58, %s6846_s10  ;;  %6035 = vrot.lane.b32.xlu1 %v5999_v8, %s6844_s7  ;;  %v10592_v8 = vrot.slane %v6341_v40, %v11542_v48  ;;  %v11853_v30 = vcombine.low %v11851_v17, %v11852_v62  ;;  %v11854_v62 = vld [vmem:[#allocation22_spill] sm:$0xff]  ;;  %v11855_v17 = vld [vmem:[#allocation55_spill] sm:$0xff]  ;;  %v6392_v59 = vcombine.low %v10533_v14, %v10517_v7 }
 0x5cf   : > { %v6237_v29 = vcombine.high %v6171_v41, %v6187_v22 }
 0x5d0   : > { %v5634_v58 = vpop.permute.xlu0 %5633  ;;  %v5618_v38 = vpop.permute.xlu1 %5617  ;;  %v6394_v54 = vcombine.low %v10592_v8, %v10579_v37 }
 0x5d1   : > { %v5672_v44 = vsel %vm510_vm5, %v11853_v30, %v5618_v38  ;;  %v5831_v30 = vcombine.high %v11855_v17, %v11854_v62  ;;  %v6251_v62 = vrot.slane %v6237_v29, %v11542_v48  ;;  %v6236_v17 = vcombine.low %v6171_v41, %v6187_v22 }
 0x5d2   : > { %6047 = vrot.lane.b32.xlu0 %v6002_v18, %s6842_s16  ;;  %v5673_v57 = vsel %vm512_vm6, %v5672_v44, %v5622_v49  ;;  %6433 = vrot.lane.b32.xlu1 %v6391_v63, %s6845_s9  ;;  %v6205_v49 = vcombine.high %v6139_v4, %v6155_v13  ;;  %v11857_v18 = vld [vmem:[#allocation11_spill] sm:$0xff]  ;;  %v11858_v63 = vld [vmem:[#allocation25_spill] sm:$0xff] }
 0x5d3   : > { %v5674_v40 = vsel %vm514_vm7, %v5673_v57, %v5626_v24  ;;  %v5822_v24 = vrot.slane %v5814_v5, %v11542_v48  ;;  %v5799_v57 = vcombine.high %v11858_v63, %v11857_v18  ;;  %v6244_v7 = vrot.slane %v6236_v17, %v11542_v48 }
 0x5d4   : > { %v5638_v53 = vpop.permute.xlu0 %5637  ;;  %v10612_v38 = vpop.permute.xlu1 %5653  ;;  %v5675_v44 = vsel %vm516_vm8, %v5674_v40, %v5630_v6  ;;  %v5845_v6 = vrot.slane %v5831_v30, %v11542_v48  ;;  %v6219_v5 = vrot.slane %v6205_v49, %v11542_v48  ;;  %v6204_v40 = vcombine.low %v6139_v4, %v6155_v13  ;;  %v11859_v4 = vld [vmem:[#allocation65_spill] sm:$0xff]  ;;  %v11860_v13 = vld [vmem:[#allocation30_spill] sm:$0xff] }
 0x5d5   : > { %11856 = vst [vmem:[#allocation31_spill] sm:$0xff] %v10612_v38  ;;  %v5866_v26 = vcombine.low %v5822_v24, %v5854_v19  ;;  %v5676_v38 = vsel %vm518_vm9, %v5675_v44, %v5634_v58  ;;  %v11861_v30 = vcombine.low %v11859_v4, %v11860_v13  ;;  %v5075_v49 = vcombine.high %v10276_v25, %v10265_v36 }
 0x5d6   : > { %6445 = vrot.lane.b32.xlu0 %v6394_v54, %s6843_s8  ;;  %6039 = vrot.lane.b32.xlu1 %v6000_v31, %s6841_s15  ;;  %v5813_v54 = vrot.slane %v5799_v57, %v11542_v48  ;;  %v5677_v22 = vsel %vm520_vm10, %v5676_v38, %v5638_v53  ;;  %v6258_v58 = vcombine.low %v6219_v5, %v6251_v62 }
 0x5d7   : > { %v5043_v57 = vcombine.high %v10231_v11, %v10234_v32  ;;  %v5847_v4 = vcombine.high %v10566_v45, %v10551_v23  ;;  %v11864_v45 = vld [vmem:[#allocation68_spill] sm:$0xff] }
 0x5d8   : > { %v4440_v39 = vpop.permute.xlu0 %4439  ;;  %v10624_v50 = vpop.permute.xlu1 %5657  ;;  %v5864_v31 = vcombine.low %v5813_v54, %v5845_v6 }
 0x5d9   : > { %v4494_v53 = vsel %vm510_vm5, %v11861_v30, %v4440_v39  ;;  %v6259_v30 = vcombine.high %v6219_v5, %v6251_v62  ;;  %v5057_v11 = vrot.slane %v5043_v57, %v11542_v48  ;;  %v5861_v23 = vrot.slane %v5847_v4, %v11542_v48  ;;  %v11865_v62 = vld [vmem:[#allocation66_spill] sm:$0xff]  ;;  %v11872_v4 = vld [vmem:[#allocation48_spill] sm:$0xff] }
 0x5da   : > { %6019 = vrot.lane.b32.xlu0 %v5866_v26, %s6842_s16  ;;  %6437 = vrot.lane.b32.xlu1 %v6392_v59, %s6842_s16  ;;  %v6212_v26 = vrot.slane %v6204_v40, %v11542_v48  ;;  %v5867_v59 = vcombine.high %v5822_v24, %v5854_v19  ;;  %v5815_v24 = vcombine.high %v10583_v56, %v10569_v21 }
 0x5db   : > { %v11866_v5 = vcombine.low %v11864_v45, %v11865_v62  ;;  %v4685_v62 = vcombine.high %v10443_v61, %v10434_v51 }
 0x5dc   : > { %v5642_v41 = vpop.permute.xlu0 %5641  ;;  %v10634_v29 = vpop.permute.xlu1 %5661  ;;  %v6256_v63 = vcombine.low %v6212_v26, %v6244_v7  ;;  %v6257_v19 = vcombine.high %v6212_v26, %v6244_v7  ;;  %v11867_v7 = vld [vmem:[#allocation38_spill] sm:$0xff]  ;;  %v5829_v56 = vrot.slane %v5815_v24, %v11542_v48  ;;  %v11874_v24 = vld [vmem:[#allocation120_spill] sm:$0xff] }
 0x5dd   : > { %v10638_v14 = vsel %vm522_vm12, %v5677_v22, %v5642_v41  ;;  %v5865_v22 = vcombine.high %v5813_v54, %v5845_v6  ;;  %v11862_v41 = vld [vmem:[#allocation75_spill] sm:$0xff]  ;;  %v11868_v26 = vld [vmem:[#allocation118_spill] sm:$0xff] }
 0x5de   : > { %6417 = vrot.lane.b32.xlu0 %v6258_v58, %s6843_s8  ;;  %6011 = vrot.lane.b32.xlu1 %v5864_v31, %s6841_s15  ;;  %v11863_v58 = vld [vmem:[#allocation73_spill] sm:$0xff]  ;;  %v5868_v57 = vcombine.low %v5829_v56, %v5861_v23 }
 0x5df   : > { %v5011_v31 = vcombine.high %v11863_v58, %v11862_v41 }
 0x5e0   : > { %v4444_v38 = vpop.permute.xlu0 %4443  ;;  %v10650_v18 = vpop.permute.xlu1 %5665 }
 0x5e1   : > { %v4495_v44 = vsel %vm512_vm6, %v4494_v53, %v4444_v38  ;;  %v5025_v6 = vrot.slane %v5011_v31, %v11542_v48  ;;  %v11871_v31 = vld [vmem:[#allocation42_spill] sm:$0xff] }
 0x5e2   : > { %5219 = vrot.lane.b32.xlu0 %v5075_v49, %s6844_s7  ;;  %6409 = vrot.lane.b32.xlu1 %v6256_v63, %s6842_s16 }
 0x5e3   : > { %v5076_v53 = vcombine.low %v5025_v6, %v5057_v11 }
 0x5e4   : > { %v4448_v17 = vpop.permute.xlu0 %4447  ;;  %v4468_v40 = vpop.permute.xlu1 %4467 }
 0x5e5   : > { %v10657_v39 = vsel %vm514_vm7, %v4495_v44, %v4448_v17  ;;  %v4501_v38 = vsel %vm510_vm5, %v11866_v5, %v4468_v40  ;;  %v5211_v44 = vcombine.high %v11868_v26, %v11867_v7  ;;  %v11869_v17 = vld [vmem:[#allocation69_spill] sm:$0xff]  ;;  %v6003_v40 = vcombine.high %v10573_v2, %v10554_v16 }
 0x5e6   : > { %6023 = vrot.lane.b32.xlu0 %v5867_v59, %s6846_s10  ;;  %6015 = vrot.lane.b32.xlu1 %v5865_v22, %s6845_s9  ;;  %v11870_v59 = vld [vmem:[#allocation50_spill] sm:$0xff]  ;;  %v5983_v5 = vcombine.high %v10506_v20, %v10495_v3  ;;  %v6395_v2 = vcombine.high %v10592_v8, %v10579_v37  ;;  %v5951_v3 = vcombine.high %v10520_v52, %v10509_v46  ;;  %v11881_v46 = vld [vmem:[#allocation52_spill] sm:$0xff] }
 0x5e7   : > { %v5179_v22 = vcombine.high %v11870_v59, %v11869_v17  ;;  %v11878_v17 = vld [vmem:[#allocation44_spill] sm:$0xff]  ;;  %v11879_v20 = vld [vmem:[#allocation46_spill] sm:$0xff] }
 0x5e8   : > { %v4484_v13 = vpop.permute.xlu0 %4483  ;;  %v10666_v32 = vpop.permute.xlu1 %5669  ;;  %v11882_v52 = vld [vmem:[#allocation58_spill] sm:$0xff] }
 0x5ea   : > { %6421 = vrot.lane.b32.xlu0 %v6259_v30, %s6847_s11  ;;  %6413 = vrot.lane.b32.xlu1 %v6257_v19, %s6846_s10  ;;  %v5147_v30 = vcombine.high %v11872_v4, %v11871_v31  ;;  %v11873_v19 = vld [vmem:[#allocation71_spill] sm:$0xff] }
 0x5ec   : > { %v4488_v54 = vpop.permute.xlu0 %4487  ;;  %v4472_v49 = vpop.permute.xlu1 %4471  ;;  %v5161_v8 = vrot.slane %v5147_v30, %v11542_v48  ;;  %v10729_v30 = vrot.slane %v5983_v5, %v11542_v48 }
 0x5ed   : > { %v4502_v21 = vsel %vm512_vm6, %v4501_v38, %v4472_v49  ;;  %v10702_v38 = vrot.slane %v5179_v22, %v11542_v48  ;;  %v11875_v49 = vld [vmem:[#allocation43_spill] sm:$0xff] }
 0x5ee   : > { %5223 = vrot.lane.b32.xlu0 %v5076_v53, %s6841_s15  ;;  %5247 = vrot.lane.b32.xlu1 %v5211_v44, %s6844_s7  ;;  %v4995_v53 = vcombine.high %v11874_v24, %v11873_v19  ;;  %v11876_v44 = vld [vmem:[#allocation114_spill] sm:$0xff]  ;;  %v5077_v19 = vcombine.high %v5025_v6, %v5057_v11  ;;  %v5965_v6 = vrot.slane %v5951_v3, %v11542_v48 }
 0x5f0   : > { %v4460_v63 = vpop.permute.xlu0 %4459  ;;  %v4476_v41 = vpop.permute.xlu1 %4475  ;;  %v10718_v22 = vrot.slane %v4995_v53, %v11541_v1 }
 0x5f1   : > { %v4503_v58 = vsel %vm514_vm7, %v4502_v21, %v4476_v41  ;;  %v4979_v21 = vcombine.high %v11876_v44, %v11875_v49  ;;  %v5869_v44 = vcombine.high %v5829_v56, %v5861_v23  ;;  %v4605_v23 = vcombine.high %v10367_v55, %v10386_v28 }
 0x5f2   : > { %6027 = vrot.lane.b32.xlu0 %v5868_v57, %s6843_s8  ;;  %6051 = vrot.lane.b32.xlu1 %v6003_v40, %s6846_s10  ;;  %v11877_v57 = vld [vmem:[#allocation117_spill] sm:$0xff]  ;;  %v4573_v55 = vcombine.high %v10324_v43, %v10347_v0  ;;  %v4557_v43 = vcombine.high %v10211_v60, %v10236_v9 }
 0x5f3   : > { %v4963_v59 = vcombine.high %v11878_v17, %v11877_v57  ;;  %v11880_v40 = vld [vmem:[#allocation57_spill] sm:$0xff]  ;;  %v10732_v53 = vrot.slane %v4979_v21, %v11541_v1  ;;  %v10787_v0 = vrot.slane %v4605_v23, %v11541_v1 }
 0x5f4   : > { %v4464_v45 = vpop.permute.xlu0 %4463  ;;  %v4480_v16 = vpop.permute.xlu1 %4479  ;;  %v4947_v31 = vcombine.high %v11880_v40, %v11879_v20  ;;  %v11884_v40 = vld [vmem:[#allocation40_spill] sm:$0xff] }
 0x5f5   : > { %v4504_v41 = vsel %vm516_vm8, %v4503_v58, %v4480_v16  ;;  %v4653_v58 = vcombine.high %v10408_v42, %v10411_v15  ;;  %v10735_v42 = vrot.slane %v4963_v59, %v11541_v1  ;;  %v4621_v15 = vcombine.high %v10405_v34, %v10391_v10 }
 0x5f6   : > { %4829 = vrot.lane.b32.xlu0 %v4685_v62, %s6844_s7  ;;  %v4505_v37 = vsel %vm518_vm9, %v4504_v41, %v4484_v13  ;;  %6449 = vrot.lane.b32.xlu1 %v6395_v2, %s6847_s11  ;;  %v11883_v62 = vcombine.low %v11881_v46, %v11882_v52  ;;  %v5212_v2 = vcombine.low %v5161_v8, %v10702_v38  ;;  %v11887_v46 = vld [vmem:[#allocation13_spill] sm:$0xff] }
 0x5f7   : > { %v4506_v24 = vsel %vm520_vm10, %v4505_v37, %v4488_v54  ;;  %v10745_v54 = vrot.slane %v4947_v31, %v11541_v1  ;;  %v5058_v5 = vcombine.low %v10732_v53, %v10718_v22  ;;  %v4667_v21 = vrot.slane %v4653_v58, %v11542_v48  ;;  %v11885_v31 = vld [vmem:[#allocation47_spill] sm:$0xff] }
 0x5f8   : > { %v3644_v4 = vpop.permute.xlu0 %3643  ;;  %v4452_v13 = vpop.permute.xlu1 %4451  ;;  %v6004_v34 = vcombine.low %v5965_v6, %v10729_v30  ;;  %v4635_v17 = vrot.slane %v4621_v15, %v11542_v48  ;;  %v5131_v37 = vcombine.high %v11885_v31, %v11884_v40  ;;  %v11890_v15 = vld [vmem:[#allocation51_spill] sm:$0xff] }
 0x5f9   : > { %v3698_v16 = vsel %vm510_vm5, %v11883_v62, %v3644_v4  ;;  %v4497_v11 = vsel %vm516_vm8, %v10657_v39, %v4452_v13  ;;  %v5026_v39 = vcombine.low %v10745_v54, %v10735_v42  ;;  %v5066_v3 = vrot.slane %v5058_v5, %v11542_v48  ;;  %v11888_v62 = vld [vmem:[#allocation115_spill] sm:$0xff]  ;;  %v11889_v13 = vld [vmem:[#allocation24_spill] sm:$0xff] }
 0x5fa   : > { %5227 = vrot.lane.b32.xlu0 %v5077_v19, %s6845_s9  ;;  %5251 = vrot.lane.b32.xlu1 %v5212_v2, %s6841_s15  ;;  %v4686_v41 = vcombine.low %v4635_v17, %v4667_v21  ;;  %v4821_v4 = vcombine.high %v10356_v33, %v10345_v47  ;;  %v11886_v19 = vld [vmem:[#allocation53_spill] sm:$0xff]  ;;  %v5099_v2 = vcombine.high %v11889_v13, %v11888_v62 }
 0x5fb   : > { %v5034_v28 = vrot.slane %v5026_v39, %v11542_v48  ;;  %v5115_v52 = vcombine.high %v11887_v46, %v11886_v19  ;;  %v10790_v5 = vrot.slane %v5131_v37, %v11541_v1  ;;  %v5213_v39 = vcombine.high %v5161_v8, %v10702_v38 }
 0x5fc   : > { %v3652_v49 = vpop.permute.xlu0 %3651  ;;  %v4456_v10 = vpop.permute.xlu1 %4455  ;;  %v10807_v23 = vrot.slane %v5099_v2, %v11541_v1 }
 0x5fd   : > { %v4498_v57 = vsel %vm518_vm9, %v4497_v11, %v4456_v10  ;;  %v10804_v9 = vrot.slane %v5115_v52, %v11541_v1  ;;  %v6005_v52 = vcombine.high %v5965_v6, %v10729_v30  ;;  %v5059_v30 = vcombine.high %v10732_v53, %v10718_v22  ;;  %v11900_v53 = vld [vmem:[#allocation119_spill] sm:$0xff] }
 0x5fe   : > { %6031 = vrot.lane.b32.xlu0 %v5869_v44, %s6847_s11  ;;  %6055 = vrot.lane.b32.xlu1 %v6004_v34, %s6843_s8  ;;  %v4499_v59 = vsel %vm520_vm10, %v4498_v57, %v4460_v63  ;;  %v4589_v63 = vcombine.high %v10262_v27, %v10281_v35  ;;  %v11891_v27 = vld [vmem:[#allocation36_spill] sm:$0xff]  ;;  %v11892_v44 = vld [vmem:[#allocation79_spill] sm:$0xff] }
 0x5ff   : > { %v10762_v20 = vsel %vm522_vm12, %v4499_v59, %v4464_v45  ;;  %v5083_v35 = vcombine.high %v11891_v27, %v11890_v15  ;;  %v4789_v10 = vcombine.high %v11892_v44, %v10320_v12  ;;  %v10799_v59 = vrot.slane %v4573_v55, %v11541_v1  ;;  %v11893_v12 = vld [vmem:[#allocation70_spill] sm:$0xff]  ;;  %v11896_v55 = vld [vmem:[#allocation77_spill] sm:$0xff] }
 0x600   : > { %v3660_v56 = vpop.permute.xlu0 %3659  ;;  %v4492_v58 = vpop.permute.xlu1 %4491  ;;  %v10796_v57 = vrot.slane %v4589_v63, %v11541_v1  ;;  %v11895_v63 = vld [vmem:[#allocation80_spill] sm:$0xff]  ;;  %v5079_v27 = vcombine.high %v5034_v28, %v5066_v3 }
 0x601   : > { %v10775_v45 = vsel %vm522_vm12, %v4506_v24, %v4492_v58  ;;  %v5078_v24 = vcombine.low %v5034_v28, %v5066_v3  ;;  %v10814_v8 = vrot.slane %v5083_v35, %v11541_v1  ;;  %v4687_v58 = vcombine.high %v4635_v17, %v4667_v21  ;;  %v11901_v3 = vld [vmem:[#allocation28_spill] sm:$0xff] }
 0x602   : > { %4833 = vrot.lane.b32.xlu0 %v4686_v41, %s6841_s15  ;;  %4857 = vrot.lane.b32.xlu1 %v4821_v4, %s6844_s7  ;;  %v11894_v41 = vld [vmem:[#allocation74_spill] sm:$0xff]  ;;  %v4668_v31 = vcombine.low %v10796_v57, %v10787_v0  ;;  %v5194_v4 = vcombine.low %v10804_v9, %v10790_v5  ;;  %v11897_v19 = vcombine.low %v11895_v63, %v11896_v55 }
 0x603   : > { %v4757_v40 = vcombine.high %v11894_v41, %v11893_v12  ;;  %v4803_v62 = vrot.slane %v4789_v10, %v11542_v48  ;;  %v5162_v21 = vcombine.low %v10814_v8, %v10807_v23  ;;  %v4725_v28 = vcombine.high %v11901_v3, %v11900_v53  ;;  %v11902_v12 = vld [vmem:[#allocation82_spill] sm:$0xff]  ;;  %v11903_v41 = vld [vmem:[#allocation15_spill] sm:$0xff] }
 0x604   : > { %v3668_v11 = vpop.permute.xlu0 %3667  ;;  %v3648_v34 = vpop.permute.xlu1 %3647  ;;  %v4676_v35 = vrot.slane %v4668_v31, %v11542_v48 }
 0x605   : > { %v3699_v60 = vsel %vm512_vm6, %v3698_v16, %v3648_v34  ;;  %v10817_v16 = vrot.slane %v4557_v43, %v11541_v1  ;;  %v4771_v15 = vrot.slane %v4757_v40, %v11542_v48  ;;  %v11898_v43 = vld [vmem:[#allocation59_spill] sm:$0xff]  ;;  %v4709_v40 = vcombine.high %v11903_v41, %v11902_v12 }
 0x606   : > { %5231 = vrot.lane.b32.xlu0 %v5078_v24, %s6842_s16  ;;  %5255 = vrot.lane.b32.xlu1 %v5213_v39, %s6845_s9  ;;  %v3700_v38 = vsel %vm514_vm7, %v3699_v60, %v3652_v49  ;;  %v11899_v24 = vld [vmem:[#allocation76_spill] sm:$0xff]  ;;  %v5202_v39 = vrot.slane %v5194_v4, %v11542_v48  ;;  %v5027_v60 = vcombine.high %v10745_v54, %v10735_v42  ;;  %v11905_v4 = vld [vmem:[#allocation67_spill] sm:$0xff] }
 0x607   : > { %v4636_v13 = vcombine.low %v10817_v16, %v10799_v59  ;;  %v4741_v44 = vcombine.high %v11899_v24, %v11898_v43  ;;  %v4822_v34 = vcombine.low %v4771_v15, %v4803_v62  ;;  %v4823_v24 = vcombine.high %v4771_v15, %v4803_v62 }
 0x608   : > { %v4034_v37 = vpop.permute.xlu0 %4033  ;;  %v3656_v49 = vpop.permute.xlu1 %3655 }
 0x609   : > { %v4088_v46 = vsel %vm510_vm5, %v11897_v19, %v4034_v37  ;;  %v3701_v2 = vsel %vm516_vm8, %v3700_v38, %v3656_v49  ;;  %v4644_v22 = vrot.slane %v4636_v13, %v11542_v48  ;;  %v5170_v38 = vrot.slane %v5162_v21, %v11542_v48 }
 0x60a   : > { %4837 = vrot.lane.b32.xlu0 %v4687_v58, %s6845_s9  ;;  %6059 = vrot.lane.b32.xlu1 %v6005_v52, %s6847_s11  ;;  %v3702_v17 = vsel %vm518_vm9, %v3701_v2, %v3660_v56  ;;  %v5073_v37 = vrot.slane %v5059_v30, %v11542_v48  ;;  %v11904_v58 = vld [vmem:[#allocation20_spill] sm:$0xff]  ;;  %v4755_v55 = vrot.slane %v4741_v44, %v11541_v1 }
 0x60b   : > { %v4688_v54 = vcombine.low %v4644_v22, %v4676_v35  ;;  %v4693_v63 = vcombine.high %v11905_v4, %v11904_v58  ;;  %v5214_v49 = vcombine.low %v5170_v38, %v5202_v39  ;;  %v5041_v13 = vrot.slane %v5027_v60, %v11542_v48 }
 0x60c   : > { %v4046_v6 = vpop.permute.xlu0 %4045  ;;  %v3664_v10 = vpop.permute.xlu1 %3663  ;;  %v4723_v2 = vrot.slane %v4709_v40, %v11541_v1  ;;  %v4689_v53 = vcombine.high %v4644_v22, %v4676_v35 }
 0x60d   : > { %v3703_v56 = vsel %vm520_vm10, %v3702_v17, %v3664_v10  ;;  %v5080_v17 = vcombine.low %v5041_v13, %v5073_v37  ;;  %v4707_v30 = vrot.slane %v4693_v63, %v11541_v1  ;;  %v5081_v41 = vcombine.high %v5041_v13, %v5073_v37 }
 0x60e   : > { %5235 = vrot.lane.b32.xlu0 %v5079_v27, %s6846_s10  ;;  %4861 = vrot.lane.b32.xlu1 %v4822_v34, %s6841_s15  ;;  %v10856_v31 = vsel %vm522_vm12, %v3703_v56, %v3668_v11  ;;  %v4739_v11 = vrot.slane %v4725_v28, %v11541_v1  ;;  %v5195_v1 = vcombine.high %v10804_v9, %v10790_v5  ;;  %s6649_s15 = sshll.u32 %s6977_s23, 4 }
 0x60f   : > { %v5215_v28 = vcombine.high %v5170_v38, %v5202_v39  ;;  %v4773_v15 = vcombine.high %v4707_v30, %v4723_v2  ;;  %v11906_v38 = vld [vmem:[#allocation90_spill] sm:$0xff] }
 0x610   : > { %v4050_v42 = vpop.permute.xlu0 %4049  ;;  %v4038_v19 = vpop.permute.xlu1 %4037  ;;  %v4804_v27 = vcombine.low %v4739_v11, %v4755_v55  ;;  %v4805_v34 = vcombine.high %v4739_v11, %v4755_v55  ;;  %v5209_v40 = vrot.slane %v5195_v1, %v11542_v48 }
 0x611   : > { %v4089_v52 = vsel %vm512_vm6, %v4088_v46, %v4038_v19  ;;  %v4772_v46 = vcombine.low %v4707_v30, %v4723_v2  ;;  %v11910_v30 = vld [vmem:[#allocation14_spill] sm:$0xff] }
 0x612   : > { %4841 = vrot.lane.b32.xlu0 %v4688_v54, %s6842_s16  ;;  %5259 = vrot.lane.b32.xlu1 %v5214_v49, %s6842_s16  ;;  %v4812_v62 = vrot.slane %v4804_v27, %v11542_v48  ;;  %v4819_v5 = vrot.slane %v4805_v34, %v11542_v48 }
 0x613   : > { %v4780_v35 = vrot.slane %v4772_v46, %v11542_v48  ;;  %v4669_v46 = vcombine.high %v10796_v57, %v10787_v0 }
 0x614   : > { %v3676_v21 = vpop.permute.xlu0 %3675  ;;  %v4042_v43 = vpop.permute.xlu1 %4041 }
 0x615   : > { %v4090_v44 = vsel %vm514_vm7, %v4089_v52, %v4042_v43  ;;  %v4824_v39 = vcombine.low %v4780_v35, %v4812_v62  ;;  %v4825_v2 = vcombine.high %v4780_v35, %v4812_v62  ;;  %v6467_v43 = vld [vmem:[%s11142_s4] sm:$0xff]  ;;  %v11912_v62 = vld [vmem:[#allocation103_spill] sm:$0xff] }
 0x616   : > { %5239 = vrot.lane.b32.xlu0 %v5080_v17, %s6843_s8  ;;  %v4091_v10 = vsel %vm516_vm8, %v4090_v44, %v4046_v6  ;;  %4865 = vrot.lane.b32.xlu1 %v4823_v24, %s6845_s9  ;;  %v5163_v6 = vcombine.high %v10814_v8, %v10807_v23  ;;  %v4787_v23 = vrot.slane %v4773_v15, %v11542_v48  ;;  %v11913_v15 = vld [vmem:[#allocation23_spill] sm:$0xff] }
 0x617   : > { %v4092_v56 = vsel %vm518_vm9, %v4091_v10, %v4050_v42  ;;  %v11907_v42 = vld [vmem:[#allocation88_spill] sm:$0xff] }
 0x618   : > { %v3684_v60 = vpop.permute.xlu0 %3683  ;;  %v4054_v3 = vpop.permute.xlu1 %4053  ;;  %v11908_v54 = vcombine.low %v11906_v38, %v11907_v42  ;;  %v5177_v37 = vrot.slane %v5163_v6, %v11542_v48  ;;  %v4827_v63 = vcombine.high %v4787_v23, %v4819_v5  ;;  %v11914_v6 = vcombine.low %v11912_v62, %v11913_v15  ;;  %v11922_v62 = vld [vmem:[#allocation56_spill] sm:$0xff] }
 0x619   : > { %v10878_v12 = vsel %vm520_vm10, %v4092_v56, %v4054_v3  ;;  %v4637_v56 = vcombine.high %v10817_v16, %v10799_v59  ;;  %v4826_v3 = vcombine.low %v4787_v23, %v4819_v5  ;;  %v11916_v23 = vld [vmem:[#allocation78_spill] sm:$0xff] }
 0x61a   : > { %4845 = vrot.lane.b32.xlu0 %v4689_v53, %s6846_s10  ;;  %5263 = vrot.lane.b32.xlu1 %v5215_v28, %s6846_s10  ;;  %v5216_v19 = vcombine.low %v5177_v37, %v5209_v40  ;;  %v5217_v34 = vcombine.high %v5177_v37, %v5209_v40  ;;  %v4683_v28 = vrot.slane %v4669_v46, %v11542_v48 }
 0x61b   : > { %v4651_v57 = vrot.slane %v4637_v56, %v11542_v48 }
 0x61c   : > { %v3692_v22 = vpop.permute.xlu0 %3691  ;;  %v3672_v9 = vpop.permute.xlu1 %3671 }
 0x61d   : > { %v3705_v58 = vsel %vm510_vm5, %v11908_v54, %v3672_v9  ;;  %v4691_v40 = vcombine.high %v4651_v57, %v4683_v28 }
 0x61e   : > { %5243 = vrot.lane.b32.xlu0 %v5081_v41, %s6847_s11  ;;  %4869 = vrot.lane.b32.xlu1 %v4824_v39, %s6842_s16  ;;  %v3706_v8 = vsel %vm512_vm6, %v3705_v58, %v3676_v21  ;;  %v11909_v21 = vld [vmem:[#allocation104_spill] sm:$0xff]  ;;  %v4690_v41 = vcombine.low %v4651_v57, %v4683_v28  ;;  %v11915_v58 = vld [vmem:[#allocation81_spill] sm:$0xff]  ;;  %v11921_v28 = vld [vmem:[#allocation35_spill] sm:$0xff]  ;;  %s6660_s16 = sshll.u32 %s6901_s22, 8  ;;  %s6849_s22 = smov [#allocation7]  }
 0x61f   : > { %v11911_v27 = vcombine.high %v11909_v21, %v11910_v30  ;;  %v11923_v15 = vcombine.low %v11921_v28, %v11922_v62  ;;  %s6770_s25 = sshll.u32 %s6849_s22, 4  ;;  %s6771_s25 = int_to_ptr.vmem [resolvable:$false] %s6770_s25 }
 0x620   : > { %v4070_v4 = vpop.permute.xlu0 %4069  ;;  %v3680_v55 = vpop.permute.xlu1 %3679  ;;  %s6772_s26 = scalar_lea.vmem %s6771_s25, 512 }
 0x621   : > { %v3707_v49 = vsel %vm514_vm7, %v3706_v8, %v3680_v55  ;;  %v11917_v8 = vcombine.high %v11915_v58, %v11916_v23 }
 0x622   : > { %4881 = vrot.lane.b32.xlu0 %v4827_v63, %s6847_s11  ;;  %5267 = vrot.lane.b32.xlu1 %v5216_v19, %s6843_s8  ;;  %v3708_v52 = vsel %vm516_vm8, %v3707_v49, %v3684_v60 }
 0x624   : > { %v4074_v13 = vpop.permute.xlu0 %4073  ;;  %v3688_v11 = vpop.permute.xlu1 %3687 }
 0x625   : > { %v3709_v17 = vsel %vm518_vm9, %v3708_v52, %v3688_v11 }
 0x626   : > { %4085 = vrot.lane.b32.xlu0 %v11911_v27, %s6847_s11  ;;  %4873 = vrot.lane.b32.xlu1 %v4825_v2, %s6846_s10  ;;  %v3710_v24 = vsel %vm520_vm10, %v3709_v17, %v3692_v22 }
 0x628   : > { %v6426_v44 = vpop.permute.xlu0 %6425  ;;  %v3696_v10 = vpop.permute.xlu1 %3695 }
 0x629   : > { %v10913_v60 = vsel %vm522_vm12, %v3710_v24, %v3696_v10  ;;  %v11918_v10 = vld [vmem:[#allocation41_spill] sm:$0xff] }
 0x62a   : > { %6470 = vperm.xlu0 %6723, %v6467_v43   ;;  %5271 = vrot.lane.b32.xlu1 %v5217_v34, %s6847_s11  ;;  %v11919_v34 = vld [vmem:[#allocation16_spill] sm:$0xff] }
 0x62b   : > { %v11920_v56 = vcombine.low %v11918_v10, %v11919_v34  ;;  %v11924_v10 = vld [vmem:[#allocation49_spill] sm:$0xff]  ;;  %v11925_v34 = vld [vmem:[#allocation32_spill] sm:$0xff] }
 0x62c   : > { %v6430_v53 = vpop.permute.xlu0 %6429  ;;  %v4062_v1 = vpop.permute.xlu1 %4061 }
 0x62d   : > { %v4095_v0 = vsel %vm510_vm5, %v11914_v6, %v4062_v1  ;;  %v6459_v6 = vsel %vm510_vm5, %v11923_v15, %v6426_v44 }
 0x62e   : > { %4877 = vrot.lane.b32.xlu1 %v4826_v3, %s6843_s8 }
 0x630   : > { %v6402_v35 = vpop.permute.xlu0 %6401  ;;  %v4066_v22 = vpop.permute.xlu1 %4065 }
 0x631   : > { %v4096_v59 = vsel %vm512_vm6, %v4095_v0, %v4066_v22  ;;  %v6460_v22 = vsel %vm512_vm6, %v6459_v6, %v6430_v53 }
 0x632   : > { %v4097_v16 = vsel %vm514_vm7, %v4096_v59, %v4070_v4  ;;  %4849 = vrot.lane.b32.xlu1 %v4690_v41, %s6843_s8  ;;  %s242_s8 = scalar_lea.vmem [#allocation7], %s6649_s15 }
 0x633   : > { %v4098_v9 = vsel %vm516_vm8, %v4097_v16, %v4074_v13  ;;  %s6571_s7 = sshll.u32 %s242_s8, 4  ;;  %s6572_s7 = int_to_ptr.vmem [resolvable:$true] %s6571_s7 }
 0x634   : > { %v6008_v5 = vpop.permute.xlu0 %6007  ;;  %v4078_v39 = vpop.permute.xlu1 %4077  ;;  %s6766_s17 = scalar_lea.vmem %s6572_s7, 256  ;;  %p6773_p5 = scmp.lt.s32.totalorder %s6572_s7, %s6771_s25 }
 0x635   : > { %v4099_v38 = vsel %vm518_vm9, %v4098_v9, %v4078_v39  ;;  %p6767_p11 = scmp.ne.s32.totalorder %s6572_s7, %s6766_s17  ;;  %p6774_p7 = scmp.lt.s32.totalorder %s6772_s26, %s6766_s17 }
 0x636   : > { %4853 = vrot.lane.b32.xlu1 %v4691_v40, %s6847_s11 }
 0x637   : > { %p6768_p13 = pnand %p6767_p11, %p11960_p12  ;;  %p6775_p8 = por %p6774_p7, %p6773_p5 }
 0x638   : > { %v6406_v42 = vpop.permute.xlu0 %6405  ;;  %v4082_v48 = vpop.permute.xlu1 %4081 }
 0x639   : > { %v10932_v54 = vsel %vm520_vm10, %v4099_v38, %v4082_v48  ;;  %p6769_p4 = pneg %p6768_p13 }
 0x63a   : > { %4057 = vrot.lane.b32.xlu1 %v11917_v8, %s6847_s11  ;;  %s11101_s11 = scalar_lea.hbm %s11143_s5, %s6660_s16 }
 0x63b   : > { %p6776_p10 = pnand %p6775_p8, %p6769_p4 }
 0x63c   : > { %v6044_v37 = vpop.permute.xlu0 %6043  ;;  %v6398_v4 = vpop.permute.xlu1 %6397 }
 0x63d   : > { %v6452_v1 = vsel %vm510_vm5, %v11920_v56, %v6398_v4 }
 0x63e   : > { %v6453_v0 = vsel %vm512_vm6, %v6452_v1, %v6402_v35 }
 0x63f   : > { %v6454_v9 = vsel %vm514_vm7, %v6453_v0, %v6406_v42 }
 0x640   : > { %v6442_v63 = vpop.permute.xlu0 %6441  ;;  %v6036_v55 = vpop.permute.xlu1 %6035 }
 0x644   : > { %v6048_v19 = vpop.permute.xlu0 %6047  ;;  %v6434_v49 = vpop.permute.xlu1 %6433 }
 0x645   : > { %v6461_v59 = vsel %vm514_vm7, %v6460_v22, %v6434_v49 }
 0x648   : > { %v6446_v52 = vpop.permute.xlu0 %6445  ;;  %v6040_v13 = vpop.permute.xlu1 %6039 }
 0x64c   : > { %v6020_v11 = vpop.permute.xlu0 %6019  ;;  %v6438_v2 = vpop.permute.xlu1 %6437 }
 0x64d   : > { %v6462_v16 = vsel %vm516_vm8, %v6461_v59, %v6438_v2 }
 0x64e   : > { %v6463_v35 = vsel %vm518_vm9, %v6462_v16, %v6442_v63  ;;  %v11926_v63 = vcombine.low %v11924_v10, %v11925_v34  ;;  %v11930_v16 = vld [vmem:[#allocation84_spill] sm:$0xff] }
 0x64f   : > { %v6464_v23 = vsel %vm520_vm10, %v6463_v35, %v6446_v52 }
 0x650   : > { %v6418_v17 = vpop.permute.xlu0 %6417  ;;  %v6012_v21 = vpop.permute.xlu1 %6011  ;;  %v6069_v56 = vsel %vm510_vm5, %v11926_v63, %v6036_v55  ;;  %v11931_v55 = vld [vmem:[#allocation39_spill] sm:$0xff] }
 0x651   : > { %v6070_v62 = vsel %vm512_vm6, %v6069_v56, %v6040_v13 }
 0x652   : > { %v6071_v0 = vsel %vm514_vm7, %v6070_v62, %v6044_v37 }
 0x654   : > { %v10938_v30 = vpop.permute.xlu0 %5219  ;;  %v6410_v27 = vpop.permute.xlu1 %6409 }
 0x655   : > { %v6455_v39 = vsel %vm516_vm8, %v6454_v9, %v6410_v27  ;;  %v11932_v9 = vld [vmem:[#allocation64_spill] sm:$0xff] }
 0x658   : > { %v6024_v43 = vpop.permute.xlu0 %6023  ;;  %v6016_v24 = vpop.permute.xlu1 %6015 }
 0x65c   : > { %v6422_v46 = vpop.permute.xlu0 %6421  ;;  %v6414_v3 = vpop.permute.xlu1 %6413 }
 0x65d   : > { %v6456_v38 = vsel %vm518_vm9, %v6455_v39, %v6414_v3  ;;  %v11928_v3 = vld [vmem:[#allocation113_spill] sm:$0xff]  ;;  %v11933_v39 = vcombine.low %v11931_v55, %v11932_v9 }
 0x65e   : > { %v6457_v53 = vsel %vm520_vm10, %v6456_v38, %v6418_v17  ;;  %v11927_v17 = vld [vmem:[#allocation116_spill] sm:$0xff] }
 0x65f   : > { %v6458_v42 = vsel %vm522_vm12, %v6457_v53, %v6422_v46  ;;  %v11929_v52 = vcombine.low %v11927_v17, %v11928_v3  ;;  %v5679_v38 = vsel %vm510_vm5, %v11933_v39, %v11930_v16  ;;  %v6072_v53 = vsel %vm516_vm8, %v6071_v0, %v6048_v19 }
 0x660   : > { %v10949_v57 = vpop.permute.xlu0 %5223  ;;  %v10952_v41 = vpop.permute.xlu1 %5247 }
 0x661   : > { %v6062_v28 = vsel %vm510_vm5, %v11929_v52, %v6008_v5  ;;  %v11934_v5 = vld [vmem:[#allocation94_spill] sm:$0xff] }
 0x662   : > { %v6063_v15 = vsel %vm512_vm6, %v6062_v28, %v6012_v21  ;;  %v5680_v13 = vsel %vm512_vm6, %v5679_v38, %v11934_v5  ;;  %v11935_v21 = vld [vmem:[#allocation31_spill] sm:$0xff] }
 0x663   : > { %v6064_v6 = vsel %vm514_vm7, %v6063_v15, %v6016_v24  ;;  %v5681_v24 = vsel %vm514_vm7, %v5680_v13, %v11935_v21 }
 0x664   : > { %v6028_v40 = vpop.permute.xlu0 %6027  ;;  %v6052_v44 = vpop.permute.xlu1 %6051  ;;  %v6065_v35 = vsel %vm516_vm8, %v6064_v6, %v6020_v11 }
 0x665   : > { %v6073_v37 = vsel %vm518_vm9, %v6072_v53, %v6052_v44  ;;  %v11939_v53 = vcombine.low %v10443_v61, %v10434_v51  ;;  %v11948_v61 = vld [vmem:[#allocation86_spill] sm:$0xff] }
 0x668   : > { %v10960_v48 = vpop.permute.xlu0 %4829  ;;  %v6450_v58 = vpop.permute.xlu1 %6449 }
 0x669   : > { %v6465_v8 = vsel %vm522_vm12, %v6464_v23, %v6450_v58  ;;  %v5682_v58 = vsel %vm516_vm8, %v5681_v24, %v10624_v50  ;;  %v6066_v23 = vsel %vm518_vm9, %v6065_v35, %v6024_v43  ;;  %v4884_v21 = vsel %vm510_vm5, %v11939_v53, %v10960_v48  ;;  %v11940_v24 = vld [vmem:[#allocation26_spill] sm:$0xff] }
 0x66a   : > { %6491 = vmatprep.subr.mxu1 %v6465_v8  ;;  %v5683_v11 = vsel %vm518_vm9, %v5682_v58, %v10634_v29  ;;  %v6067_v10 = vsel %vm520_vm10, %v6066_v23, %v6028_v40  ;;  %v11942_v58 = vld [vmem:[#allocation27_spill] sm:$0xff] }
 0x66b   : > { %6492 = vmatpush1.msra.mxu1 %v6458_v42  ;;  %v5684_v63 = vsel %vm520_vm10, %v5683_v11, %v10650_v18 }
 0x66c   : > { %v5228_v4 = vpop.permute.xlu0 %5227  ;;  %v5252_v49 = vpop.permute.xlu1 %5251  ;;  %v5685_v50 = vsel %vm522_vm12, %v5684_v63, %v10666_v32  ;;  %v11937_v32 = vcombine.low %v10276_v25, %v10265_v36  ;;  %v11938_v36 = vcombine.low %v10356_v33, %v10345_v47  ;;  %v11946_v63 = vld [vmem:[#allocation33_spill] sm:$0xff] }
 0x670   : > { %v6032_v2 = vpop.permute.xlu0 %6031  ;;  %v6056_v27 = vpop.permute.xlu1 %6055 }
 0x671   : > { %v6074_v8 = vsel %vm520_vm10, %v6073_v37, %v6056_v27  ;;  %v6068_v44 = vsel %vm522_vm12, %v6067_v10, %v6032_v2  ;;  %v11936_v2 = vcombine.low %v11868_v26, %v11867_v7  ;;  %v11941_v37 = vld [vmem:[#allocation34_spill] sm:$0xff]  ;;  %v11944_v10 = vld [vmem:[#allocation61_spill] sm:$0xff] }
 0x672   : > { %v11943_v23 = vcombine.low %v11941_v37, %v11942_v58 }
 0x673   : > { %v5281_v62 = vsel %vm510_vm5, %v11936_v2, %v10952_v41 }
 0x674   : > { %v10970_v1 = vpop.permute.xlu0 %4833  ;;  %v4858_v46 = vpop.permute.xlu1 %4857  ;;  %v5282_v15 = vsel %vm512_vm6, %v5281_v62, %v5252_v49 }
 0x675   : > { %v4891_v25 = vsel %vm510_vm5, %v11938_v36, %v4858_v46 }
 0x678   : > { %v5232_v22 = vpop.permute.xlu0 %5231  ;;  %v5256_v59 = vpop.permute.xlu1 %5255 }
 0x679   : > { %v5283_v16 = vsel %vm514_vm7, %v5282_v15, %v5256_v59 }
 0x67c   : > { %v6060_v42 = vpop.permute.xlu1 %6059  ;;  %v4838_v34 = vpop.permute.xlu0 %4837 }
 0x67d   : > { %v6075_v19 = vsel %vm522_vm12, %v6074_v8, %v6060_v42  ;;  %v3299_v8 = vsel %vm510_vm5, %v11943_v23, %v11940_v24  ;;  %v4885_v42 = vsel %vm512_vm6, %v4884_v21, %v10970_v1  ;;  %v11950_v1 = vld [vmem:[#allocation98_spill] sm:$0xff] }
 0x67e   : > { %6493 = vmatprep.subr.mxu1 %v6075_v19  ;;  %v11945_v19 = vld [vmem:[#allocation12_spill] sm:$0xff]  ;;  %v4886_v51 = vsel %vm514_vm7, %v4885_v42, %v4838_v34 }
 0x67f   : > { %6494 = vmatpush1.msra.mxu1 %v6068_v44  ;;  %v11947_v44 = vcombine.low %v11945_v19, %v11946_v63 }
 0x680   : > { %6495 = vmatprep.subr.mxu1 %v5685_v50  ;;  %v4862_v43 = vpop.permute.xlu1 %4861  ;;  %v5236_v29 = vpop.permute.xlu0 %5235 }
 0x681   : > { %6496 = vmatpush1.msra.mxu1 %v10638_v14  ;;  %v5274_v14 = vsel %vm510_vm5, %v11937_v32, %v10938_v30  ;;  %v4892_v59 = vsel %vm512_vm6, %v4891_v25, %v4862_v43  ;;  %v3292_v50 = vsel %vm510_vm5, %v11947_v44, %v11944_v10  ;;  %v11952_v32 = vld [vmem:[#allocation83_spill] sm:$0xff]  ;;  %v6466_v25 = vld [vmem:[%s11141_s3] sm:$0xff] }
 0x682   : > { %v5275_v0 = vsel %vm512_vm6, %v5274_v14, %v10949_v57  ;;  %v3293_v48 = vsel %vm512_vm6, %v3292_v50, %v11948_v61  ;;  %v11953_v14 = vld [vmem:[#allocation18_spill] sm:$0xff] }
 0x683   : > { %v5276_v55 = vsel %vm514_vm7, %v5275_v0, %v5228_v4 }
 0x684   : > { %v5260_v27 = vpop.permute.xlu1 %5259  ;;  %v4842_v56 = vpop.permute.xlu0 %4841  ;;  %v5277_v26 = vsel %vm516_vm8, %v5276_v55, %v5232_v22  ;;  %v11955_v55 = vld [vmem:[#allocation72_spill] sm:$0xff] }
 0x685   : > { %v5284_v7 = vsel %vm516_vm8, %v5283_v16, %v5260_v27  ;;  %v5278_v30 = vsel %vm518_vm9, %v5277_v26, %v5236_v29  ;;  %v4887_v43 = vsel %vm516_vm8, %v4886_v51, %v4842_v56  ;;  %v11949_v29 = vld [vmem:[#allocation54_spill] sm:$0xff] }
 0x686   : > { %v3300_v27 = vsel %vm512_vm6, %v3299_v8, %v11949_v29 }
 0x688   : > { %v4866_v40 = vpop.permute.xlu1 %4865  ;;  %v5240_v3 = vpop.permute.xlu0 %5239 }
 0x689   : > { %v5279_v4 = vsel %vm520_vm10, %v5278_v30, %v5240_v3  ;;  %v4893_v22 = vsel %vm514_vm7, %v4892_v59, %v4866_v40 }
 0x68c   : > { %v5264_v17 = vpop.permute.xlu1 %5263  ;;  %v4846_v18 = vpop.permute.xlu0 %4845 }
 0x68d   : > { %v5285_v41 = vsel %vm518_vm9, %v5284_v7, %v5264_v17  ;;  %v4888_v40 = vsel %vm518_vm9, %v4887_v43, %v4846_v18  ;;  %v3301_v17 = vsel %vm514_vm7, %v3300_v27, %v11950_v1  ;;  %v11954_v18 = vld [vmem:[#allocation97_spill] sm:$0xff] }
 0x68e   : > { %v3302_v15 = vsel %vm516_vm8, %v3301_v17, %v11953_v14 }
 0x690   : > { %v4870_v52 = vpop.permute.xlu1 %4869  ;;  %v5244_v9 = vpop.permute.xlu0 %5243 }
 0x691   : > { %v5280_v38 = vsel %vm522_vm12, %v5279_v4, %v5244_v9  ;;  %v4894_v47 = vsel %vm516_vm8, %v4893_v22, %v4870_v52  ;;  %v11957_v9 = vld [vmem:[#allocation85_spill] sm:$0xff] }
 0x694   : > { %v5268_v28 = vpop.permute.xlu1 %5267  ;;  %v4882_v35 = vpop.permute.xlu0 %4881 }
 0x695   : > { %v5286_v57 = vsel %vm520_vm10, %v5285_v41, %v5268_v28  ;;  %v11951_v28 = vld [vmem:[#allocation60_spill] sm:$0xff] }
 0x696   : > { %v3294_v2 = vsel %vm514_vm7, %v3293_v48, %v11951_v28  ;;  %v11956_v41 = vld [vmem:[#allocation96_spill] sm:$0xff] }
 0x697   : > { %v3295_v56 = vsel %vm516_vm8, %v3294_v2, %v11952_v32 }
 0x698   : > { %v4874_v6 = vpop.permute.xlu1 %4873  ;;  %v4086_v34 = vpop.permute.xlu0 %4085  ;;  %v3296_v7 = vsel %vm518_vm9, %v3295_v56, %v11955_v55 }
 0x699   : > { %v4895_v33 = vsel %vm518_vm9, %v4894_v47, %v4874_v6  ;;  %v3303_v6 = vsel %vm518_vm9, %v3302_v15, %v11954_v18  ;;  %v4101_v16 = vsel %vm522_vm12, %v10932_v54, %v4086_v34  ;;  %v11958_v54 = vld [vmem:[#allocation95_spill] sm:$0xff] }
 0x69c   : > { %v5272_v49 = vpop.permute.xlu1 %5271 }
 0x69d   : > { %v5287_v39 = vsel %vm522_vm12, %v5286_v57, %v5272_v49 }
 0x69e   : > { %6497 = vmatprep.subr.mxu1 %v5287_v39 }
 0x69f   : > { %6498 = vmatpush1.msra.mxu1 %v5280_v38 }
 0x6a0   : > { %v4878_v46 = vpop.permute.xlu1 %4877 }
 0x6a1   : > { %v4896_v5 = vsel %vm520_vm10, %v4895_v33, %v4878_v46 }
 0x6a2   : > { %v4897_v13 = vsel %vm522_vm12, %v4896_v5, %v4882_v35 }
 0x6a3   : > { %6499 = vmatprep.subr.mxu1 %v4897_v13 }
 0x6a4   : > { %v4850_v11 = vpop.permute.xlu1 %4849 }
 0x6a5   : > { %v4889_v3 = vsel %vm520_vm10, %v4888_v40, %v4850_v11 }
 0x6a8   : > { %v4854_v52 = vpop.permute.xlu1 %4853 }
 0x6a9   : > { %v4890_v62 = vsel %vm522_vm12, %v4889_v3, %v4854_v52 }
 0x6aa   : > { %6500 = vmatpush1.msra.mxu1 %v4890_v62 }
 0x6ab   : > { %6501 = vmatprep.subr.mxu1 %v10775_v45  ;;  %v3297_v45 = vsel %vm520_vm10, %v3296_v7, %v11956_v41 }
 0x6ac   : > { %6502 = vmatpush1.msra.mxu1 %v10762_v20  ;;  %v4058_v0 = vpop.permute.xlu1 %4057  ;;  %v3304_v20 = vsel %vm520_vm10, %v3303_v6, %v11957_v9 }
 0x6ad   : > { %6503 = vmatprep.subr.mxu1 %v4101_v16  ;;  %v4094_v26 = vsel %vm522_vm12, %v10878_v12, %v4058_v0  ;;  %v3305_v36 = vsel %vm522_vm12, %v3304_v20, %v11958_v54  ;;  %v11959_v12 = vld [vmem:[#allocation10_spill] sm:$0xff] }
 0x6ae   : > { %6504 = vmatpush1.msra.mxu1 %v4094_v26  ;;  %v3298_v30 = vsel %vm522_vm12, %v3297_v45, %v11959_v12 }
 0x6af   : > { %6505 = vmatprep.subr.mxu1 %v10913_v60  ;;  %v6471_v60 = vpop.permute.xlu0 %6470 }
 0x6b0   : > { %6506 = vmatpush1.msra.mxu1 %v10856_v31 }
 0x6b1   : > { %6507 = vmatprep.subr.mxu1 %v3305_v36 }
 0x6b2   : > { %6508 = vmatpush1.msra.mxu1 %v3298_v30 }
 0x6b3   : > { %6653 = vmatmul.mubr.msk.f32.vlgmr.msra.gmra.mxu1 %vm6473_vm0, %v6466_v25 }
 0x773   : > { %v6543_v57 = vpop.f32.mrf.mxu1 }
 0x774   : > { %v6544_v49 = vadd.f32 %v6543_v57, %v6471_v60 }
 0x775   : > { %v6545_v31 = vpop.f32.mrf.mxu1 }
 0x776   : > { %vm6548_vm1 = vcmp.ge.f32.partialorder %v6544_v49, 0.0  ;;  %v6550_v59 = vmul.f32 0.2, %v6544_v49  ;;  %v6546_v4 = vadd.f32 %v6545_v31, %v6471_v60 }
 0x778   : > { %v6552_v39 = vsel %vm6548_vm1, %v6544_v49, %v6550_v59  ;;  %vm6549_vm2 = vcmp.ge.f32.partialorder %v6546_v4, 0.0  ;;  %v6551_v22 = vmul.f32 0.2, %v6546_v4 }
 0x779   : > { %6554 = vst [vmem:[%s242_s8] sm:$0xff] %v6552_v39 }
 0x77a   : > { %v6553_v38 = vsel %vm6549_vm2, %v6546_v4, %v6551_v22 }
 0x77b   : > { %6555 = vst [vmem:[%s242_s8 + $0x8] sm:$0xff] %v6553_v38 }
 0x77c   : > { %6779 = shalt.err (!%p6776_p10)
}
 0x77d   : > { %s6780_s28 = scalar_lea.hbm %s11101_s11, 256  ;;  %s6784_s12 = scalar_lea.hbm %s11143_s5, 512 }
 0x77e   : > { %p6781_p0 = scmp.ne.s32.totalorder %s11101_s11, %s6780_s28  ;;  %p6785_p1 = scmp.lt.s32.totalorder %s11101_s11, %s11143_s5 }
 0x77f   : > { %p6786_p3 = scmp.lt.s32.totalorder %s6784_s12, %s6780_s28 }
 0x780   : > { %p6782_p2 = pnand %p6781_p0, %p11960_p12 }
 0x781   : > { %p6787_p6 = por %p6786_p3, %p6785_p1 }
 0x782   : > { %p6783_p9 = pneg %p6782_p2 }
 0x784   : > { %p6788_p11 = pnand %p6787_p6, %p6783_p9 }
 0x786   : > { %6791 = shalt.err (!%p6788_p11)
}
 0x787   : > { %6663 = dma.vmem_to_hbm [thread:$0]  (%p11960_p12), %s6572_s7, 256, %s11101_s11, %s6557_s13  }
 0x788 PF: > { %s6583_s16 = sand.u32 1, %s6818_s18   ;;  %p11961_p13 = scmp.ne.s32.totalorder %s11388_s6, 0 }
 0x789   : > { %p11962_p4 = scmp.ge.s32.totalorder %s6830_s21, 2  ;;  %s6584_s8 = scalar_lea.sflag [#allocation6], %s6583_s16 }
 0x78b   : > { %p6670_p5 = pnand %p11962_p4, %p11961_p13 }
 0x78d   : > { %p6671_p7 = pneg %p6670_p5 }
 0x78f   : > { %6813 = dma.done.wait (%p6671_p7), %s6584_s8, 256  }
 0x790   : > { %6815 = vsyncadd (%p6671_p7), %s6584_s8, 4294967040  ;;  %p18_p8 = scmp.ge.s32.totalorder %s6905_s24, 4   ;;  %s11963_s18 = smov %s6822_s19 }
 0x791   : > { %s11964_s19 = smov %s6826_s20  ;;  %s11965_s20 = smov %s6917_s27 }
 0x792   : > { %s11966_s21 = smov %s6905_s24  ;;  %20 = sbr.rel (!%p18_p8) target bundleno = 5 (0x5), region = 85 }
 0x797   :  { %6589 = vsyncpa [#allocation5], 1 }
 0x798   :  { %6591 = vsyncpa [#allocation5 + $0x1], 1 }
 0x799   :  { %6592 = vsyncpa [#allocation6], 1 }
 0x79a   :  { %6594 = vsyncpa [#allocation6 + $0x1], 1 }

</bundles_post_ra>
